<compile_context>
chip_gen: v7x
topology: tpu7x:2x2x1
jax: 0.10.0
libtpu: 0.0.40
codegen_flags: <defaults>
</compile_context>

<pallas_src>
import functools

import jax
import jax.numpy as jnp
import numpy as np
from jax.experimental import pallas as pl
from jax.experimental.pallas import tpu as pltpu


# ----------------------------------------------------------------------------
# Recurrent Pallas kernel: Tc LSTM+attention steps per grid iteration
# ----------------------------------------------------------------------------
def _make_decoder_step_kernel(n_layers, hidden, t_block, t_true):
    L, H, Tc = n_layers, hidden, t_block

    def kernel(*refs):
        # ---- unpack refs (order must match wrapper) ----
        gin_ref, enc_ref, h0_ref, c0_ref = refs[0:4]
        base = 4
        w_ih = refs[base:base + (L - 1)]; base += (L - 1)   # layers 1..L-1: (H, 4H)
        w_hh = refs[base:base + L]; base += L               # all layers   : (H, 4H)
        b_l = refs[base:base + (L - 1)]; base += (L - 1)    # layers 1..L-1: (1, 4H)
        wg_ref, bg_ref, woa_ref, boa_ref = refs[base:base + 4]; base += 4
        attout_ref, hfin_ref = refs[base:base + 2]; base += 2
        h_scr, c_scr = refs[base:base + 2]                  # VMEM scratch (L, B, H)

        blk = pl.program_id(0)

        # Load the initial recurrent state on the first grid step.
        @pl.when(blk == 0)
        def _init():
            h_scr[...] = h0_ref[...]
            c_scr[...] = c0_ref[...]

        # Hoist grid-invariant loads out of the per-step loop.
        whh = [w_hh[l][...] for l in range(L)]
        wih = [w_ih[l][...] for l in range(L - 1)]
        bl = [b_l[l][...] for l in range(L - 1)]
        wg = wg_ref[...]
        bg = bg_ref[...]
        woa_dec = woa_ref[0:H, :]                           # out_linear rows for dec_out
        woa_ctx = woa_ref[H:2 * H, :]                       # out_linear rows for context
        boa = boa_ref[...]
        enc = enc_ref[...]                                  # (B, S, H)

        for tc in range(Tc):
            t_glob = blk * Tc + tc                          # global time-step

            # ---- one LSTM time-step over all layers ----
            x = None
            for l in range(L):
                h_prev = h_scr[l]                           # (B, H)
                c_prev = c_scr[l]
                if l == 0:
                    # layer-0 input matmul + bias precomputed in the wrapper (OPT-1)
                    gates = gin_ref[tc] + jnp.dot(
                        h_prev, whh[0], preferred_element_type=jnp.float32)
                else:
                    gates = (jnp.dot(x, wih[l - 1], preferred_element_type=jnp.float32)
                             + jnp.dot(h_prev, whh[l], preferred_element_type=jnp.float32)
                             + bl[l - 1])                   # (B, 4H)
                i_g = jax.nn.sigmoid(gates[:, 0:H])
                f_g = jax.nn.sigmoid(gates[:, H:2 * H])
                g_g = jnp.tanh(gates[:, 2 * H:3 * H])
                o_g = jax.nn.sigmoid(gates[:, 3 * H:4 * H])
                c_new = f_g * c_prev + i_g * g_g
                h_new = o_g * jnp.tanh(c_new)
                # torch.clamp applies only to the state carried to the next step.
                h_scr[l] = jnp.clip(h_new, -50.0, 50.0)
                c_scr[l] = jnp.clip(c_new, -50.0, 50.0)
                x = h_new                                   # un-clamped input to next layer

            dec_out = x                                     # (B, H) top-layer output

            # ---- global attention ----
            scores = jnp.dot(dec_out, wg, preferred_element_type=jnp.float32) + bg
            scores = scores - jnp.max(scores, axis=1, keepdims=True)
            e = jnp.exp(scores)
            inv = pl.reciprocal(jnp.sum(e, axis=1, keepdims=True), approx=True)  # OPT-6
            att = e * inv                                   # (B, S) softmax

            # context via batched MXU matmul instead of broadcast-mul + reduce (OPT-5)
            ctx = jnp.einsum('bqs,bsh->bqh', att[:, None, :], enc,
                             preferred_element_type=jnp.float32)[:, 0, :]   # (B, H)

            # out_linear on concat([dec_out, ctx]) as two matmuls (avoids lane concat)
            att_pre = (jnp.dot(dec_out, woa_dec, preferred_element_type=jnp.float32)
                       + jnp.dot(ctx, woa_ctx, preferred_element_type=jnp.float32)
                       + boa)
            attout_ref[tc] = jnp.tanh(att_pre)              # (B, H)

            # ---- final recurrent state only at the true last step (OPT-4) ----
            @pl.when(t_glob == t_true - 1)
            def _store_final():
                hfin_ref[...] = h_scr[...]

    return kernel


# ----------------------------------------------------------------------------
# Hoisted vocab projection kernel: dense (Tc*B, H) @ (H, V) per time-block (OPT-2)
# ----------------------------------------------------------------------------
def _make_vocab_proj_kernel(t_block, batch, hidden, vocab):
    Tc, B, H, V = t_block, batch, hidden, vocab

    def kernel(x_ref, w_ref, b_ref, o_ref):
        x = x_ref[...].reshape(Tc * B, H)
        y = jnp.dot(x, w_ref[...], preferred_element_type=jnp.float32) + b_ref[...]
        o_ref[...] = y.reshape(Tc, B, V)

    return kernel


# ----------------------------------------------------------------------------
# Wrapper (glue: embedding gather, teacher-forced inputs, pallas_call setup)
# ----------------------------------------------------------------------------
def decoder_forward(params, encoder_output, h0, c0, target_tensor, *,
                    max_len, n_layers, hidden, sos_token=0, t_block=8):
    B = h0.shape[1]
    H = hidden
    L = n_layers
    T = max_len + 1
    V = params["w_out"].shape[1]

    Tc = min(t_block, T)                       # time-steps per grid iteration (OPT-3)
    n_blocks = -(-T // Tc)
    T_pad = n_blocks * Tc                      # pad T up; extra steps are sliced off

    # teacher_forcing_ratio == 1 -> deterministic teacher-forced inputs.
    sos = jnp.full((B, 1), sos_token, dtype=jnp.int32)
    tokens = jnp.concatenate([sos, target_tensor[:, :max_len].astype(jnp.int32)], axis=1)
    if T_pad > T:
        tokens = jnp.concatenate(
            [tokens, jnp.full((B, T_pad - T), sos_token, jnp.int32)], axis=1)
    embed_all = jnp.transpose(params["embedding"][tokens], (1, 0, 2))   # (T_pad, B, E)

    # OPT-1: layer-0 input-to-hidden matmul + bias as one dense batched matmul.
    gin_all = (jnp.einsum('tbe,ef->tbf', embed_all, params["w_ih"][0])
               + params["b_lstm"][0])                                    # (T_pad, B, 4H)

    def full_spec(arr):
        nd = arr.ndim
        return pl.BlockSpec(arr.shape, lambda t, _nd=nd: (0,) * _nd)

    weight_arrays = (list(params["w_ih"][1:]) + list(params["w_hh"])
                     + list(params["b_lstm"][1:])
                     + [params["w_g"], params["b_g"],
                        params["w_att_out"], params["b_att_out"]])

    ins = [gin_all, encoder_output, h0, c0] + weight_arrays
    in_specs = ([pl.BlockSpec((Tc, B, 4 * H), lambda t: (t, 0, 0)),
                 full_spec(encoder_output), full_spec(h0), full_spec(c0)]
                + [full_spec(a) for a in weight_arrays])

    out_shapes = (jax.ShapeDtypeStruct((T_pad, B, H), jnp.float32),
                  jax.ShapeDtypeStruct((L, B, H), jnp.float32))
    out_specs = [pl.BlockSpec((Tc, B, H), lambda t: (t, 0, 0)),
                 pl.BlockSpec((L, B, H), lambda t: (0, 0, 0))]

    step_kernel = _make_decoder_step_kernel(L, H, Tc, T)

    attout_all, h_final = pl.pallas_call(
        step_kernel,
        out_shape=out_shapes,
        grid_spec=pltpu.PrefetchScalarGridSpec(
            num_scalar_prefetch=0,
            grid=(n_blocks,),
            in_specs=in_specs,
            out_specs=out_specs,
            scratch_shapes=[pltpu.VMEM((L, B, H), jnp.float32),
                            pltpu.VMEM((L, B, H), jnp.float32)]),
        compiler_params=pltpu.CompilerParams(dimension_semantics=("arbitrary",)),
    )(*ins)

    # OPT-2: hoisted vocab projection (time-parallel; 2x TCs on v7x for this stage).
    proj_kernel = _make_vocab_proj_kernel(Tc, B, H, V)
    logits_all = pl.pallas_call(
        proj_kernel,
        out_shape=jax.ShapeDtypeStruct((T_pad, B, V), jnp.float32),
        grid_spec=pltpu.PrefetchScalarGridSpec(
            num_scalar_prefetch=0,
            grid=(n_blocks,),
            in_specs=[pl.BlockSpec((Tc, B, H), lambda t: (t, 0, 0)),
                      full_spec(params["w_out"]),
                      full_spec(params["b_out"])],
            out_specs=pl.BlockSpec((Tc, B, V), lambda t: (t, 0, 0))),
        compiler_params=pltpu.CompilerParams(dimension_semantics=("parallel",)),
    )(attout_all, params["w_out"], params["b_out"])

    decoder_outputs = jnp.transpose(logits_all[:T], (1, 0, 2))   # (B, T, V) batch-first
    return decoder_outputs, h_final, None


# ----------------------------------------------------------------------------
# Deterministic parameter init (synthetic weights; shapes from the module)
# ----------------------------------------------------------------------------
def init_params(key, vocab, embed, hidden, n_layers, max_len):
    n_keys = 1 + 3 * n_layers + 3
    keys = list(jax.random.split(key, n_keys))
    ki = iter(keys)

    def u(shape, scale=0.1):
        return jax.random.uniform(next(ki), shape, jnp.float32, -scale, scale)

    params = {}
    emb = u((vocab, embed))
    emb = emb.at[2].set(0.0)                             # padding_idx=2 row is zero
    params["embedding"] = emb

    w_ih, w_hh, b_lstm = [], [], []
    for l in range(n_layers):
        in_dim = embed if l == 0 else hidden
        w_ih.append(u((in_dim, 4 * hidden)))             # stored transposed: y = x @ W
        w_hh.append(u((hidden, 4 * hidden)))
        b_lstm.append(u((1, 4 * hidden)))                # combined b_ih + b_hh
    params["w_ih"], params["w_hh"], params["b_lstm"] = w_ih, w_hh, b_lstm

    params["w_g"] = u((hidden, max_len))                 # Attention.global_linear
    params["b_g"] = jnp.zeros((1, max_len), jnp.float32)
    params["w_att_out"] = u((2 * hidden, hidden))        # Attention.out_linear
    params["b_att_out"] = jnp.zeros((1, hidden), jnp.float32)
    params["w_out"] = u((hidden, vocab))                 # Decoder.out
    params["b_out"] = jnp.zeros((1, vocab), jnp.float32)
    return params


# ----------------------------------------------------------------------------
# Pure-JAX reference (same math, Python time loop) for a correctness check
# ----------------------------------------------------------------------------
def decoder_forward_ref(params, encoder_output, h0, c0, target_tensor, *,
                        max_len, n_layers, hidden, sos_token=0):
    B = h0.shape[1]
    H = hidden
    h, c = h0, c0
    outs = []
    tok = jnp.full((B,), sos_token, jnp.int32)
    for i in range(max_len + 1):
        inp = params["embedding"][tok]
        new_h, new_c = [], []
        for l in range(n_layers):
            gates = inp @ params["w_ih"][l] + h[l] @ params["w_hh"][l] + params["b_lstm"][l]
            i_g = jax.nn.sigmoid(gates[:, :H])
            f_g = jax.nn.sigmoid(gates[:, H:2 * H])
            g_g = jnp.tanh(gates[:, 2 * H:3 * H])
            o_g = jax.nn.sigmoid(gates[:, 3 * H:])
            c_new = f_g * c[l] + i_g * g_g
            h_new = o_g * jnp.tanh(c_new)
            new_h.append(jnp.clip(h_new, -50.0, 50.0))
            new_c.append(jnp.clip(c_new, -50.0, 50.0))
            inp = h_new
        h, c = jnp.stack(new_h), jnp.stack(new_c)
        dec_out = inp
        att = jax.nn.softmax(dec_out @ params["w_g"] + params["b_g"], axis=1)
        ctx = jnp.sum(encoder_output * att[:, :, None], axis=1)
        att_out = jnp.tanh(jnp.concatenate([dec_out, ctx], axis=1) @ params["w_att_out"]
                           + params["b_att_out"])
        outs.append(att_out @ params["w_out"] + params["b_out"])
        tok = target_tensor[:, i].astype(jnp.int32)
    return jnp.stack(outs, axis=1), h, None


# ----------------------------------------------------------------------------
if __name__ == "__main__":
    V, E, H, B, L, MAXLEN = 16, 8, 32, 2, 2, 8          # small shapes consistent w/ module
    key = jax.random.PRNGKey(0)
    kp, kenc, kh, kc, ktgt = jax.random.split(key, 5)

    params = init_params(kp, V, E, H, L, MAXLEN)
    encoder_output = jax.random.normal(kenc, (B, MAXLEN, H), jnp.float32)  # seq == max_len
    h0 = jax.random.normal(kh, (L, B, H), jnp.float32)
    c0 = jax.random.normal(kc, (L, B, H), jnp.float32)
    target = jax.random.randint(ktgt, (B, MAXLEN + 1), 0, V, jnp.int32)

    fwd = functools.partial(decoder_forward, max_len=MAXLEN, n_layers=L, hidden=H)
    dec, h_fin, _ = fwd(params, encoder_output, h0, c0, target)
    jax.block_until_ready(dec)
    jax.block_until_ready(h_fin)

    dec_ref, h_ref, _ = decoder_forward_ref(params, encoder_output, h0, c0, target,
                                            max_len=MAXLEN, n_layers=L, hidden=H)
    # approx-reciprocal softmax in the kernel -> slightly looser tolerance on the logits
    assert np.allclose(np.asarray(dec), np.asarray(dec_ref), atol=1e-2, rtol=1e-2)
    assert np.allclose(np.asarray(h_fin), np.asarray(h_ref), atol=1e-3, rtol=1e-3)
    print("KERNEL_OK")
</pallas_src>

<mosaic_0001>
module attributes {stable_mosaic.version = 11 : i64} {
  func.func @kernel(%arg0: i32, %arg1: memref<8x2x128xf32, #tpu.memory_space<vmem>>, %arg2: memref<2x8x32xf32, #tpu.memory_space<vmem>>, %arg3: memref<2x2x32xf32, #tpu.memory_space<vmem>>, %arg4: memref<2x2x32xf32, #tpu.memory_space<vmem>>, %arg5: memref<32x128xf32, #tpu.memory_space<vmem>>, %arg6: memref<32x128xf32, #tpu.memory_space<vmem>>, %arg7: memref<32x128xf32, #tpu.memory_space<vmem>>, %arg8: memref<1x128xf32, #tpu.memory_space<vmem>>, %arg9: memref<32x8xf32, #tpu.memory_space<vmem>>, %arg10: memref<1x8xf32, #tpu.memory_space<vmem>>, %arg11: memref<64x32xf32, #tpu.memory_space<vmem>>, %arg12: memref<1x32xf32, #tpu.memory_space<vmem>>, %arg13: memref<8x2x32xf32, #tpu.memory_space<vmem>>, %arg14: memref<2x2x32xf32, #tpu.memory_space<vmem>>, %arg15: memref<2x2x32xf32, #tpu.memory_space<vmem>>, %arg16: memref<2x2x32xf32, #tpu.memory_space<vmem>>) attributes {dimension_semantics = [#tpu.dimension_semantics<arbitrary>], iteration_bounds = array<i64: 2>, scalar_prefetch = 0 : i64, scratch_operands = 2 : i64, tpu.core_type = #tpu.core_type<tc>, window_params = [{transform_indices = @transform_0, window_bounds = array<i64: 8, 2, 128>}, {pipeline_mode = #tpu.pipeline_mode<synchronous>, transform_indices = @transform_1, window_bounds = array<i64: 2, 8, 32>}, {pipeline_mode = #tpu.pipeline_mode<synchronous>, transform_indices = @transform_2, window_bounds = array<i64: 2, 2, 32>}, {pipeline_mode = #tpu.pipeline_mode<synchronous>, transform_indices = @transform_3, window_bounds = array<i64: 2, 2, 32>}, {pipeline_mode = #tpu.pipeline_mode<synchronous>, transform_indices = @transform_4, window_bounds = array<i64: 32, 128>}, {pipeline_mode = #tpu.pipeline_mode<synchronous>, transform_indices = @transform_5, window_bounds = array<i64: 32, 128>}, {pipeline_mode = #tpu.pipeline_mode<synchronous>, transform_indices = @transform_6, window_bounds = array<i64: 32, 128>}, {pipeline_mode = #tpu.pipeline_mode<synchronous>, transform_indices = @transform_7, window_bounds = array<i64: 1, 128>}, {pipeline_mode = #tpu.pipeline_mode<synchronous>, transform_indices = @transform_8, window_bounds = array<i64: 32, 8>}, {pipeline_mode = #tpu.pipeline_mode<synchronous>, transform_indices = @transform_9, window_bounds = array<i64: 1, 8>}, {pipeline_mode = #tpu.pipeline_mode<synchronous>, transform_indices = @transform_10, window_bounds = array<i64: 64, 32>}, {pipeline_mode = #tpu.pipeline_mode<synchronous>, transform_indices = @transform_11, window_bounds = array<i64: 1, 32>}, {transform_indices = @transform_12, window_bounds = array<i64: 8, 2, 32>}, {pipeline_mode = #tpu.pipeline_mode<synchronous>, transform_indices = @transform_13, window_bounds = array<i64: 2, 2, 32>}]} {
    %c0_i32 = arith.constant 0 : i32
    %0 = arith.cmpi eq, %arg0, %c0_i32 : i32
    %1 = arith.extui %0 : i1 to i32
    %c0_i32_0 = arith.constant 0 : i32
    %2 = arith.cmpi ne, %1, %c0_i32_0 : i32
    scf.if %2 {
      %c0_460 = arith.constant 0 : index
      %c0_461 = arith.constant 0 : index
      %c0_462 = arith.constant 0 : index
      %1013 = vector.load %arg3[%c0_460, %c0_461, %c0_462] : memref<2x2x32xf32, #tpu.memory_space<vmem>>, vector<2x2x32xf32>
      %c0_463 = arith.constant 0 : index
      %c0_464 = arith.constant 0 : index
      %c0_465 = arith.constant 0 : index
      %1014 = vector.load %arg15[%c0_463, %c0_464, %c0_465] : memref<2x2x32xf32, #tpu.memory_space<vmem>>, vector<2x2x32xf32>
      tpu.vector_store %arg15[%c0_463, %c0_464, %c0_465], %1013 {strides = array<i32>} : memref<2x2x32xf32, #tpu.memory_space<vmem>>, vector<2x2x32xf32>,
      %c0_466 = arith.constant 0 : index
      %c0_467 = arith.constant 0 : index
      %c0_468 = arith.constant 0 : index
      %1015 = vector.load %arg4[%c0_466, %c0_467, %c0_468] : memref<2x2x32xf32, #tpu.memory_space<vmem>>, vector<2x2x32xf32>
      %c0_469 = arith.constant 0 : index
      %c0_470 = arith.constant 0 : index
      %c0_471 = arith.constant 0 : index
      %1016 = vector.load %arg16[%c0_469, %c0_470, %c0_471] : memref<2x2x32xf32, #tpu.memory_space<vmem>>, vector<2x2x32xf32>
      tpu.vector_store %arg16[%c0_469, %c0_470, %c0_471], %1015 {strides = array<i32>} : memref<2x2x32xf32, #tpu.memory_space<vmem>>, vector<2x2x32xf32>,
    } else {
    }
    %c0 = arith.constant 0 : index
    %c0_1 = arith.constant 0 : index
    %3 = vector.load %arg6[%c0, %c0_1] : memref<32x128xf32, #tpu.memory_space<vmem>>, vector<32x128xf32>
    %c0_2 = arith.constant 0 : index
    %c0_3 = arith.constant 0 : index
    %4 = vector.load %arg7[%c0_2, %c0_3] : memref<32x128xf32, #tpu.memory_space<vmem>>, vector<32x128xf32>
    %c0_4 = arith.constant 0 : index
    %c0_5 = arith.constant 0 : index
    %5 = vector.load %arg5[%c0_4, %c0_5] : memref<32x128xf32, #tpu.memory_space<vmem>>, vector<32x128xf32>
    %c0_6 = arith.constant 0 : index
    %c0_7 = arith.constant 0 : index
    %6 = vector.load %arg8[%c0_6, %c0_7] : memref<1x128xf32, #tpu.memory_space<vmem>>, vector<1x128xf32>
    %c0_8 = arith.constant 0 : index
    %c0_9 = arith.constant 0 : index
    %7 = vector.load %arg9[%c0_8, %c0_9] : memref<32x8xf32, #tpu.memory_space<vmem>>, vector<32x8xf32>
    %c0_10 = arith.constant 0 : index
    %c0_11 = arith.constant 0 : index
    %8 = vector.load %arg10[%c0_10, %c0_11] : memref<1x8xf32, #tpu.memory_space<vmem>>, vector<1x8xf32>
    %c0_12 = arith.constant 0 : index
    %c0_13 = arith.constant 0 : index
    %9 = vector.load %arg11[%c0_12, %c0_13] : memref<64x32xf32, #tpu.memory_space<vmem>>, vector<32x32xf32>
    %c32 = arith.constant 32 : index
    %c0_14 = arith.constant 0 : index
    %10 = vector.load %arg11[%c32, %c0_14] : memref<64x32xf32, #tpu.memory_space<vmem>>, vector<32x32xf32>
    %c0_15 = arith.constant 0 : index
    %c0_16 = arith.constant 0 : index
    %11 = vector.load %arg12[%c0_15, %c0_16] : memref<1x32xf32, #tpu.memory_space<vmem>>, vector<1x32xf32>
    %c0_17 = arith.constant 0 : index
    %c0_18 = arith.constant 0 : index
    %c0_19 = arith.constant 0 : index
    %12 = vector.load %arg2[%c0_17, %c0_18, %c0_19] : memref<2x8x32xf32, #tpu.memory_space<vmem>>, vector<2x8x32xf32>
    %c8_i32 = arith.constant 8 : i32
    %13 = arith.muli %arg0, %c8_i32 : i32
    %c0_i32_20 = arith.constant 0 : i32
    %14 = arith.addi %13, %c0_i32_20 : i32
    %c0_21 = arith.constant 0 : index
    %c0_22 = arith.constant 0 : index
    %c0_23 = arith.constant 0 : index
    %15 = vector.load %arg15[%c0_21, %c0_22, %c0_23] : memref<2x2x32xf32, #tpu.memory_space<vmem>>, vector<1x2x32xf32>
    %16 = vector.shape_cast %15 : vector<1x2x32xf32> to vector<2x32xf32>
    %c0_24 = arith.constant 0 : index
    %c0_25 = arith.constant 0 : index
    %c0_26 = arith.constant 0 : index
    %17 = vector.load %arg16[%c0_24, %c0_25, %c0_26] : memref<2x2x32xf32, #tpu.memory_space<vmem>>, vector<1x2x32xf32>
    %18 = vector.shape_cast %17 : vector<1x2x32xf32> to vector<2x32xf32>
    %c0_27 = arith.constant 0 : index
    %c0_28 = arith.constant 0 : index
    %c0_29 = arith.constant 0 : index
    %19 = vector.load %arg1[%c0_27, %c0_28, %c0_29] : memref<8x2x128xf32, #tpu.memory_space<vmem>>, vector<1x2x128xf32>
    %20 = vector.shape_cast %19 : vector<1x2x128xf32> to vector<2x128xf32>
    %cst = arith.constant dense<0.000000e+00> : vector<2x128xf32>
    %21 = tpu.matmul %16, %3, %cst {dimension_numbers = #tpu.dot_dimension_numbers<[1], [0], [0], [1], [0, 0, 1, 1], [], []>} : vector<2x32xf32>, vector<32x128xf32>, vector<2x128xf32> -> vector<2x128xf32>
    %22 = arith.addf %20, %21 : vector<2x128xf32>
    %23 = vector.extract_strided_slice %22 {offsets = [0, 0], sizes = [2, 32], strides = [1, 1]} : vector<2x128xf32> to vector<2x32xf32>
    %24 = arith.negf %23 : vector<2x32xf32>
    %25 = math.exp %24 : vector<2x32xf32>
    %cst_30 = arith.constant 1.000000e+00 : f32
    %26 = vector.broadcast %cst_30 : f32 to vector<2x32xf32>
    %27 = arith.addf %26, %25 : vector<2x32xf32>
    %28 = arith.divf %26, %27 : vector<2x32xf32>
    %29 = vector.extract_strided_slice %22 {offsets = [0, 32], sizes = [2, 32], strides = [1, 1]} : vector<2x128xf32> to vector<2x32xf32>
    %30 = arith.negf %29 : vector<2x32xf32>
    %31 = math.exp %30 : vector<2x32xf32>
    %cst_31 = arith.constant 1.000000e+00 : f32
    %32 = vector.broadcast %cst_31 : f32 to vector<2x32xf32>
    %33 = arith.addf %32, %31 : vector<2x32xf32>
    %34 = arith.divf %32, %33 : vector<2x32xf32>
    %35 = vector.extract_strided_slice %22 {offsets = [0, 64], sizes = [2, 32], strides = [1, 1]} : vector<2x128xf32> to vector<2x32xf32>
    %36 = math.tanh %35 : vector<2x32xf32>
    %37 = vector.extract_strided_slice %22 {offsets = [0, 96], sizes = [2, 32], strides = [1, 1]} : vector<2x128xf32> to vector<2x32xf32>
    %38 = arith.negf %37 : vector<2x32xf32>
    %39 = math.exp %38 : vector<2x32xf32>
    %cst_32 = arith.constant 1.000000e+00 : f32
    %40 = vector.broadcast %cst_32 : f32 to vector<2x32xf32>
    %41 = arith.addf %40, %39 : vector<2x32xf32>
    %42 = arith.divf %40, %41 : vector<2x32xf32>
    %43 = arith.mulf %34, %18 : vector<2x32xf32>
    %44 = arith.mulf %28, %36 : vector<2x32xf32>
    %45 = arith.addf %43, %44 : vector<2x32xf32>
    %46 = math.tanh %45 : vector<2x32xf32>
    %47 = arith.mulf %42, %46 : vector<2x32xf32>
    %cst_33 = arith.constant -5.000000e+01 : f32
    %cst_34 = arith.constant 5.000000e+01 : f32
    %48 = vector.broadcast %cst_33 : f32 to vector<2x32xf32>
    %49 = arith.maximumf %48, %47 : vector<2x32xf32>
    %50 = vector.broadcast %cst_34 : f32 to vector<2x32xf32>
    %51 = arith.minimumf %50, %49 : vector<2x32xf32>
    %c0_35 = arith.constant 0 : index
    %c0_36 = arith.constant 0 : index
    %c0_37 = arith.constant 0 : index
    %52 = vector.load %arg15[%c0_35, %c0_36, %c0_37] : memref<2x2x32xf32, #tpu.memory_space<vmem>>, vector<1x2x32xf32>
    %53 = vector.shape_cast %52 : vector<1x2x32xf32> to vector<2x32xf32>
    %54 = vector.shape_cast %51 : vector<2x32xf32> to vector<1x2x32xf32>
    tpu.vector_store %arg15[%c0_35, %c0_36, %c0_37], %54 {strides = array<i32>} : memref<2x2x32xf32, #tpu.memory_space<vmem>>, vector<1x2x32xf32>,
    %cst_38 = arith.constant -5.000000e+01 : f32
    %cst_39 = arith.constant 5.000000e+01 : f32
    %55 = vector.broadcast %cst_38 : f32 to vector<2x32xf32>
    %56 = arith.maximumf %55, %45 : vector<2x32xf32>
    %57 = vector.broadcast %cst_39 : f32 to vector<2x32xf32>
    %58 = arith.minimumf %57, %56 : vector<2x32xf32>
    %c0_40 = arith.constant 0 : index
    %c0_41 = arith.constant 0 : index
    %c0_42 = arith.constant 0 : index
    %59 = vector.load %arg16[%c0_40, %c0_41, %c0_42] : memref<2x2x32xf32, #tpu.memory_space<vmem>>, vector<1x2x32xf32>
    %60 = vector.shape_cast %59 : vector<1x2x32xf32> to vector<2x32xf32>
    %61 = vector.shape_cast %58 : vector<2x32xf32> to vector<1x2x32xf32>
    tpu.vector_store %arg16[%c0_40, %c0_41, %c0_42], %61 {strides = array<i32>} : memref<2x2x32xf32, #tpu.memory_space<vmem>>, vector<1x2x32xf32>,
    %c1 = arith.constant 1 : index
    %c0_43 = arith.constant 0 : index
    %c0_44 = arith.constant 0 : index
    %62 = vector.load %arg15[%c1, %c0_43, %c0_44] : memref<2x2x32xf32, #tpu.memory_space<vmem>>, vector<1x2x32xf32>
    %63 = vector.shape_cast %62 : vector<1x2x32xf32> to vector<2x32xf32>
    %c1_45 = arith.constant 1 : index
    %c0_46 = arith.constant 0 : index
    %c0_47 = arith.constant 0 : index
    %64 = vector.load %arg16[%c1_45, %c0_46, %c0_47] : memref<2x2x32xf32, #tpu.memory_space<vmem>>, vector<1x2x32xf32>
    %65 = vector.shape_cast %64 : vector<1x2x32xf32> to vector<2x32xf32>
    %cst_48 = arith.constant dense<0.000000e+00> : vector<2x128xf32>
    %66 = tpu.matmul %47, %5, %cst_48 {dimension_numbers = #tpu.dot_dimension_numbers<[1], [0], [0], [1], [0, 0, 1, 1], [], []>} : vector<2x32xf32>, vector<32x128xf32>, vector<2x128xf32> -> vector<2x128xf32>
    %cst_49 = arith.constant dense<0.000000e+00> : vector<2x128xf32>
    %67 = tpu.matmul %63, %4, %cst_49 {dimension_numbers = #tpu.dot_dimension_numbers<[1], [0], [0], [1], [0, 0, 1, 1], [], []>} : vector<2x32xf32>, vector<32x128xf32>, vector<2x128xf32> -> vector<2x128xf32>
    %68 = arith.addf %66, %67 : vector<2x128xf32>
    %69 = vector.broadcast %6 : vector<1x128xf32> to vector<2x128xf32>
    %70 = arith.addf %68, %69 : vector<2x128xf32>
    %71 = vector.extract_strided_slice %70 {offsets = [0, 0], sizes = [2, 32], strides = [1, 1]} : vector<2x128xf32> to vector<2x32xf32>
    %72 = arith.negf %71 : vector<2x32xf32>
    %73 = math.exp %72 : vector<2x32xf32>
    %cst_50 = arith.constant 1.000000e+00 : f32
    %74 = vector.broadcast %cst_50 : f32 to vector<2x32xf32>
    %75 = arith.addf %74, %73 : vector<2x32xf32>
    %76 = arith.divf %74, %75 : vector<2x32xf32>
    %77 = vector.extract_strided_slice %70 {offsets = [0, 32], sizes = [2, 32], strides = [1, 1]} : vector<2x128xf32> to vector<2x32xf32>
    %78 = arith.negf %77 : vector<2x32xf32>
    %79 = math.exp %78 : vector<2x32xf32>
    %cst_51 = arith.constant 1.000000e+00 : f32
    %80 = vector.broadcast %cst_51 : f32 to vector<2x32xf32>
    %81 = arith.addf %80, %79 : vector<2x32xf32>
    %82 = arith.divf %80, %81 : vector<2x32xf32>
    %83 = vector.extract_strided_slice %70 {offsets = [0, 64], sizes = [2, 32], strides = [1, 1]} : vector<2x128xf32> to vector<2x32xf32>
    %84 = math.tanh %83 : vector<2x32xf32>
    %85 = vector.extract_strided_slice %70 {offsets = [0, 96], sizes = [2, 32], strides = [1, 1]} : vector<2x128xf32> to vector<2x32xf32>
    %86 = arith.negf %85 : vector<2x32xf32>
    %87 = math.exp %86 : vector<2x32xf32>
    %cst_52 = arith.constant 1.000000e+00 : f32
    %88 = vector.broadcast %cst_52 : f32 to vector<2x32xf32>
    %89 = arith.addf %88, %87 : vector<2x32xf32>
    %90 = arith.divf %88, %89 : vector<2x32xf32>
    %91 = arith.mulf %82, %65 : vector<2x32xf32>
    %92 = arith.mulf %76, %84 : vector<2x32xf32>
    %93 = arith.addf %91, %92 : vector<2x32xf32>
    %94 = math.tanh %93 : vector<2x32xf32>
    %95 = arith.mulf %90, %94 : vector<2x32xf32>
    %cst_53 = arith.constant -5.000000e+01 : f32
    %cst_54 = arith.constant 5.000000e+01 : f32
    %96 = vector.broadcast %cst_53 : f32 to vector<2x32xf32>
    %97 = arith.maximumf %96, %95 : vector<2x32xf32>
    %98 = vector.broadcast %cst_54 : f32 to vector<2x32xf32>
    %99 = arith.minimumf %98, %97 : vector<2x32xf32>
    %c1_55 = arith.constant 1 : index
    %c0_56 = arith.constant 0 : index
    %c0_57 = arith.constant 0 : index
    %100 = vector.load %arg15[%c1_55, %c0_56, %c0_57] : memref<2x2x32xf32, #tpu.memory_space<vmem>>, vector<1x2x32xf32>
    %101 = vector.shape_cast %100 : vector<1x2x32xf32> to vector<2x32xf32>
    %102 = vector.shape_cast %99 : vector<2x32xf32> to vector<1x2x32xf32>
    tpu.vector_store %arg15[%c1_55, %c0_56, %c0_57], %102 {strides = array<i32>} : memref<2x2x32xf32, #tpu.memory_space<vmem>>, vector<1x2x32xf32>,
    %cst_58 = arith.constant -5.000000e+01 : f32
    %cst_59 = arith.constant 5.000000e+01 : f32
    %103 = vector.broadcast %cst_58 : f32 to vector<2x32xf32>
    %104 = arith.maximumf %103, %93 : vector<2x32xf32>
    %105 = vector.broadcast %cst_59 : f32 to vector<2x32xf32>
    %106 = arith.minimumf %105, %104 : vector<2x32xf32>
    %c1_60 = arith.constant 1 : index
    %c0_61 = arith.constant 0 : index
    %c0_62 = arith.constant 0 : index
    %107 = vector.load %arg16[%c1_60, %c0_61, %c0_62] : memref<2x2x32xf32, #tpu.memory_space<vmem>>, vector<1x2x32xf32>
    %108 = vector.shape_cast %107 : vector<1x2x32xf32> to vector<2x32xf32>
    %109 = vector.shape_cast %106 : vector<2x32xf32> to vector<1x2x32xf32>
    tpu.vector_store %arg16[%c1_60, %c0_61, %c0_62], %109 {strides = array<i32>} : memref<2x2x32xf32, #tpu.memory_space<vmem>>, vector<1x2x32xf32>,
    %cst_63 = arith.constant dense<0.000000e+00> : vector<2x8xf32>
    %110 = tpu.matmul %95, %7, %cst_63 {dimension_numbers = #tpu.dot_dimension_numbers<[1], [0], [0], [1], [0, 0, 1, 1], [], []>} : vector<2x32xf32>, vector<32x8xf32>, vector<2x8xf32> -> vector<2x8xf32>
    %111 = vector.broadcast %8 : vector<1x8xf32> to vector<2x8xf32>
    %112 = arith.addf %110, %111 : vector<2x8xf32>
    %cst_64 = arith.constant dense<0xFF800000> : vector<2xf32>
    %113 = vector.multi_reduction <maximumf>, %112, %cst_64 [1] : vector<2x8xf32> to vector<2xf32>
    %114 = vector.shape_cast %113 : vector<2xf32> to vector<2x1xf32>
    %115 = vector.broadcast %114 : vector<2x1xf32> to vector<2x8xf32>
    %116 = arith.subf %112, %115 : vector<2x8xf32>
    %117 = math.exp %116 : vector<2x8xf32>
    %cst_65 = arith.constant dense<0.000000e+00> : vector<2xf32>
    %118 = vector.multi_reduction <add>, %117, %cst_65 [1] : vector<2x8xf32> to vector<2xf32>
    %119 = vector.shape_cast %118 : vector<2xf32> to vector<2x1xf32>
    %120 = tpu.reciprocal %119 {approx = true} : vector<2x1xf32> -> vector<2x1xf32>
    %121 = vector.broadcast %120 : vector<2x1xf32> to vector<2x8xf32>
    %122 = arith.mulf %117, %121 : vector<2x8xf32>
    %123 = vector.shape_cast %122 : vector<2x8xf32> to vector<2x1x8xf32>
    "tpu.trace_start"() <{level = 10 : i32, message = "bqs,bsh->bqh"}> : () -> ()
    %cst_66 = arith.constant dense<0.000000e+00> : vector<2x1x32xf32>
    %124 = tpu.matmul %123, %12, %cst_66 {dimension_numbers = #tpu.dot_dimension_numbers<[2], [1], [1], [2], [0, 0, 0, 1, 1, 2], [0], [0]>} : vector<2x1x8xf32>, vector<2x8x32xf32>, vector<2x1x32xf32> -> vector<2x1x32xf32>
    "tpu.trace_stop"() : () -> ()
    %125 = vector.shape_cast %124 : vector<2x1x32xf32> to vector<2x32xf32>
    %cst_67 = arith.constant dense<0.000000e+00> : vector<2x32xf32>
    %126 = tpu.matmul %95, %9, %cst_67 {dimension_numbers = #tpu.dot_dimension_numbers<[1], [0], [0], [1], [0, 0, 1, 1], [], []>} : vector<2x32xf32>, vector<32x32xf32>, vector<2x32xf32> -> vector<2x32xf32>
    %cst_68 = arith.constant dense<0.000000e+00> : vector<2x32xf32>
    %127 = tpu.matmul %125, %10, %cst_68 {dimension_numbers = #tpu.dot_dimension_numbers<[1], [0], [0], [1], [0, 0, 1, 1], [], []>} : vector<2x32xf32>, vector<32x32xf32>, vector<2x32xf32> -> vector<2x32xf32>
    %128 = arith.addf %126, %127 : vector<2x32xf32>
    %129 = vector.broadcast %11 : vector<1x32xf32> to vector<2x32xf32>
    %130 = arith.addf %128, %129 : vector<2x32xf32>
    %131 = math.tanh %130 : vector<2x32xf32>
    %c0_69 = arith.constant 0 : index
    %c0_70 = arith.constant 0 : index
    %c0_71 = arith.constant 0 : index
    %132 = vector.load %arg13[%c0_69, %c0_70, %c0_71] : memref<8x2x32xf32, #tpu.memory_space<vmem>>, vector<1x2x32xf32>
    %133 = vector.shape_cast %132 : vector<1x2x32xf32> to vector<2x32xf32>
    %134 = vector.shape_cast %131 : vector<2x32xf32> to vector<1x2x32xf32>
    tpu.vector_store %arg13[%c0_69, %c0_70, %c0_71], %134 {strides = array<i32>} : memref<8x2x32xf32, #tpu.memory_space<vmem>>, vector<1x2x32xf32>,
    %c8_i32_72 = arith.constant 8 : i32
    %135 = arith.cmpi eq, %14, %c8_i32_72 : i32
    %136 = arith.extui %135 : i1 to i32
    %c0_i32_73 = arith.constant 0 : i32
    %137 = arith.cmpi ne, %136, %c0_i32_73 : i32
    scf.if %137 {
      %c0_460 = arith.constant 0 : index
      %c0_461 = arith.constant 0 : index
      %c0_462 = arith.constant 0 : index
      %1013 = vector.load %arg15[%c0_460, %c0_461, %c0_462] : memref<2x2x32xf32, #tpu.memory_space<vmem>>, vector<2x2x32xf32>
      %c0_463 = arith.constant 0 : index
      %c0_464 = arith.constant 0 : index
      %c0_465 = arith.constant 0 : index
      %1014 = vector.load %arg14[%c0_463, %c0_464, %c0_465] : memref<2x2x32xf32, #tpu.memory_space<vmem>>, vector<2x2x32xf32>
      tpu.vector_store %arg14[%c0_463, %c0_464, %c0_465], %1013 {strides = array<i32>} : memref<2x2x32xf32, #tpu.memory_space<vmem>>, vector<2x2x32xf32>,
    } else {
    }
    %c8_i32_74 = arith.constant 8 : i32
    %138 = arith.muli %arg0, %c8_i32_74 : i32
    %c1_i32 = arith.constant 1 : i32
    %139 = arith.addi %138, %c1_i32 : i32
    %c0_75 = arith.constant 0 : index
    %c0_76 = arith.constant 0 : index
    %c0_77 = arith.constant 0 : index
    %140 = vector.load %arg15[%c0_75, %c0_76, %c0_77] : memref<2x2x32xf32, #tpu.memory_space<vmem>>, vector<1x2x32xf32>
    %141 = vector.shape_cast %140 : vector<1x2x32xf32> to vector<2x32xf32>
    %c0_78 = arith.constant 0 : index
    %c0_79 = arith.constant 0 : index
    %c0_80 = arith.constant 0 : index
    %142 = vector.load %arg16[%c0_78, %c0_79, %c0_80] : memref<2x2x32xf32, #tpu.memory_space<vmem>>, vector<1x2x32xf32>
    %143 = vector.shape_cast %142 : vector<1x2x32xf32> to vector<2x32xf32>
    %c1_81 = arith.constant 1 : index
    %c0_82 = arith.constant 0 : index
    %c0_83 = arith.constant 0 : index
    %144 = vector.load %arg1[%c1_81, %c0_82, %c0_83] : memref<8x2x128xf32, #tpu.memory_space<vmem>>, vector<1x2x128xf32>
    %145 = vector.shape_cast %144 : vector<1x2x128xf32> to vector<2x128xf32>
    %cst_84 = arith.constant dense<0.000000e+00> : vector<2x128xf32>
    %146 = tpu.matmul %141, %3, %cst_84 {dimension_numbers = #tpu.dot_dimension_numbers<[1], [0], [0], [1], [0, 0, 1, 1], [], []>} : vector<2x32xf32>, vector<32x128xf32>, vector<2x128xf32> -> vector<2x128xf32>
    %147 = arith.addf %145, %146 : vector<2x128xf32>
    %148 = vector.extract_strided_slice %147 {offsets = [0, 0], sizes = [2, 32], strides = [1, 1]} : vector<2x128xf32> to vector<2x32xf32>
    %149 = arith.negf %148 : vector<2x32xf32>
    %150 = math.exp %149 : vector<2x32xf32>
    %cst_85 = arith.constant 1.000000e+00 : f32
    %151 = vector.broadcast %cst_85 : f32 to vector<2x32xf32>
    %152 = arith.addf %151, %150 : vector<2x32xf32>
    %153 = arith.divf %151, %152 : vector<2x32xf32>
    %154 = vector.extract_strided_slice %147 {offsets = [0, 32], sizes = [2, 32], strides = [1, 1]} : vector<2x128xf32> to vector<2x32xf32>
    %155 = arith.negf %154 : vector<2x32xf32>
    %156 = math.exp %155 : vector<2x32xf32>
    %cst_86 = arith.constant 1.000000e+00 : f32
    %157 = vector.broadcast %cst_86 : f32 to vector<2x32xf32>
    %158 = arith.addf %157, %156 : vector<2x32xf32>
    %159 = arith.divf %157, %158 : vector<2x32xf32>
    %160 = vector.extract_strided_slice %147 {offsets = [0, 64], sizes = [2, 32], strides = [1, 1]} : vector<2x128xf32> to vector<2x32xf32>
    %161 = math.tanh %160 : vector<2x32xf32>
    %162 = vector.extract_strided_slice %147 {offsets = [0, 96], sizes = [2, 32], strides = [1, 1]} : vector<2x128xf32> to vector<2x32xf32>
    %163 = arith.negf %162 : vector<2x32xf32>
    %164 = math.exp %163 : vector<2x32xf32>
    %cst_87 = arith.constant 1.000000e+00 : f32
    %165 = vector.broadcast %cst_87 : f32 to vector<2x32xf32>
    %166 = arith.addf %165, %164 : vector<2x32xf32>
    %167 = arith.divf %165, %166 : vector<2x32xf32>
    %168 = arith.mulf %159, %143 : vector<2x32xf32>
    %169 = arith.mulf %153, %161 : vector<2x32xf32>
    %170 = arith.addf %168, %169 : vector<2x32xf32>
    %171 = math.tanh %170 : vector<2x32xf32>
    %172 = arith.mulf %167, %171 : vector<2x32xf32>
    %cst_88 = arith.constant -5.000000e+01 : f32
    %cst_89 = arith.constant 5.000000e+01 : f32
    %173 = vector.broadcast %cst_88 : f32 to vector<2x32xf32>
    %174 = arith.maximumf %173, %172 : vector<2x32xf32>
    %175 = vector.broadcast %cst_89 : f32 to vector<2x32xf32>
    %176 = arith.minimumf %175, %174 : vector<2x32xf32>
    %c0_90 = arith.constant 0 : index
    %c0_91 = arith.constant 0 : index
    %c0_92 = arith.constant 0 : index
    %177 = vector.load %arg15[%c0_90, %c0_91, %c0_92] : memref<2x2x32xf32, #tpu.memory_space<vmem>>, vector<1x2x32xf32>
    %178 = vector.shape_cast %177 : vector<1x2x32xf32> to vector<2x32xf32>
    %179 = vector.shape_cast %176 : vector<2x32xf32> to vector<1x2x32xf32>
    tpu.vector_store %arg15[%c0_90, %c0_91, %c0_92], %179 {strides = array<i32>} : memref<2x2x32xf32, #tpu.memory_space<vmem>>, vector<1x2x32xf32>,
    %cst_93 = arith.constant -5.000000e+01 : f32
    %cst_94 = arith.constant 5.000000e+01 : f32
    %180 = vector.broadcast %cst_93 : f32 to vector<2x32xf32>
    %181 = arith.maximumf %180, %170 : vector<2x32xf32>
    %182 = vector.broadcast %cst_94 : f32 to vector<2x32xf32>
    %183 = arith.minimumf %182, %181 : vector<2x32xf32>
    %c0_95 = arith.constant 0 : index
    %c0_96 = arith.constant 0 : index
    %c0_97 = arith.constant 0 : index
    %184 = vector.load %arg16[%c0_95, %c0_96, %c0_97] : memref<2x2x32xf32, #tpu.memory_space<vmem>>, vector<1x2x32xf32>
    %185 = vector.shape_cast %184 : vector<1x2x32xf32> to vector<2x32xf32>
    %186 = vector.shape_cast %183 : vector<2x32xf32> to vector<1x2x32xf32>
    tpu.vector_store %arg16[%c0_95, %c0_96, %c0_97], %186 {strides = array<i32>} : memref<2x2x32xf32, #tpu.memory_space<vmem>>, vector<1x2x32xf32>,
    %c1_98 = arith.constant 1 : index
    %c0_99 = arith.constant 0 : index
    %c0_100 = arith.constant 0 : index
    %187 = vector.load %arg15[%c1_98, %c0_99, %c0_100] : memref<2x2x32xf32, #tpu.memory_space<vmem>>, vector<1x2x32xf32>
    %188 = vector.shape_cast %187 : vector<1x2x32xf32> to vector<2x32xf32>
    %c1_101 = arith.constant 1 : index
    %c0_102 = arith.constant 0 : index
    %c0_103 = arith.constant 0 : index
    %189 = vector.load %arg16[%c1_101, %c0_102, %c0_103] : memref<2x2x32xf32, #tpu.memory_space<vmem>>, vector<1x2x32xf32>
    %190 = vector.shape_cast %189 : vector<1x2x32xf32> to vector<2x32xf32>
    %cst_104 = arith.constant dense<0.000000e+00> : vector<2x128xf32>
    %191 = tpu.matmul %172, %5, %cst_104 {dimension_numbers = #tpu.dot_dimension_numbers<[1], [0], [0], [1], [0, 0, 1, 1], [], []>} : vector<2x32xf32>, vector<32x128xf32>, vector<2x128xf32> -> vector<2x128xf32>
    %cst_105 = arith.constant dense<0.000000e+00> : vector<2x128xf32>
    %192 = tpu.matmul %188, %4, %cst_105 {dimension_numbers = #tpu.dot_dimension_numbers<[1], [0], [0], [1], [0, 0, 1, 1], [], []>} : vector<2x32xf32>, vector<32x128xf32>, vector<2x128xf32> -> vector<2x128xf32>
    %193 = arith.addf %191, %192 : vector<2x128xf32>
    %194 = vector.broadcast %6 : vector<1x128xf32> to vector<2x128xf32>
    %195 = arith.addf %193, %194 : vector<2x128xf32>
    %196 = vector.extract_strided_slice %195 {offsets = [0, 0], sizes = [2, 32], strides = [1, 1]} : vector<2x128xf32> to vector<2x32xf32>
    %197 = arith.negf %196 : vector<2x32xf32>
    %198 = math.exp %197 : vector<2x32xf32>
    %cst_106 = arith.constant 1.000000e+00 : f32
    %199 = vector.broadcast %cst_106 : f32 to vector<2x32xf32>
    %200 = arith.addf %199, %198 : vector<2x32xf32>
    %201 = arith.divf %199, %200 : vector<2x32xf32>
    %202 = vector.extract_strided_slice %195 {offsets = [0, 32], sizes = [2, 32], strides = [1, 1]} : vector<2x128xf32> to vector<2x32xf32>
    %203 = arith.negf %202 : vector<2x32xf32>
    %204 = math.exp %203 : vector<2x32xf32>
    %cst_107 = arith.constant 1.000000e+00 : f32
    %205 = vector.broadcast %cst_107 : f32 to vector<2x32xf32>
    %206 = arith.addf %205, %204 : vector<2x32xf32>
    %207 = arith.divf %205, %206 : vector<2x32xf32>
    %208 = vector.extract_strided_slice %195 {offsets = [0, 64], sizes = [2, 32], strides = [1, 1]} : vector<2x128xf32> to vector<2x32xf32>
    %209 = math.tanh %208 : vector<2x32xf32>
    %210 = vector.extract_strided_slice %195 {offsets = [0, 96], sizes = [2, 32], strides = [1, 1]} : vector<2x128xf32> to vector<2x32xf32>
    %211 = arith.negf %210 : vector<2x32xf32>
    %212 = math.exp %211 : vector<2x32xf32>
    %cst_108 = arith.constant 1.000000e+00 : f32
    %213 = vector.broadcast %cst_108 : f32 to vector<2x32xf32>
    %214 = arith.addf %213, %212 : vector<2x32xf32>
    %215 = arith.divf %213, %214 : vector<2x32xf32>
    %216 = arith.mulf %207, %190 : vector<2x32xf32>
    %217 = arith.mulf %201, %209 : vector<2x32xf32>
    %218 = arith.addf %216, %217 : vector<2x32xf32>
    %219 = math.tanh %218 : vector<2x32xf32>
    %220 = arith.mulf %215, %219 : vector<2x32xf32>
    %cst_109 = arith.constant -5.000000e+01 : f32
    %cst_110 = arith.constant 5.000000e+01 : f32
    %221 = vector.broadcast %cst_109 : f32 to vector<2x32xf32>
    %222 = arith.maximumf %221, %220 : vector<2x32xf32>
    %223 = vector.broadcast %cst_110 : f32 to vector<2x32xf32>
    %224 = arith.minimumf %223, %222 : vector<2x32xf32>
    %c1_111 = arith.constant 1 : index
    %c0_112 = arith.constant 0 : index
    %c0_113 = arith.constant 0 : index
    %225 = vector.load %arg15[%c1_111, %c0_112, %c0_113] : memref<2x2x32xf32, #tpu.memory_space<vmem>>, vector<1x2x32xf32>
    %226 = vector.shape_cast %225 : vector<1x2x32xf32> to vector<2x32xf32>
    %227 = vector.shape_cast %224 : vector<2x32xf32> to vector<1x2x32xf32>
    tpu.vector_store %arg15[%c1_111, %c0_112, %c0_113], %227 {strides = array<i32>} : memref<2x2x32xf32, #tpu.memory_space<vmem>>, vector<1x2x32xf32>,
    %cst_114 = arith.constant -5.000000e+01 : f32
    %cst_115 = arith.constant 5.000000e+01 : f32
    %228 = vector.broadcast %cst_114 : f32 to vector<2x32xf32>
    %229 = arith.maximumf %228, %218 : vector<2x32xf32>
    %230 = vector.broadcast %cst_115 : f32 to vector<2x32xf32>
    %231 = arith.minimumf %230, %229 : vector<2x32xf32>
    %c1_116 = arith.constant 1 : index
    %c0_117 = arith.constant 0 : index
    %c0_118 = arith.constant 0 : index
    %232 = vector.load %arg16[%c1_116, %c0_117, %c0_118] : memref<2x2x32xf32, #tpu.memory_space<vmem>>, vector<1x2x32xf32>
    %233 = vector.shape_cast %232 : vector<1x2x32xf32> to vector<2x32xf32>
    %234 = vector.shape_cast %231 : vector<2x32xf32> to vector<1x2x32xf32>
    tpu.vector_store %arg16[%c1_116, %c0_117, %c0_118], %234 {strides = array<i32>} : memref<2x2x32xf32, #tpu.memory_space<vmem>>, vector<1x2x32xf32>,
    %cst_119 = arith.constant dense<0.000000e+00> : vector<2x8xf32>
    %235 = tpu.matmul %220, %7, %cst_119 {dimension_numbers = #tpu.dot_dimension_numbers<[1], [0], [0], [1], [0, 0, 1, 1], [], []>} : vector<2x32xf32>, vector<32x8xf32>, vector<2x8xf32> -> vector<2x8xf32>
    %236 = vector.broadcast %8 : vector<1x8xf32> to vector<2x8xf32>
    %237 = arith.addf %235, %236 : vector<2x8xf32>
    %cst_120 = arith.constant dense<0xFF800000> : vector<2xf32>
    %238 = vector.multi_reduction <maximumf>, %237, %cst_120 [1] : vector<2x8xf32> to vector<2xf32>
    %239 = vector.shape_cast %238 : vector<2xf32> to vector<2x1xf32>
    %240 = vector.broadcast %239 : vector<2x1xf32> to vector<2x8xf32>
    %241 = arith.subf %237, %240 : vector<2x8xf32>
    %242 = math.exp %241 : vector<2x8xf32>
    %cst_121 = arith.constant dense<0.000000e+00> : vector<2xf32>
    %243 = vector.multi_reduction <add>, %242, %cst_121 [1] : vector<2x8xf32> to vector<2xf32>
    %244 = vector.shape_cast %243 : vector<2xf32> to vector<2x1xf32>
    %245 = tpu.reciprocal %244 {approx = true} : vector<2x1xf32> -> vector<2x1xf32>
    %246 = vector.broadcast %245 : vector<2x1xf32> to vector<2x8xf32>
    %247 = arith.mulf %242, %246 : vector<2x8xf32>
    %248 = vector.shape_cast %247 : vector<2x8xf32> to vector<2x1x8xf32>
    "tpu.trace_start"() <{level = 10 : i32, message = "bqs,bsh->bqh"}> : () -> ()
    %cst_122 = arith.constant dense<0.000000e+00> : vector<2x1x32xf32>
    %249 = tpu.matmul %248, %12, %cst_122 {dimension_numbers = #tpu.dot_dimension_numbers<[2], [1], [1], [2], [0, 0, 0, 1, 1, 2], [0], [0]>} : vector<2x1x8xf32>, vector<2x8x32xf32>, vector<2x1x32xf32> -> vector<2x1x32xf32>
    "tpu.trace_stop"() : () -> ()
    %250 = vector.shape_cast %249 : vector<2x1x32xf32> to vector<2x32xf32>
    %cst_123 = arith.constant dense<0.000000e+00> : vector<2x32xf32>
    %251 = tpu.matmul %220, %9, %cst_123 {dimension_numbers = #tpu.dot_dimension_numbers<[1], [0], [0], [1], [0, 0, 1, 1], [], []>} : vector<2x32xf32>, vector<32x32xf32>, vector<2x32xf32> -> vector<2x32xf32>
    %cst_124 = arith.constant dense<0.000000e+00> : vector<2x32xf32>
    %252 = tpu.matmul %250, %10, %cst_124 {dimension_numbers = #tpu.dot_dimension_numbers<[1], [0], [0], [1], [0, 0, 1, 1], [], []>} : vector<2x32xf32>, vector<32x32xf32>, vector<2x32xf32> -> vector<2x32xf32>
    %253 = arith.addf %251, %252 : vector<2x32xf32>
    %254 = vector.broadcast %11 : vector<1x32xf32> to vector<2x32xf32>
    %255 = arith.addf %253, %254 : vector<2x32xf32>
    %256 = math.tanh %255 : vector<2x32xf32>
    %c1_125 = arith.constant 1 : index
    %c0_126 = arith.constant 0 : index
    %c0_127 = arith.constant 0 : index
    %257 = vector.load %arg13[%c1_125, %c0_126, %c0_127] : memref<8x2x32xf32, #tpu.memory_space<vmem>>, vector<1x2x32xf32>
    %258 = vector.shape_cast %257 : vector<1x2x32xf32> to vector<2x32xf32>
    %259 = vector.shape_cast %256 : vector<2x32xf32> to vector<1x2x32xf32>
    tpu.vector_store %arg13[%c1_125, %c0_126, %c0_127], %259 {strides = array<i32>} : memref<8x2x32xf32, #tpu.memory_space<vmem>>, vector<1x2x32xf32>,
    %c8_i32_128 = arith.constant 8 : i32
    %260 = arith.cmpi eq, %139, %c8_i32_128 : i32
    %261 = arith.extui %260 : i1 to i32
    %c0_i32_129 = arith.constant 0 : i32
    %262 = arith.cmpi ne, %261, %c0_i32_129 : i32
    scf.if %262 {
      %c0_460 = arith.constant 0 : index
      %c0_461 = arith.constant 0 : index
      %c0_462 = arith.constant 0 : index
      %1013 = vector.load %arg15[%c0_460, %c0_461, %c0_462] : memref<2x2x32xf32, #tpu.memory_space<vmem>>, vector<2x2x32xf32>
      %c0_463 = arith.constant 0 : index
      %c0_464 = arith.constant 0 : index
      %c0_465 = arith.constant 0 : index
      %1014 = vector.load %arg14[%c0_463, %c0_464, %c0_465] : memref<2x2x32xf32, #tpu.memory_space<vmem>>, vector<2x2x32xf32>
      tpu.vector_store %arg14[%c0_463, %c0_464, %c0_465], %1013 {strides = array<i32>} : memref<2x2x32xf32, #tpu.memory_space<vmem>>, vector<2x2x32xf32>,
    } else {
    }
    %c8_i32_130 = arith.constant 8 : i32
    %263 = arith.muli %arg0, %c8_i32_130 : i32
    %c2_i32 = arith.constant 2 : i32
    %264 = arith.addi %263, %c2_i32 : i32
    %c0_131 = arith.constant 0 : index
    %c0_132 = arith.constant 0 : index
    %c0_133 = arith.constant 0 : index
    %265 = vector.load %arg15[%c0_131, %c0_132, %c0_133] : memref<2x2x32xf32, #tpu.memory_space<vmem>>, vector<1x2x32xf32>
    %266 = vector.shape_cast %265 : vector<1x2x32xf32> to vector<2x32xf32>
    %c0_134 = arith.constant 0 : index
    %c0_135 = arith.constant 0 : index
    %c0_136 = arith.constant 0 : index
    %267 = vector.load %arg16[%c0_134, %c0_135, %c0_136] : memref<2x2x32xf32, #tpu.memory_space<vmem>>, vector<1x2x32xf32>
    %268 = vector.shape_cast %267 : vector<1x2x32xf32> to vector<2x32xf32>
    %c2 = arith.constant 2 : index
    %c0_137 = arith.constant 0 : index
    %c0_138 = arith.constant 0 : index
    %269 = vector.load %arg1[%c2, %c0_137, %c0_138] : memref<8x2x128xf32, #tpu.memory_space<vmem>>, vector<1x2x128xf32>
    %270 = vector.shape_cast %269 : vector<1x2x128xf32> to vector<2x128xf32>
    %cst_139 = arith.constant dense<0.000000e+00> : vector<2x128xf32>
    %271 = tpu.matmul %266, %3, %cst_139 {dimension_numbers = #tpu.dot_dimension_numbers<[1], [0], [0], [1], [0, 0, 1, 1], [], []>} : vector<2x32xf32>, vector<32x128xf32>, vector<2x128xf32> -> vector<2x128xf32>
    %272 = arith.addf %270, %271 : vector<2x128xf32>
    %273 = vector.extract_strided_slice %272 {offsets = [0, 0], sizes = [2, 32], strides = [1, 1]} : vector<2x128xf32> to vector<2x32xf32>
    %274 = arith.negf %273 : vector<2x32xf32>
    %275 = math.exp %274 : vector<2x32xf32>
    %cst_140 = arith.constant 1.000000e+00 : f32
    %276 = vector.broadcast %cst_140 : f32 to vector<2x32xf32>
    %277 = arith.addf %276, %275 : vector<2x32xf32>
    %278 = arith.divf %276, %277 : vector<2x32xf32>
    %279 = vector.extract_strided_slice %272 {offsets = [0, 32], sizes = [2, 32], strides = [1, 1]} : vector<2x128xf32> to vector<2x32xf32>
    %280 = arith.negf %279 : vector<2x32xf32>
    %281 = math.exp %280 : vector<2x32xf32>
    %cst_141 = arith.constant 1.000000e+00 : f32
    %282 = vector.broadcast %cst_141 : f32 to vector<2x32xf32>
    %283 = arith.addf %282, %281 : vector<2x32xf32>
    %284 = arith.divf %282, %283 : vector<2x32xf32>
    %285 = vector.extract_strided_slice %272 {offsets = [0, 64], sizes = [2, 32], strides = [1, 1]} : vector<2x128xf32> to vector<2x32xf32>
    %286 = math.tanh %285 : vector<2x32xf32>
    %287 = vector.extract_strided_slice %272 {offsets = [0, 96], sizes = [2, 32], strides = [1, 1]} : vector<2x128xf32> to vector<2x32xf32>
    %288 = arith.negf %287 : vector<2x32xf32>
    %289 = math.exp %288 : vector<2x32xf32>
    %cst_142 = arith.constant 1.000000e+00 : f32
    %290 = vector.broadcast %cst_142 : f32 to vector<2x32xf32>
    %291 = arith.addf %290, %289 : vector<2x32xf32>
    %292 = arith.divf %290, %291 : vector<2x32xf32>
    %293 = arith.mulf %284, %268 : vector<2x32xf32>
    %294 = arith.mulf %278, %286 : vector<2x32xf32>
    %295 = arith.addf %293, %294 : vector<2x32xf32>
    %296 = math.tanh %295 : vector<2x32xf32>
    %297 = arith.mulf %292, %296 : vector<2x32xf32>
    %cst_143 = arith.constant -5.000000e+01 : f32
    %cst_144 = arith.constant 5.000000e+01 : f32
    %298 = vector.broadcast %cst_143 : f32 to vector<2x32xf32>
    %299 = arith.maximumf %298, %297 : vector<2x32xf32>
    %300 = vector.broadcast %cst_144 : f32 to vector<2x32xf32>
    %301 = arith.minimumf %300, %299 : vector<2x32xf32>
    %c0_145 = arith.constant 0 : index
    %c0_146 = arith.constant 0 : index
    %c0_147 = arith.constant 0 : index
    %302 = vector.load %arg15[%c0_145, %c0_146, %c0_147] : memref<2x2x32xf32, #tpu.memory_space<vmem>>, vector<1x2x32xf32>
    %303 = vector.shape_cast %302 : vector<1x2x32xf32> to vector<2x32xf32>
    %304 = vector.shape_cast %301 : vector<2x32xf32> to vector<1x2x32xf32>
    tpu.vector_store %arg15[%c0_145, %c0_146, %c0_147], %304 {strides = array<i32>} : memref<2x2x32xf32, #tpu.memory_space<vmem>>, vector<1x2x32xf32>,
    %cst_148 = arith.constant -5.000000e+01 : f32
    %cst_149 = arith.constant 5.000000e+01 : f32
    %305 = vector.broadcast %cst_148 : f32 to vector<2x32xf32>
    %306 = arith.maximumf %305, %295 : vector<2x32xf32>
    %307 = vector.broadcast %cst_149 : f32 to vector<2x32xf32>
    %308 = arith.minimumf %307, %306 : vector<2x32xf32>
    %c0_150 = arith.constant 0 : index
    %c0_151 = arith.constant 0 : index
    %c0_152 = arith.constant 0 : index
    %309 = vector.load %arg16[%c0_150, %c0_151, %c0_152] : memref<2x2x32xf32, #tpu.memory_space<vmem>>, vector<1x2x32xf32>
    %310 = vector.shape_cast %309 : vector<1x2x32xf32> to vector<2x32xf32>
    %311 = vector.shape_cast %308 : vector<2x32xf32> to vector<1x2x32xf32>
    tpu.vector_store %arg16[%c0_150, %c0_151, %c0_152], %311 {strides = array<i32>} : memref<2x2x32xf32, #tpu.memory_space<vmem>>, vector<1x2x32xf32>,
    %c1_153 = arith.constant 1 : index
    %c0_154 = arith.constant 0 : index
    %c0_155 = arith.constant 0 : index
    %312 = vector.load %arg15[%c1_153, %c0_154, %c0_155] : memref<2x2x32xf32, #tpu.memory_space<vmem>>, vector<1x2x32xf32>
    %313 = vector.shape_cast %312 : vector<1x2x32xf32> to vector<2x32xf32>
    %c1_156 = arith.constant 1 : index
    %c0_157 = arith.constant 0 : index
    %c0_158 = arith.constant 0 : index
    %314 = vector.load %arg16[%c1_156, %c0_157, %c0_158] : memref<2x2x32xf32, #tpu.memory_space<vmem>>, vector<1x2x32xf32>
    %315 = vector.shape_cast %314 : vector<1x2x32xf32> to vector<2x32xf32>
    %cst_159 = arith.constant dense<0.000000e+00> : vector<2x128xf32>
    %316 = tpu.matmul %297, %5, %cst_159 {dimension_numbers = #tpu.dot_dimension_numbers<[1], [0], [0], [1], [0, 0, 1, 1], [], []>} : vector<2x32xf32>, vector<32x128xf32>, vector<2x128xf32> -> vector<2x128xf32>
    %cst_160 = arith.constant dense<0.000000e+00> : vector<2x128xf32>
    %317 = tpu.matmul %313, %4, %cst_160 {dimension_numbers = #tpu.dot_dimension_numbers<[1], [0], [0], [1], [0, 0, 1, 1], [], []>} : vector<2x32xf32>, vector<32x128xf32>, vector<2x128xf32> -> vector<2x128xf32>
    %318 = arith.addf %316, %317 : vector<2x128xf32>
    %319 = vector.broadcast %6 : vector<1x128xf32> to vector<2x128xf32>
    %320 = arith.addf %318, %319 : vector<2x128xf32>
    %321 = vector.extract_strided_slice %320 {offsets = [0, 0], sizes = [2, 32], strides = [1, 1]} : vector<2x128xf32> to vector<2x32xf32>
    %322 = arith.negf %321 : vector<2x32xf32>
    %323 = math.exp %322 : vector<2x32xf32>
    %cst_161 = arith.constant 1.000000e+00 : f32
    %324 = vector.broadcast %cst_161 : f32 to vector<2x32xf32>
    %325 = arith.addf %324, %323 : vector<2x32xf32>
    %326 = arith.divf %324, %325 : vector<2x32xf32>
    %327 = vector.extract_strided_slice %320 {offsets = [0, 32], sizes = [2, 32], strides = [1, 1]} : vector<2x128xf32> to vector<2x32xf32>
    %328 = arith.negf %327 : vector<2x32xf32>
    %329 = math.exp %328 : vector<2x32xf32>
    %cst_162 = arith.constant 1.000000e+00 : f32
    %330 = vector.broadcast %cst_162 : f32 to vector<2x32xf32>
    %331 = arith.addf %330, %329 : vector<2x32xf32>
    %332 = arith.divf %330, %331 : vector<2x32xf32>
    %333 = vector.extract_strided_slice %320 {offsets = [0, 64], sizes = [2, 32], strides = [1, 1]} : vector<2x128xf32> to vector<2x32xf32>
    %334 = math.tanh %333 : vector<2x32xf32>
    %335 = vector.extract_strided_slice %320 {offsets = [0, 96], sizes = [2, 32], strides = [1, 1]} : vector<2x128xf32> to vector<2x32xf32>
    %336 = arith.negf %335 : vector<2x32xf32>
    %337 = math.exp %336 : vector<2x32xf32>
    %cst_163 = arith.constant 1.000000e+00 : f32
    %338 = vector.broadcast %cst_163 : f32 to vector<2x32xf32>
    %339 = arith.addf %338, %337 : vector<2x32xf32>
    %340 = arith.divf %338, %339 : vector<2x32xf32>
    %341 = arith.mulf %332, %315 : vector<2x32xf32>
    %342 = arith.mulf %326, %334 : vector<2x32xf32>
    %343 = arith.addf %341, %342 : vector<2x32xf32>
    %344 = math.tanh %343 : vector<2x32xf32>
    %345 = arith.mulf %340, %344 : vector<2x32xf32>
    %cst_164 = arith.constant -5.000000e+01 : f32
    %cst_165 = arith.constant 5.000000e+01 : f32
    %346 = vector.broadcast %cst_164 : f32 to vector<2x32xf32>
    %347 = arith.maximumf %346, %345 : vector<2x32xf32>
    %348 = vector.broadcast %cst_165 : f32 to vector<2x32xf32>
    %349 = arith.minimumf %348, %347 : vector<2x32xf32>
    %c1_166 = arith.constant 1 : index
    %c0_167 = arith.constant 0 : index
    %c0_168 = arith.constant 0 : index
    %350 = vector.load %arg15[%c1_166, %c0_167, %c0_168] : memref<2x2x32xf32, #tpu.memory_space<vmem>>, vector<1x2x32xf32>
    %351 = vector.shape_cast %350 : vector<1x2x32xf32> to vector<2x32xf32>
    %352 = vector.shape_cast %349 : vector<2x32xf32> to vector<1x2x32xf32>
    tpu.vector_store %arg15[%c1_166, %c0_167, %c0_168], %352 {strides = array<i32>} : memref<2x2x32xf32, #tpu.memory_space<vmem>>, vector<1x2x32xf32>,
    %cst_169 = arith.constant -5.000000e+01 : f32
    %cst_170 = arith.constant 5.000000e+01 : f32
    %353 = vector.broadcast %cst_169 : f32 to vector<2x32xf32>
    %354 = arith.maximumf %353, %343 : vector<2x32xf32>
    %355 = vector.broadcast %cst_170 : f32 to vector<2x32xf32>
    %356 = arith.minimumf %355, %354 : vector<2x32xf32>
    %c1_171 = arith.constant 1 : index
    %c0_172 = arith.constant 0 : index
    %c0_173 = arith.constant 0 : index
    %357 = vector.load %arg16[%c1_171, %c0_172, %c0_173] : memref<2x2x32xf32, #tpu.memory_space<vmem>>, vector<1x2x32xf32>
    %358 = vector.shape_cast %357 : vector<1x2x32xf32> to vector<2x32xf32>
    %359 = vector.shape_cast %356 : vector<2x32xf32> to vector<1x2x32xf32>
    tpu.vector_store %arg16[%c1_171, %c0_172, %c0_173], %359 {strides = array<i32>} : memref<2x2x32xf32, #tpu.memory_space<vmem>>, vector<1x2x32xf32>,
    %cst_174 = arith.constant dense<0.000000e+00> : vector<2x8xf32>
    %360 = tpu.matmul %345, %7, %cst_174 {dimension_numbers = #tpu.dot_dimension_numbers<[1], [0], [0], [1], [0, 0, 1, 1], [], []>} : vector<2x32xf32>, vector<32x8xf32>, vector<2x8xf32> -> vector<2x8xf32>
    %361 = vector.broadcast %8 : vector<1x8xf32> to vector<2x8xf32>
    %362 = arith.addf %360, %361 : vector<2x8xf32>
    %cst_175 = arith.constant dense<0xFF800000> : vector<2xf32>
    %363 = vector.multi_reduction <maximumf>, %362, %cst_175 [1] : vector<2x8xf32> to vector<2xf32>
    %364 = vector.shape_cast %363 : vector<2xf32> to vector<2x1xf32>
    %365 = vector.broadcast %364 : vector<2x1xf32> to vector<2x8xf32>
    %366 = arith.subf %362, %365 : vector<2x8xf32>
    %367 = math.exp %366 : vector<2x8xf32>
    %cst_176 = arith.constant dense<0.000000e+00> : vector<2xf32>
    %368 = vector.multi_reduction <add>, %367, %cst_176 [1] : vector<2x8xf32> to vector<2xf32>
    %369 = vector.shape_cast %368 : vector<2xf32> to vector<2x1xf32>
    %370 = tpu.reciprocal %369 {approx = true} : vector<2x1xf32> -> vector<2x1xf32>
    %371 = vector.broadcast %370 : vector<2x1xf32> to vector<2x8xf32>
    %372 = arith.mulf %367, %371 : vector<2x8xf32>
    %373 = vector.shape_cast %372 : vector<2x8xf32> to vector<2x1x8xf32>
    "tpu.trace_start"() <{level = 10 : i32, message = "bqs,bsh->bqh"}> : () -> ()
    %cst_177 = arith.constant dense<0.000000e+00> : vector<2x1x32xf32>
    %374 = tpu.matmul %373, %12, %cst_177 {dimension_numbers = #tpu.dot_dimension_numbers<[2], [1], [1], [2], [0, 0, 0, 1, 1, 2], [0], [0]>} : vector<2x1x8xf32>, vector<2x8x32xf32>, vector<2x1x32xf32> -> vector<2x1x32xf32>
    "tpu.trace_stop"() : () -> ()
    %375 = vector.shape_cast %374 : vector<2x1x32xf32> to vector<2x32xf32>
    %cst_178 = arith.constant dense<0.000000e+00> : vector<2x32xf32>
    %376 = tpu.matmul %345, %9, %cst_178 {dimension_numbers = #tpu.dot_dimension_numbers<[1], [0], [0], [1], [0, 0, 1, 1], [], []>} : vector<2x32xf32>, vector<32x32xf32>, vector<2x32xf32> -> vector<2x32xf32>
    %cst_179 = arith.constant dense<0.000000e+00> : vector<2x32xf32>
    %377 = tpu.matmul %375, %10, %cst_179 {dimension_numbers = #tpu.dot_dimension_numbers<[1], [0], [0], [1], [0, 0, 1, 1], [], []>} : vector<2x32xf32>, vector<32x32xf32>, vector<2x32xf32> -> vector<2x32xf32>
    %378 = arith.addf %376, %377 : vector<2x32xf32>
    %379 = vector.broadcast %11 : vector<1x32xf32> to vector<2x32xf32>
    %380 = arith.addf %378, %379 : vector<2x32xf32>
    %381 = math.tanh %380 : vector<2x32xf32>
    %c2_180 = arith.constant 2 : index
    %c0_181 = arith.constant 0 : index
    %c0_182 = arith.constant 0 : index
    %382 = vector.load %arg13[%c2_180, %c0_181, %c0_182] : memref<8x2x32xf32, #tpu.memory_space<vmem>>, vector<1x2x32xf32>
    %383 = vector.shape_cast %382 : vector<1x2x32xf32> to vector<2x32xf32>
    %384 = vector.shape_cast %381 : vector<2x32xf32> to vector<1x2x32xf32>
    tpu.vector_store %arg13[%c2_180, %c0_181, %c0_182], %384 {strides = array<i32>} : memref<8x2x32xf32, #tpu.memory_space<vmem>>, vector<1x2x32xf32>,
    %c8_i32_183 = arith.constant 8 : i32
    %385 = arith.cmpi eq, %264, %c8_i32_183 : i32
    %386 = arith.extui %385 : i1 to i32
    %c0_i32_184 = arith.constant 0 : i32
    %387 = arith.cmpi ne, %386, %c0_i32_184 : i32
    scf.if %387 {
      %c0_460 = arith.constant 0 : index
      %c0_461 = arith.constant 0 : index
      %c0_462 = arith.constant 0 : index
      %1013 = vector.load %arg15[%c0_460, %c0_461, %c0_462] : memref<2x2x32xf32, #tpu.memory_space<vmem>>, vector<2x2x32xf32>
      %c0_463 = arith.constant 0 : index
      %c0_464 = arith.constant 0 : index
      %c0_465 = arith.constant 0 : index
      %1014 = vector.load %arg14[%c0_463, %c0_464, %c0_465] : memref<2x2x32xf32, #tpu.memory_space<vmem>>, vector<2x2x32xf32>
      tpu.vector_store %arg14[%c0_463, %c0_464, %c0_465], %1013 {strides = array<i32>} : memref<2x2x32xf32, #tpu.memory_space<vmem>>, vector<2x2x32xf32>,
    } else {
    }
    %c8_i32_185 = arith.constant 8 : i32
    %388 = arith.muli %arg0, %c8_i32_185 : i32
    %c3_i32 = arith.constant 3 : i32
    %389 = arith.addi %388, %c3_i32 : i32
    %c0_186 = arith.constant 0 : index
    %c0_187 = arith.constant 0 : index
    %c0_188 = arith.constant 0 : index
    %390 = vector.load %arg15[%c0_186, %c0_187, %c0_188] : memref<2x2x32xf32, #tpu.memory_space<vmem>>, vector<1x2x32xf32>
    %391 = vector.shape_cast %390 : vector<1x2x32xf32> to vector<2x32xf32>
    %c0_189 = arith.constant 0 : index
    %c0_190 = arith.constant 0 : index
    %c0_191 = arith.constant 0 : index
    %392 = vector.load %arg16[%c0_189, %c0_190, %c0_191] : memref<2x2x32xf32, #tpu.memory_space<vmem>>, vector<1x2x32xf32>
    %393 = vector.shape_cast %392 : vector<1x2x32xf32> to vector<2x32xf32>
    %c3 = arith.constant 3 : index
    %c0_192 = arith.constant 0 : index
    %c0_193 = arith.constant 0 : index
    %394 = vector.load %arg1[%c3, %c0_192, %c0_193] : memref<8x2x128xf32, #tpu.memory_space<vmem>>, vector<1x2x128xf32>
    %395 = vector.shape_cast %394 : vector<1x2x128xf32> to vector<2x128xf32>
    %cst_194 = arith.constant dense<0.000000e+00> : vector<2x128xf32>
    %396 = tpu.matmul %391, %3, %cst_194 {dimension_numbers = #tpu.dot_dimension_numbers<[1], [0], [0], [1], [0, 0, 1, 1], [], []>} : vector<2x32xf32>, vector<32x128xf32>, vector<2x128xf32> -> vector<2x128xf32>
    %397 = arith.addf %395, %396 : vector<2x128xf32>
    %398 = vector.extract_strided_slice %397 {offsets = [0, 0], sizes = [2, 32], strides = [1, 1]} : vector<2x128xf32> to vector<2x32xf32>
    %399 = arith.negf %398 : vector<2x32xf32>
    %400 = math.exp %399 : vector<2x32xf32>
    %cst_195 = arith.constant 1.000000e+00 : f32
    %401 = vector.broadcast %cst_195 : f32 to vector<2x32xf32>
    %402 = arith.addf %401, %400 : vector<2x32xf32>
    %403 = arith.divf %401, %402 : vector<2x32xf32>
    %404 = vector.extract_strided_slice %397 {offsets = [0, 32], sizes = [2, 32], strides = [1, 1]} : vector<2x128xf32> to vector<2x32xf32>
    %405 = arith.negf %404 : vector<2x32xf32>
    %406 = math.exp %405 : vector<2x32xf32>
    %cst_196 = arith.constant 1.000000e+00 : f32
    %407 = vector.broadcast %cst_196 : f32 to vector<2x32xf32>
    %408 = arith.addf %407, %406 : vector<2x32xf32>
    %409 = arith.divf %407, %408 : vector<2x32xf32>
    %410 = vector.extract_strided_slice %397 {offsets = [0, 64], sizes = [2, 32], strides = [1, 1]} : vector<2x128xf32> to vector<2x32xf32>
    %411 = math.tanh %410 : vector<2x32xf32>
    %412 = vector.extract_strided_slice %397 {offsets = [0, 96], sizes = [2, 32], strides = [1, 1]} : vector<2x128xf32> to vector<2x32xf32>
    %413 = arith.negf %412 : vector<2x32xf32>
    %414 = math.exp %413 : vector<2x32xf32>
    %cst_197 = arith.constant 1.000000e+00 : f32
    %415 = vector.broadcast %cst_197 : f32 to vector<2x32xf32>
    %416 = arith.addf %415, %414 : vector<2x32xf32>
    %417 = arith.divf %415, %416 : vector<2x32xf32>
    %418 = arith.mulf %409, %393 : vector<2x32xf32>
    %419 = arith.mulf %403, %411 : vector<2x32xf32>
    %420 = arith.addf %418, %419 : vector<2x32xf32>
    %421 = math.tanh %420 : vector<2x32xf32>
    %422 = arith.mulf %417, %421 : vector<2x32xf32>
    %cst_198 = arith.constant -5.000000e+01 : f32
    %cst_199 = arith.constant 5.000000e+01 : f32
    %423 = vector.broadcast %cst_198 : f32 to vector<2x32xf32>
    %424 = arith.maximumf %423, %422 : vector<2x32xf32>
    %425 = vector.broadcast %cst_199 : f32 to vector<2x32xf32>
    %426 = arith.minimumf %425, %424 : vector<2x32xf32>
    %c0_200 = arith.constant 0 : index
    %c0_201 = arith.constant 0 : index
    %c0_202 = arith.constant 0 : index
    %427 = vector.load %arg15[%c0_200, %c0_201, %c0_202] : memref<2x2x32xf32, #tpu.memory_space<vmem>>, vector<1x2x32xf32>
    %428 = vector.shape_cast %427 : vector<1x2x32xf32> to vector<2x32xf32>
    %429 = vector.shape_cast %426 : vector<2x32xf32> to vector<1x2x32xf32>
    tpu.vector_store %arg15[%c0_200, %c0_201, %c0_202], %429 {strides = array<i32>} : memref<2x2x32xf32, #tpu.memory_space<vmem>>, vector<1x2x32xf32>,
    %cst_203 = arith.constant -5.000000e+01 : f32
    %cst_204 = arith.constant 5.000000e+01 : f32
    %430 = vector.broadcast %cst_203 : f32 to vector<2x32xf32>
    %431 = arith.maximumf %430, %420 : vector<2x32xf32>
    %432 = vector.broadcast %cst_204 : f32 to vector<2x32xf32>
    %433 = arith.minimumf %432, %431 : vector<2x32xf32>
    %c0_205 = arith.constant 0 : index
    %c0_206 = arith.constant 0 : index
    %c0_207 = arith.constant 0 : index
    %434 = vector.load %arg16[%c0_205, %c0_206, %c0_207] : memref<2x2x32xf32, #tpu.memory_space<vmem>>, vector<1x2x32xf32>
    %435 = vector.shape_cast %434 : vector<1x2x32xf32> to vector<2x32xf32>
    %436 = vector.shape_cast %433 : vector<2x32xf32> to vector<1x2x32xf32>
    tpu.vector_store %arg16[%c0_205, %c0_206, %c0_207], %436 {strides = array<i32>} : memref<2x2x32xf32, #tpu.memory_space<vmem>>, vector<1x2x32xf32>,
    %c1_208 = arith.constant 1 : index
    %c0_209 = arith.constant 0 : index
    %c0_210 = arith.constant 0 : index
    %437 = vector.load %arg15[%c1_208, %c0_209, %c0_210] : memref<2x2x32xf32, #tpu.memory_space<vmem>>, vector<1x2x32xf32>
    %438 = vector.shape_cast %437 : vector<1x2x32xf32> to vector<2x32xf32>
    %c1_211 = arith.constant 1 : index
    %c0_212 = arith.constant 0 : index
    %c0_213 = arith.constant 0 : index
    %439 = vector.load %arg16[%c1_211, %c0_212, %c0_213] : memref<2x2x32xf32, #tpu.memory_space<vmem>>, vector<1x2x32xf32>
    %440 = vector.shape_cast %439 : vector<1x2x32xf32> to vector<2x32xf32>
    %cst_214 = arith.constant dense<0.000000e+00> : vector<2x128xf32>
    %441 = tpu.matmul %422, %5, %cst_214 {dimension_numbers = #tpu.dot_dimension_numbers<[1], [0], [0], [1], [0, 0, 1, 1], [], []>} : vector<2x32xf32>, vector<32x128xf32>, vector<2x128xf32> -> vector<2x128xf32>
    %cst_215 = arith.constant dense<0.000000e+00> : vector<2x128xf32>
    %442 = tpu.matmul %438, %4, %cst_215 {dimension_numbers = #tpu.dot_dimension_numbers<[1], [0], [0], [1], [0, 0, 1, 1], [], []>} : vector<2x32xf32>, vector<32x128xf32>, vector<2x128xf32> -> vector<2x128xf32>
    %443 = arith.addf %441, %442 : vector<2x128xf32>
    %444 = vector.broadcast %6 : vector<1x128xf32> to vector<2x128xf32>
    %445 = arith.addf %443, %444 : vector<2x128xf32>
    %446 = vector.extract_strided_slice %445 {offsets = [0, 0], sizes = [2, 32], strides = [1, 1]} : vector<2x128xf32> to vector<2x32xf32>
    %447 = arith.negf %446 : vector<2x32xf32>
    %448 = math.exp %447 : vector<2x32xf32>
    %cst_216 = arith.constant 1.000000e+00 : f32
    %449 = vector.broadcast %cst_216 : f32 to vector<2x32xf32>
    %450 = arith.addf %449, %448 : vector<2x32xf32>
    %451 = arith.divf %449, %450 : vector<2x32xf32>
    %452 = vector.extract_strided_slice %445 {offsets = [0, 32], sizes = [2, 32], strides = [1, 1]} : vector<2x128xf32> to vector<2x32xf32>
    %453 = arith.negf %452 : vector<2x32xf32>
    %454 = math.exp %453 : vector<2x32xf32>
    %cst_217 = arith.constant 1.000000e+00 : f32
    %455 = vector.broadcast %cst_217 : f32 to vector<2x32xf32>
    %456 = arith.addf %455, %454 : vector<2x32xf32>
    %457 = arith.divf %455, %456 : vector<2x32xf32>
    %458 = vector.extract_strided_slice %445 {offsets = [0, 64], sizes = [2, 32], strides = [1, 1]} : vector<2x128xf32> to vector<2x32xf32>
    %459 = math.tanh %458 : vector<2x32xf32>
    %460 = vector.extract_strided_slice %445 {offsets = [0, 96], sizes = [2, 32], strides = [1, 1]} : vector<2x128xf32> to vector<2x32xf32>
    %461 = arith.negf %460 : vector<2x32xf32>
    %462 = math.exp %461 : vector<2x32xf32>
    %cst_218 = arith.constant 1.000000e+00 : f32
    %463 = vector.broadcast %cst_218 : f32 to vector<2x32xf32>
    %464 = arith.addf %463, %462 : vector<2x32xf32>
    %465 = arith.divf %463, %464 : vector<2x32xf32>
    %466 = arith.mulf %457, %440 : vector<2x32xf32>
    %467 = arith.mulf %451, %459 : vector<2x32xf32>
    %468 = arith.addf %466, %467 : vector<2x32xf32>
    %469 = math.tanh %468 : vector<2x32xf32>
    %470 = arith.mulf %465, %469 : vector<2x32xf32>
    %cst_219 = arith.constant -5.000000e+01 : f32
    %cst_220 = arith.constant 5.000000e+01 : f32
    %471 = vector.broadcast %cst_219 : f32 to vector<2x32xf32>
    %472 = arith.maximumf %471, %470 : vector<2x32xf32>
    %473 = vector.broadcast %cst_220 : f32 to vector<2x32xf32>
    %474 = arith.minimumf %473, %472 : vector<2x32xf32>
    %c1_221 = arith.constant 1 : index
    %c0_222 = arith.constant 0 : index
    %c0_223 = arith.constant 0 : index
    %475 = vector.load %arg15[%c1_221, %c0_222, %c0_223] : memref<2x2x32xf32, #tpu.memory_space<vmem>>, vector<1x2x32xf32>
    %476 = vector.shape_cast %475 : vector<1x2x32xf32> to vector<2x32xf32>
    %477 = vector.shape_cast %474 : vector<2x32xf32> to vector<1x2x32xf32>
    tpu.vector_store %arg15[%c1_221, %c0_222, %c0_223], %477 {strides = array<i32>} : memref<2x2x32xf32, #tpu.memory_space<vmem>>, vector<1x2x32xf32>,
    %cst_224 = arith.constant -5.000000e+01 : f32
    %cst_225 = arith.constant 5.000000e+01 : f32
    %478 = vector.broadcast %cst_224 : f32 to vector<2x32xf32>
    %479 = arith.maximumf %478, %468 : vector<2x32xf32>
    %480 = vector.broadcast %cst_225 : f32 to vector<2x32xf32>
    %481 = arith.minimumf %480, %479 : vector<2x32xf32>
    %c1_226 = arith.constant 1 : index
    %c0_227 = arith.constant 0 : index
    %c0_228 = arith.constant 0 : index
    %482 = vector.load %arg16[%c1_226, %c0_227, %c0_228] : memref<2x2x32xf32, #tpu.memory_space<vmem>>, vector<1x2x32xf32>
    %483 = vector.shape_cast %482 : vector<1x2x32xf32> to vector<2x32xf32>
    %484 = vector.shape_cast %481 : vector<2x32xf32> to vector<1x2x32xf32>
    tpu.vector_store %arg16[%c1_226, %c0_227, %c0_228], %484 {strides = array<i32>} : memref<2x2x32xf32, #tpu.memory_space<vmem>>, vector<1x2x32xf32>,
    %cst_229 = arith.constant dense<0.000000e+00> : vector<2x8xf32>
    %485 = tpu.matmul %470, %7, %cst_229 {dimension_numbers = #tpu.dot_dimension_numbers<[1], [0], [0], [1], [0, 0, 1, 1], [], []>} : vector<2x32xf32>, vector<32x8xf32>, vector<2x8xf32> -> vector<2x8xf32>
    %486 = vector.broadcast %8 : vector<1x8xf32> to vector<2x8xf32>
    %487 = arith.addf %485, %486 : vector<2x8xf32>
    %cst_230 = arith.constant dense<0xFF800000> : vector<2xf32>
    %488 = vector.multi_reduction <maximumf>, %487, %cst_230 [1] : vector<2x8xf32> to vector<2xf32>
    %489 = vector.shape_cast %488 : vector<2xf32> to vector<2x1xf32>
    %490 = vector.broadcast %489 : vector<2x1xf32> to vector<2x8xf32>
    %491 = arith.subf %487, %490 : vector<2x8xf32>
    %492 = math.exp %491 : vector<2x8xf32>
    %cst_231 = arith.constant dense<0.000000e+00> : vector<2xf32>
    %493 = vector.multi_reduction <add>, %492, %cst_231 [1] : vector<2x8xf32> to vector<2xf32>
    %494 = vector.shape_cast %493 : vector<2xf32> to vector<2x1xf32>
    %495 = tpu.reciprocal %494 {approx = true} : vector<2x1xf32> -> vector<2x1xf32>
    %496 = vector.broadcast %495 : vector<2x1xf32> to vector<2x8xf32>
    %497 = arith.mulf %492, %496 : vector<2x8xf32>
    %498 = vector.shape_cast %497 : vector<2x8xf32> to vector<2x1x8xf32>
    "tpu.trace_start"() <{level = 10 : i32, message = "bqs,bsh->bqh"}> : () -> ()
    %cst_232 = arith.constant dense<0.000000e+00> : vector<2x1x32xf32>
    %499 = tpu.matmul %498, %12, %cst_232 {dimension_numbers = #tpu.dot_dimension_numbers<[2], [1], [1], [2], [0, 0, 0, 1, 1, 2], [0], [0]>} : vector<2x1x8xf32>, vector<2x8x32xf32>, vector<2x1x32xf32> -> vector<2x1x32xf32>
    "tpu.trace_stop"() : () -> ()
    %500 = vector.shape_cast %499 : vector<2x1x32xf32> to vector<2x32xf32>
    %cst_233 = arith.constant dense<0.000000e+00> : vector<2x32xf32>
    %501 = tpu.matmul %470, %9, %cst_233 {dimension_numbers = #tpu.dot_dimension_numbers<[1], [0], [0], [1], [0, 0, 1, 1], [], []>} : vector<2x32xf32>, vector<32x32xf32>, vector<2x32xf32> -> vector<2x32xf32>
    %cst_234 = arith.constant dense<0.000000e+00> : vector<2x32xf32>
    %502 = tpu.matmul %500, %10, %cst_234 {dimension_numbers = #tpu.dot_dimension_numbers<[1], [0], [0], [1], [0, 0, 1, 1], [], []>} : vector<2x32xf32>, vector<32x32xf32>, vector<2x32xf32> -> vector<2x32xf32>
    %503 = arith.addf %501, %502 : vector<2x32xf32>
    %504 = vector.broadcast %11 : vector<1x32xf32> to vector<2x32xf32>
    %505 = arith.addf %503, %504 : vector<2x32xf32>
    %506 = math.tanh %505 : vector<2x32xf32>
    %c3_235 = arith.constant 3 : index
    %c0_236 = arith.constant 0 : index
    %c0_237 = arith.constant 0 : index
    %507 = vector.load %arg13[%c3_235, %c0_236, %c0_237] : memref<8x2x32xf32, #tpu.memory_space<vmem>>, vector<1x2x32xf32>
    %508 = vector.shape_cast %507 : vector<1x2x32xf32> to vector<2x32xf32>
    %509 = vector.shape_cast %506 : vector<2x32xf32> to vector<1x2x32xf32>
    tpu.vector_store %arg13[%c3_235, %c0_236, %c0_237], %509 {strides = array<i32>} : memref<8x2x32xf32, #tpu.memory_space<vmem>>, vector<1x2x32xf32>,
    %c8_i32_238 = arith.constant 8 : i32
    %510 = arith.cmpi eq, %389, %c8_i32_238 : i32
    %511 = arith.extui %510 : i1 to i32
    %c0_i32_239 = arith.constant 0 : i32
    %512 = arith.cmpi ne, %511, %c0_i32_239 : i32
    scf.if %512 {
      %c0_460 = arith.constant 0 : index
      %c0_461 = arith.constant 0 : index
      %c0_462 = arith.constant 0 : index
      %1013 = vector.load %arg15[%c0_460, %c0_461, %c0_462] : memref<2x2x32xf32, #tpu.memory_space<vmem>>, vector<2x2x32xf32>
      %c0_463 = arith.constant 0 : index
      %c0_464 = arith.constant 0 : index
      %c0_465 = arith.constant 0 : index
      %1014 = vector.load %arg14[%c0_463, %c0_464, %c0_465] : memref<2x2x32xf32, #tpu.memory_space<vmem>>, vector<2x2x32xf32>
      tpu.vector_store %arg14[%c0_463, %c0_464, %c0_465], %1013 {strides = array<i32>} : memref<2x2x32xf32, #tpu.memory_space<vmem>>, vector<2x2x32xf32>,
    } else {
    }
    %c8_i32_240 = arith.constant 8 : i32
    %513 = arith.muli %arg0, %c8_i32_240 : i32
    %c4_i32 = arith.constant 4 : i32
    %514 = arith.addi %513, %c4_i32 : i32
    %c0_241 = arith.constant 0 : index
    %c0_242 = arith.constant 0 : index
    %c0_243 = arith.constant 0 : index
    %515 = vector.load %arg15[%c0_241, %c0_242, %c0_243] : memref<2x2x32xf32, #tpu.memory_space<vmem>>, vector<1x2x32xf32>
    %516 = vector.shape_cast %515 : vector<1x2x32xf32> to vector<2x32xf32>
    %c0_244 = arith.constant 0 : index
    %c0_245 = arith.constant 0 : index
    %c0_246 = arith.constant 0 : index
    %517 = vector.load %arg16[%c0_244, %c0_245, %c0_246] : memref<2x2x32xf32, #tpu.memory_space<vmem>>, vector<1x2x32xf32>
    %518 = vector.shape_cast %517 : vector<1x2x32xf32> to vector<2x32xf32>
    %c4 = arith.constant 4 : index
    %c0_247 = arith.constant 0 : index
    %c0_248 = arith.constant 0 : index
    %519 = vector.load %arg1[%c4, %c0_247, %c0_248] : memref<8x2x128xf32, #tpu.memory_space<vmem>>, vector<1x2x128xf32>
    %520 = vector.shape_cast %519 : vector<1x2x128xf32> to vector<2x128xf32>
    %cst_249 = arith.constant dense<0.000000e+00> : vector<2x128xf32>
    %521 = tpu.matmul %516, %3, %cst_249 {dimension_numbers = #tpu.dot_dimension_numbers<[1], [0], [0], [1], [0, 0, 1, 1], [], []>} : vector<2x32xf32>, vector<32x128xf32>, vector<2x128xf32> -> vector<2x128xf32>
    %522 = arith.addf %520, %521 : vector<2x128xf32>
    %523 = vector.extract_strided_slice %522 {offsets = [0, 0], sizes = [2, 32], strides = [1, 1]} : vector<2x128xf32> to vector<2x32xf32>
    %524 = arith.negf %523 : vector<2x32xf32>
    %525 = math.exp %524 : vector<2x32xf32>
    %cst_250 = arith.constant 1.000000e+00 : f32
    %526 = vector.broadcast %cst_250 : f32 to vector<2x32xf32>
    %527 = arith.addf %526, %525 : vector<2x32xf32>
    %528 = arith.divf %526, %527 : vector<2x32xf32>
    %529 = vector.extract_strided_slice %522 {offsets = [0, 32], sizes = [2, 32], strides = [1, 1]} : vector<2x128xf32> to vector<2x32xf32>
    %530 = arith.negf %529 : vector<2x32xf32>
    %531 = math.exp %530 : vector<2x32xf32>
    %cst_251 = arith.constant 1.000000e+00 : f32
    %532 = vector.broadcast %cst_251 : f32 to vector<2x32xf32>
    %533 = arith.addf %532, %531 : vector<2x32xf32>
    %534 = arith.divf %532, %533 : vector<2x32xf32>
    %535 = vector.extract_strided_slice %522 {offsets = [0, 64], sizes = [2, 32], strides = [1, 1]} : vector<2x128xf32> to vector<2x32xf32>
    %536 = math.tanh %535 : vector<2x32xf32>
    %537 = vector.extract_strided_slice %522 {offsets = [0, 96], sizes = [2, 32], strides = [1, 1]} : vector<2x128xf32> to vector<2x32xf32>
    %538 = arith.negf %537 : vector<2x32xf32>
    %539 = math.exp %538 : vector<2x32xf32>
    %cst_252 = arith.constant 1.000000e+00 : f32
    %540 = vector.broadcast %cst_252 : f32 to vector<2x32xf32>
    %541 = arith.addf %540, %539 : vector<2x32xf32>
    %542 = arith.divf %540, %541 : vector<2x32xf32>
    %543 = arith.mulf %534, %518 : vector<2x32xf32>
    %544 = arith.mulf %528, %536 : vector<2x32xf32>
    %545 = arith.addf %543, %544 : vector<2x32xf32>
    %546 = math.tanh %545 : vector<2x32xf32>
    %547 = arith.mulf %542, %546 : vector<2x32xf32>
    %cst_253 = arith.constant -5.000000e+01 : f32
    %cst_254 = arith.constant 5.000000e+01 : f32
    %548 = vector.broadcast %cst_253 : f32 to vector<2x32xf32>
    %549 = arith.maximumf %548, %547 : vector<2x32xf32>
    %550 = vector.broadcast %cst_254 : f32 to vector<2x32xf32>
    %551 = arith.minimumf %550, %549 : vector<2x32xf32>
    %c0_255 = arith.constant 0 : index
    %c0_256 = arith.constant 0 : index
    %c0_257 = arith.constant 0 : index
    %552 = vector.load %arg15[%c0_255, %c0_256, %c0_257] : memref<2x2x32xf32, #tpu.memory_space<vmem>>, vector<1x2x32xf32>
    %553 = vector.shape_cast %552 : vector<1x2x32xf32> to vector<2x32xf32>
    %554 = vector.shape_cast %551 : vector<2x32xf32> to vector<1x2x32xf32>
    tpu.vector_store %arg15[%c0_255, %c0_256, %c0_257], %554 {strides = array<i32>} : memref<2x2x32xf32, #tpu.memory_space<vmem>>, vector<1x2x32xf32>,
    %cst_258 = arith.constant -5.000000e+01 : f32
    %cst_259 = arith.constant 5.000000e+01 : f32
    %555 = vector.broadcast %cst_258 : f32 to vector<2x32xf32>
    %556 = arith.maximumf %555, %545 : vector<2x32xf32>
    %557 = vector.broadcast %cst_259 : f32 to vector<2x32xf32>
    %558 = arith.minimumf %557, %556 : vector<2x32xf32>
    %c0_260 = arith.constant 0 : index
    %c0_261 = arith.constant 0 : index
    %c0_262 = arith.constant 0 : index
    %559 = vector.load %arg16[%c0_260, %c0_261, %c0_262] : memref<2x2x32xf32, #tpu.memory_space<vmem>>, vector<1x2x32xf32>
    %560 = vector.shape_cast %559 : vector<1x2x32xf32> to vector<2x32xf32>
    %561 = vector.shape_cast %558 : vector<2x32xf32> to vector<1x2x32xf32>
    tpu.vector_store %arg16[%c0_260, %c0_261, %c0_262], %561 {strides = array<i32>} : memref<2x2x32xf32, #tpu.memory_space<vmem>>, vector<1x2x32xf32>,
    %c1_263 = arith.constant 1 : index
    %c0_264 = arith.constant 0 : index
    %c0_265 = arith.constant 0 : index
    %562 = vector.load %arg15[%c1_263, %c0_264, %c0_265] : memref<2x2x32xf32, #tpu.memory_space<vmem>>, vector<1x2x32xf32>
    %563 = vector.shape_cast %562 : vector<1x2x32xf32> to vector<2x32xf32>
    %c1_266 = arith.constant 1 : index
    %c0_267 = arith.constant 0 : index
    %c0_268 = arith.constant 0 : index
    %564 = vector.load %arg16[%c1_266, %c0_267, %c0_268] : memref<2x2x32xf32, #tpu.memory_space<vmem>>, vector<1x2x32xf32>
    %565 = vector.shape_cast %564 : vector<1x2x32xf32> to vector<2x32xf32>
    %cst_269 = arith.constant dense<0.000000e+00> : vector<2x128xf32>
    %566 = tpu.matmul %547, %5, %cst_269 {dimension_numbers = #tpu.dot_dimension_numbers<[1], [0], [0], [1], [0, 0, 1, 1], [], []>} : vector<2x32xf32>, vector<32x128xf32>, vector<2x128xf32> -> vector<2x128xf32>
    %cst_270 = arith.constant dense<0.000000e+00> : vector<2x128xf32>
    %567 = tpu.matmul %563, %4, %cst_270 {dimension_numbers = #tpu.dot_dimension_numbers<[1], [0], [0], [1], [0, 0, 1, 1], [], []>} : vector<2x32xf32>, vector<32x128xf32>, vector<2x128xf32> -> vector<2x128xf32>
    %568 = arith.addf %566, %567 : vector<2x128xf32>
    %569 = vector.broadcast %6 : vector<1x128xf32> to vector<2x128xf32>
    %570 = arith.addf %568, %569 : vector<2x128xf32>
    %571 = vector.extract_strided_slice %570 {offsets = [0, 0], sizes = [2, 32], strides = [1, 1]} : vector<2x128xf32> to vector<2x32xf32>
    %572 = arith.negf %571 : vector<2x32xf32>
    %573 = math.exp %572 : vector<2x32xf32>
    %cst_271 = arith.constant 1.000000e+00 : f32
    %574 = vector.broadcast %cst_271 : f32 to vector<2x32xf32>
    %575 = arith.addf %574, %573 : vector<2x32xf32>
    %576 = arith.divf %574, %575 : vector<2x32xf32>
    %577 = vector.extract_strided_slice %570 {offsets = [0, 32], sizes = [2, 32], strides = [1, 1]} : vector<2x128xf32> to vector<2x32xf32>
    %578 = arith.negf %577 : vector<2x32xf32>
    %579 = math.exp %578 : vector<2x32xf32>
    %cst_272 = arith.constant 1.000000e+00 : f32
    %580 = vector.broadcast %cst_272 : f32 to vector<2x32xf32>
    %581 = arith.addf %580, %579 : vector<2x32xf32>
    %582 = arith.divf %580, %581 : vector<2x32xf32>
    %583 = vector.extract_strided_slice %570 {offsets = [0, 64], sizes = [2, 32], strides = [1, 1]} : vector<2x128xf32> to vector<2x32xf32>
    %584 = math.tanh %583 : vector<2x32xf32>
    %585 = vector.extract_strided_slice %570 {offsets = [0, 96], sizes = [2, 32], strides = [1, 1]} : vector<2x128xf32> to vector<2x32xf32>
    %586 = arith.negf %585 : vector<2x32xf32>
    %587 = math.exp %586 : vector<2x32xf32>
    %cst_273 = arith.constant 1.000000e+00 : f32
    %588 = vector.broadcast %cst_273 : f32 to vector<2x32xf32>
    %589 = arith.addf %588, %587 : vector<2x32xf32>
    %590 = arith.divf %588, %589 : vector<2x32xf32>
    %591 = arith.mulf %582, %565 : vector<2x32xf32>
    %592 = arith.mulf %576, %584 : vector<2x32xf32>
    %593 = arith.addf %591, %592 : vector<2x32xf32>
    %594 = math.tanh %593 : vector<2x32xf32>
    %595 = arith.mulf %590, %594 : vector<2x32xf32>
    %cst_274 = arith.constant -5.000000e+01 : f32
    %cst_275 = arith.constant 5.000000e+01 : f32
    %596 = vector.broadcast %cst_274 : f32 to vector<2x32xf32>
    %597 = arith.maximumf %596, %595 : vector<2x32xf32>
    %598 = vector.broadcast %cst_275 : f32 to vector<2x32xf32>
    %599 = arith.minimumf %598, %597 : vector<2x32xf32>
    %c1_276 = arith.constant 1 : index
    %c0_277 = arith.constant 0 : index
    %c0_278 = arith.constant 0 : index
    %600 = vector.load %arg15[%c1_276, %c0_277, %c0_278] : memref<2x2x32xf32, #tpu.memory_space<vmem>>, vector<1x2x32xf32>
    %601 = vector.shape_cast %600 : vector<1x2x32xf32> to vector<2x32xf32>
    %602 = vector.shape_cast %599 : vector<2x32xf32> to vector<1x2x32xf32>
    tpu.vector_store %arg15[%c1_276, %c0_277, %c0_278], %602 {strides = array<i32>} : memref<2x2x32xf32, #tpu.memory_space<vmem>>, vector<1x2x32xf32>,
    %cst_279 = arith.constant -5.000000e+01 : f32
    %cst_280 = arith.constant 5.000000e+01 : f32
    %603 = vector.broadcast %cst_279 : f32 to vector<2x32xf32>
    %604 = arith.maximumf %603, %593 : vector<2x32xf32>
    %605 = vector.broadcast %cst_280 : f32 to vector<2x32xf32>
    %606 = arith.minimumf %605, %604 : vector<2x32xf32>
    %c1_281 = arith.constant 1 : index
    %c0_282 = arith.constant 0 : index
    %c0_283 = arith.constant 0 : index
    %607 = vector.load %arg16[%c1_281, %c0_282, %c0_283] : memref<2x2x32xf32, #tpu.memory_space<vmem>>, vector<1x2x32xf32>
    %608 = vector.shape_cast %607 : vector<1x2x32xf32> to vector<2x32xf32>
    %609 = vector.shape_cast %606 : vector<2x32xf32> to vector<1x2x32xf32>
    tpu.vector_store %arg16[%c1_281, %c0_282, %c0_283], %609 {strides = array<i32>} : memref<2x2x32xf32, #tpu.memory_space<vmem>>, vector<1x2x32xf32>,
    %cst_284 = arith.constant dense<0.000000e+00> : vector<2x8xf32>
    %610 = tpu.matmul %595, %7, %cst_284 {dimension_numbers = #tpu.dot_dimension_numbers<[1], [0], [0], [1], [0, 0, 1, 1], [], []>} : vector<2x32xf32>, vector<32x8xf32>, vector<2x8xf32> -> vector<2x8xf32>
    %611 = vector.broadcast %8 : vector<1x8xf32> to vector<2x8xf32>
    %612 = arith.addf %610, %611 : vector<2x8xf32>
    %cst_285 = arith.constant dense<0xFF800000> : vector<2xf32>
    %613 = vector.multi_reduction <maximumf>, %612, %cst_285 [1] : vector<2x8xf32> to vector<2xf32>
    %614 = vector.shape_cast %613 : vector<2xf32> to vector<2x1xf32>
    %615 = vector.broadcast %614 : vector<2x1xf32> to vector<2x8xf32>
    %616 = arith.subf %612, %615 : vector<2x8xf32>
    %617 = math.exp %616 : vector<2x8xf32>
    %cst_286 = arith.constant dense<0.000000e+00> : vector<2xf32>
    %618 = vector.multi_reduction <add>, %617, %cst_286 [1] : vector<2x8xf32> to vector<2xf32>
    %619 = vector.shape_cast %618 : vector<2xf32> to vector<2x1xf32>
    %620 = tpu.reciprocal %619 {approx = true} : vector<2x1xf32> -> vector<2x1xf32>
    %621 = vector.broadcast %620 : vector<2x1xf32> to vector<2x8xf32>
    %622 = arith.mulf %617, %621 : vector<2x8xf32>
    %623 = vector.shape_cast %622 : vector<2x8xf32> to vector<2x1x8xf32>
    "tpu.trace_start"() <{level = 10 : i32, message = "bqs,bsh->bqh"}> : () -> ()
    %cst_287 = arith.constant dense<0.000000e+00> : vector<2x1x32xf32>
    %624 = tpu.matmul %623, %12, %cst_287 {dimension_numbers = #tpu.dot_dimension_numbers<[2], [1], [1], [2], [0, 0, 0, 1, 1, 2], [0], [0]>} : vector<2x1x8xf32>, vector<2x8x32xf32>, vector<2x1x32xf32> -> vector<2x1x32xf32>
    "tpu.trace_stop"() : () -> ()
    %625 = vector.shape_cast %624 : vector<2x1x32xf32> to vector<2x32xf32>
    %cst_288 = arith.constant dense<0.000000e+00> : vector<2x32xf32>
    %626 = tpu.matmul %595, %9, %cst_288 {dimension_numbers = #tpu.dot_dimension_numbers<[1], [0], [0], [1], [0, 0, 1, 1], [], []>} : vector<2x32xf32>, vector<32x32xf32>, vector<2x32xf32> -> vector<2x32xf32>
    %cst_289 = arith.constant dense<0.000000e+00> : vector<2x32xf32>
    %627 = tpu.matmul %625, %10, %cst_289 {dimension_numbers = #tpu.dot_dimension_numbers<[1], [0], [0], [1], [0, 0, 1, 1], [], []>} : vector<2x32xf32>, vector<32x32xf32>, vector<2x32xf32> -> vector<2x32xf32>
    %628 = arith.addf %626, %627 : vector<2x32xf32>
    %629 = vector.broadcast %11 : vector<1x32xf32> to vector<2x32xf32>
    %630 = arith.addf %628, %629 : vector<2x32xf32>
    %631 = math.tanh %630 : vector<2x32xf32>
    %c4_290 = arith.constant 4 : index
    %c0_291 = arith.constant 0 : index
    %c0_292 = arith.constant 0 : index
    %632 = vector.load %arg13[%c4_290, %c0_291, %c0_292] : memref<8x2x32xf32, #tpu.memory_space<vmem>>, vector<1x2x32xf32>
    %633 = vector.shape_cast %632 : vector<1x2x32xf32> to vector<2x32xf32>
    %634 = vector.shape_cast %631 : vector<2x32xf32> to vector<1x2x32xf32>
    tpu.vector_store %arg13[%c4_290, %c0_291, %c0_292], %634 {strides = array<i32>} : memref<8x2x32xf32, #tpu.memory_space<vmem>>, vector<1x2x32xf32>,
    %c8_i32_293 = arith.constant 8 : i32
    %635 = arith.cmpi eq, %514, %c8_i32_293 : i32
    %636 = arith.extui %635 : i1 to i32
    %c0_i32_294 = arith.constant 0 : i32
    %637 = arith.cmpi ne, %636, %c0_i32_294 : i32
    scf.if %637 {
      %c0_460 = arith.constant 0 : index
      %c0_461 = arith.constant 0 : index
      %c0_462 = arith.constant 0 : index
      %1013 = vector.load %arg15[%c0_460, %c0_461, %c0_462] : memref<2x2x32xf32, #tpu.memory_space<vmem>>, vector<2x2x32xf32>
      %c0_463 = arith.constant 0 : index
      %c0_464 = arith.constant 0 : index
      %c0_465 = arith.constant 0 : index
      %1014 = vector.load %arg14[%c0_463, %c0_464, %c0_465] : memref<2x2x32xf32, #tpu.memory_space<vmem>>, vector<2x2x32xf32>
      tpu.vector_store %arg14[%c0_463, %c0_464, %c0_465], %1013 {strides = array<i32>} : memref<2x2x32xf32, #tpu.memory_space<vmem>>, vector<2x2x32xf32>,
    } else {
    }
    %c8_i32_295 = arith.constant 8 : i32
    %638 = arith.muli %arg0, %c8_i32_295 : i32
    %c5_i32 = arith.constant 5 : i32
    %639 = arith.addi %638, %c5_i32 : i32
    %c0_296 = arith.constant 0 : index
    %c0_297 = arith.constant 0 : index
    %c0_298 = arith.constant 0 : index
    %640 = vector.load %arg15[%c0_296, %c0_297, %c0_298] : memref<2x2x32xf32, #tpu.memory_space<vmem>>, vector<1x2x32xf32>
    %641 = vector.shape_cast %640 : vector<1x2x32xf32> to vector<2x32xf32>
    %c0_299 = arith.constant 0 : index
    %c0_300 = arith.constant 0 : index
    %c0_301 = arith.constant 0 : index
    %642 = vector.load %arg16[%c0_299, %c0_300, %c0_301] : memref<2x2x32xf32, #tpu.memory_space<vmem>>, vector<1x2x32xf32>
    %643 = vector.shape_cast %642 : vector<1x2x32xf32> to vector<2x32xf32>
    %c5 = arith.constant 5 : index
    %c0_302 = arith.constant 0 : index
    %c0_303 = arith.constant 0 : index
    %644 = vector.load %arg1[%c5, %c0_302, %c0_303] : memref<8x2x128xf32, #tpu.memory_space<vmem>>, vector<1x2x128xf32>
    %645 = vector.shape_cast %644 : vector<1x2x128xf32> to vector<2x128xf32>
    %cst_304 = arith.constant dense<0.000000e+00> : vector<2x128xf32>
    %646 = tpu.matmul %641, %3, %cst_304 {dimension_numbers = #tpu.dot_dimension_numbers<[1], [0], [0], [1], [0, 0, 1, 1], [], []>} : vector<2x32xf32>, vector<32x128xf32>, vector<2x128xf32> -> vector<2x128xf32>
    %647 = arith.addf %645, %646 : vector<2x128xf32>
    %648 = vector.extract_strided_slice %647 {offsets = [0, 0], sizes = [2, 32], strides = [1, 1]} : vector<2x128xf32> to vector<2x32xf32>
    %649 = arith.negf %648 : vector<2x32xf32>
    %650 = math.exp %649 : vector<2x32xf32>
    %cst_305 = arith.constant 1.000000e+00 : f32
    %651 = vector.broadcast %cst_305 : f32 to vector<2x32xf32>
    %652 = arith.addf %651, %650 : vector<2x32xf32>
    %653 = arith.divf %651, %652 : vector<2x32xf32>
    %654 = vector.extract_strided_slice %647 {offsets = [0, 32], sizes = [2, 32], strides = [1, 1]} : vector<2x128xf32> to vector<2x32xf32>
    %655 = arith.negf %654 : vector<2x32xf32>
    %656 = math.exp %655 : vector<2x32xf32>
    %cst_306 = arith.constant 1.000000e+00 : f32
    %657 = vector.broadcast %cst_306 : f32 to vector<2x32xf32>
    %658 = arith.addf %657, %656 : vector<2x32xf32>
    %659 = arith.divf %657, %658 : vector<2x32xf32>
    %660 = vector.extract_strided_slice %647 {offsets = [0, 64], sizes = [2, 32], strides = [1, 1]} : vector<2x128xf32> to vector<2x32xf32>
    %661 = math.tanh %660 : vector<2x32xf32>
    %662 = vector.extract_strided_slice %647 {offsets = [0, 96], sizes = [2, 32], strides = [1, 1]} : vector<2x128xf32> to vector<2x32xf32>
    %663 = arith.negf %662 : vector<2x32xf32>
    %664 = math.exp %663 : vector<2x32xf32>
    %cst_307 = arith.constant 1.000000e+00 : f32
    %665 = vector.broadcast %cst_307 : f32 to vector<2x32xf32>
    %666 = arith.addf %665, %664 : vector<2x32xf32>
    %667 = arith.divf %665, %666 : vector<2x32xf32>
    %668 = arith.mulf %659, %643 : vector<2x32xf32>
    %669 = arith.mulf %653, %661 : vector<2x32xf32>
    %670 = arith.addf %668, %669 : vector<2x32xf32>
    %671 = math.tanh %670 : vector<2x32xf32>
    %672 = arith.mulf %667, %671 : vector<2x32xf32>
    %cst_308 = arith.constant -5.000000e+01 : f32
    %cst_309 = arith.constant 5.000000e+01 : f32
    %673 = vector.broadcast %cst_308 : f32 to vector<2x32xf32>
    %674 = arith.maximumf %673, %672 : vector<2x32xf32>
    %675 = vector.broadcast %cst_309 : f32 to vector<2x32xf32>
    %676 = arith.minimumf %675, %674 : vector<2x32xf32>
    %c0_310 = arith.constant 0 : index
    %c0_311 = arith.constant 0 : index
    %c0_312 = arith.constant 0 : index
    %677 = vector.load %arg15[%c0_310, %c0_311, %c0_312] : memref<2x2x32xf32, #tpu.memory_space<vmem>>, vector<1x2x32xf32>
    %678 = vector.shape_cast %677 : vector<1x2x32xf32> to vector<2x32xf32>
    %679 = vector.shape_cast %676 : vector<2x32xf32> to vector<1x2x32xf32>
    tpu.vector_store %arg15[%c0_310, %c0_311, %c0_312], %679 {strides = array<i32>} : memref<2x2x32xf32, #tpu.memory_space<vmem>>, vector<1x2x32xf32>,
    %cst_313 = arith.constant -5.000000e+01 : f32
    %cst_314 = arith.constant 5.000000e+01 : f32
    %680 = vector.broadcast %cst_313 : f32 to vector<2x32xf32>
    %681 = arith.maximumf %680, %670 : vector<2x32xf32>
    %682 = vector.broadcast %cst_314 : f32 to vector<2x32xf32>
    %683 = arith.minimumf %682, %681 : vector<2x32xf32>
    %c0_315 = arith.constant 0 : index
    %c0_316 = arith.constant 0 : index
    %c0_317 = arith.constant 0 : index
    %684 = vector.load %arg16[%c0_315, %c0_316, %c0_317] : memref<2x2x32xf32, #tpu.memory_space<vmem>>, vector<1x2x32xf32>
    %685 = vector.shape_cast %684 : vector<1x2x32xf32> to vector<2x32xf32>
    %686 = vector.shape_cast %683 : vector<2x32xf32> to vector<1x2x32xf32>
    tpu.vector_store %arg16[%c0_315, %c0_316, %c0_317], %686 {strides = array<i32>} : memref<2x2x32xf32, #tpu.memory_space<vmem>>, vector<1x2x32xf32>,
    %c1_318 = arith.constant 1 : index
    %c0_319 = arith.constant 0 : index
    %c0_320 = arith.constant 0 : index
    %687 = vector.load %arg15[%c1_318, %c0_319, %c0_320] : memref<2x2x32xf32, #tpu.memory_space<vmem>>, vector<1x2x32xf32>
    %688 = vector.shape_cast %687 : vector<1x2x32xf32> to vector<2x32xf32>
    %c1_321 = arith.constant 1 : index
    %c0_322 = arith.constant 0 : index
    %c0_323 = arith.constant 0 : index
    %689 = vector.load %arg16[%c1_321, %c0_322, %c0_323] : memref<2x2x32xf32, #tpu.memory_space<vmem>>, vector<1x2x32xf32>
    %690 = vector.shape_cast %689 : vector<1x2x32xf32> to vector<2x32xf32>
    %cst_324 = arith.constant dense<0.000000e+00> : vector<2x128xf32>
    %691 = tpu.matmul %672, %5, %cst_324 {dimension_numbers = #tpu.dot_dimension_numbers<[1], [0], [0], [1], [0, 0, 1, 1], [], []>} : vector<2x32xf32>, vector<32x128xf32>, vector<2x128xf32> -> vector<2x128xf32>
    %cst_325 = arith.constant dense<0.000000e+00> : vector<2x128xf32>
    %692 = tpu.matmul %688, %4, %cst_325 {dimension_numbers = #tpu.dot_dimension_numbers<[1], [0], [0], [1], [0, 0, 1, 1], [], []>} : vector<2x32xf32>, vector<32x128xf32>, vector<2x128xf32> -> vector<2x128xf32>
    %693 = arith.addf %691, %692 : vector<2x128xf32>
    %694 = vector.broadcast %6 : vector<1x128xf32> to vector<2x128xf32>
    %695 = arith.addf %693, %694 : vector<2x128xf32>
    %696 = vector.extract_strided_slice %695 {offsets = [0, 0], sizes = [2, 32], strides = [1, 1]} : vector<2x128xf32> to vector<2x32xf32>
    %697 = arith.negf %696 : vector<2x32xf32>
    %698 = math.exp %697 : vector<2x32xf32>
    %cst_326 = arith.constant 1.000000e+00 : f32
    %699 = vector.broadcast %cst_326 : f32 to vector<2x32xf32>
    %700 = arith.addf %699, %698 : vector<2x32xf32>
    %701 = arith.divf %699, %700 : vector<2x32xf32>
    %702 = vector.extract_strided_slice %695 {offsets = [0, 32], sizes = [2, 32], strides = [1, 1]} : vector<2x128xf32> to vector<2x32xf32>
    %703 = arith.negf %702 : vector<2x32xf32>
    %704 = math.exp %703 : vector<2x32xf32>
    %cst_327 = arith.constant 1.000000e+00 : f32
    %705 = vector.broadcast %cst_327 : f32 to vector<2x32xf32>
    %706 = arith.addf %705, %704 : vector<2x32xf32>
    %707 = arith.divf %705, %706 : vector<2x32xf32>
    %708 = vector.extract_strided_slice %695 {offsets = [0, 64], sizes = [2, 32], strides = [1, 1]} : vector<2x128xf32> to vector<2x32xf32>
    %709 = math.tanh %708 : vector<2x32xf32>
    %710 = vector.extract_strided_slice %695 {offsets = [0, 96], sizes = [2, 32], strides = [1, 1]} : vector<2x128xf32> to vector<2x32xf32>
    %711 = arith.negf %710 : vector<2x32xf32>
    %712 = math.exp %711 : vector<2x32xf32>
    %cst_328 = arith.constant 1.000000e+00 : f32
    %713 = vector.broadcast %cst_328 : f32 to vector<2x32xf32>
    %714 = arith.addf %713, %712 : vector<2x32xf32>
    %715 = arith.divf %713, %714 : vector<2x32xf32>
    %716 = arith.mulf %707, %690 : vector<2x32xf32>
    %717 = arith.mulf %701, %709 : vector<2x32xf32>
    %718 = arith.addf %716, %717 : vector<2x32xf32>
    %719 = math.tanh %718 : vector<2x32xf32>
    %720 = arith.mulf %715, %719 : vector<2x32xf32>
    %cst_329 = arith.constant -5.000000e+01 : f32
    %cst_330 = arith.constant 5.000000e+01 : f32
    %721 = vector.broadcast %cst_329 : f32 to vector<2x32xf32>
    %722 = arith.maximumf %721, %720 : vector<2x32xf32>
    %723 = vector.broadcast %cst_330 : f32 to vector<2x32xf32>
    %724 = arith.minimumf %723, %722 : vector<2x32xf32>
    %c1_331 = arith.constant 1 : index
    %c0_332 = arith.constant 0 : index
    %c0_333 = arith.constant 0 : index
    %725 = vector.load %arg15[%c1_331, %c0_332, %c0_333] : memref<2x2x32xf32, #tpu.memory_space<vmem>>, vector<1x2x32xf32>
    %726 = vector.shape_cast %725 : vector<1x2x32xf32> to vector<2x32xf32>
    %727 = vector.shape_cast %724 : vector<2x32xf32> to vector<1x2x32xf32>
    tpu.vector_store %arg15[%c1_331, %c0_332, %c0_333], %727 {strides = array<i32>} : memref<2x2x32xf32, #tpu.memory_space<vmem>>, vector<1x2x32xf32>,
    %cst_334 = arith.constant -5.000000e+01 : f32
    %cst_335 = arith.constant 5.000000e+01 : f32
    %728 = vector.broadcast %cst_334 : f32 to vector<2x32xf32>
    %729 = arith.maximumf %728, %718 : vector<2x32xf32>
    %730 = vector.broadcast %cst_335 : f32 to vector<2x32xf32>
    %731 = arith.minimumf %730, %729 : vector<2x32xf32>
    %c1_336 = arith.constant 1 : index
    %c0_337 = arith.constant 0 : index
    %c0_338 = arith.constant 0 : index
    %732 = vector.load %arg16[%c1_336, %c0_337, %c0_338] : memref<2x2x32xf32, #tpu.memory_space<vmem>>, vector<1x2x32xf32>
    %733 = vector.shape_cast %732 : vector<1x2x32xf32> to vector<2x32xf32>
    %734 = vector.shape_cast %731 : vector<2x32xf32> to vector<1x2x32xf32>
    tpu.vector_store %arg16[%c1_336, %c0_337, %c0_338], %734 {strides = array<i32>} : memref<2x2x32xf32, #tpu.memory_space<vmem>>, vector<1x2x32xf32>,
    %cst_339 = arith.constant dense<0.000000e+00> : vector<2x8xf32>
    %735 = tpu.matmul %720, %7, %cst_339 {dimension_numbers = #tpu.dot_dimension_numbers<[1], [0], [0], [1], [0, 0, 1, 1], [], []>} : vector<2x32xf32>, vector<32x8xf32>, vector<2x8xf32> -> vector<2x8xf32>
    %736 = vector.broadcast %8 : vector<1x8xf32> to vector<2x8xf32>
    %737 = arith.addf %735, %736 : vector<2x8xf32>
    %cst_340 = arith.constant dense<0xFF800000> : vector<2xf32>
    %738 = vector.multi_reduction <maximumf>, %737, %cst_340 [1] : vector<2x8xf32> to vector<2xf32>
    %739 = vector.shape_cast %738 : vector<2xf32> to vector<2x1xf32>
    %740 = vector.broadcast %739 : vector<2x1xf32> to vector<2x8xf32>
    %741 = arith.subf %737, %740 : vector<2x8xf32>
    %742 = math.exp %741 : vector<2x8xf32>
    %cst_341 = arith.constant dense<0.000000e+00> : vector<2xf32>
    %743 = vector.multi_reduction <add>, %742, %cst_341 [1] : vector<2x8xf32> to vector<2xf32>
    %744 = vector.shape_cast %743 : vector<2xf32> to vector<2x1xf32>
    %745 = tpu.reciprocal %744 {approx = true} : vector<2x1xf32> -> vector<2x1xf32>
    %746 = vector.broadcast %745 : vector<2x1xf32> to vector<2x8xf32>
    %747 = arith.mulf %742, %746 : vector<2x8xf32>
    %748 = vector.shape_cast %747 : vector<2x8xf32> to vector<2x1x8xf32>
    "tpu.trace_start"() <{level = 10 : i32, message = "bqs,bsh->bqh"}> : () -> ()
    %cst_342 = arith.constant dense<0.000000e+00> : vector<2x1x32xf32>
    %749 = tpu.matmul %748, %12, %cst_342 {dimension_numbers = #tpu.dot_dimension_numbers<[2], [1], [1], [2], [0, 0, 0, 1, 1, 2], [0], [0]>} : vector<2x1x8xf32>, vector<2x8x32xf32>, vector<2x1x32xf32> -> vector<2x1x32xf32>
    "tpu.trace_stop"() : () -> ()
    %750 = vector.shape_cast %749 : vector<2x1x32xf32> to vector<2x32xf32>
    %cst_343 = arith.constant dense<0.000000e+00> : vector<2x32xf32>
    %751 = tpu.matmul %720, %9, %cst_343 {dimension_numbers = #tpu.dot_dimension_numbers<[1], [0], [0], [1], [0, 0, 1, 1], [], []>} : vector<2x32xf32>, vector<32x32xf32>, vector<2x32xf32> -> vector<2x32xf32>
    %cst_344 = arith.constant dense<0.000000e+00> : vector<2x32xf32>
    %752 = tpu.matmul %750, %10, %cst_344 {dimension_numbers = #tpu.dot_dimension_numbers<[1], [0], [0], [1], [0, 0, 1, 1], [], []>} : vector<2x32xf32>, vector<32x32xf32>, vector<2x32xf32> -> vector<2x32xf32>
    %753 = arith.addf %751, %752 : vector<2x32xf32>
    %754 = vector.broadcast %11 : vector<1x32xf32> to vector<2x32xf32>
    %755 = arith.addf %753, %754 : vector<2x32xf32>
    %756 = math.tanh %755 : vector<2x32xf32>
    %c5_345 = arith.constant 5 : index
    %c0_346 = arith.constant 0 : index
    %c0_347 = arith.constant 0 : index
    %757 = vector.load %arg13[%c5_345, %c0_346, %c0_347] : memref<8x2x32xf32, #tpu.memory_space<vmem>>, vector<1x2x32xf32>
    %758 = vector.shape_cast %757 : vector<1x2x32xf32> to vector<2x32xf32>
    %759 = vector.shape_cast %756 : vector<2x32xf32> to vector<1x2x32xf32>
    tpu.vector_store %arg13[%c5_345, %c0_346, %c0_347], %759 {strides = array<i32>} : memref<8x2x32xf32, #tpu.memory_space<vmem>>, vector<1x2x32xf32>,
    %c8_i32_348 = arith.constant 8 : i32
    %760 = arith.cmpi eq, %639, %c8_i32_348 : i32
    %761 = arith.extui %760 : i1 to i32
    %c0_i32_349 = arith.constant 0 : i32
    %762 = arith.cmpi ne, %761, %c0_i32_349 : i32
    scf.if %762 {
      %c0_460 = arith.constant 0 : index
      %c0_461 = arith.constant 0 : index
      %c0_462 = arith.constant 0 : index
      %1013 = vector.load %arg15[%c0_460, %c0_461, %c0_462] : memref<2x2x32xf32, #tpu.memory_space<vmem>>, vector<2x2x32xf32>
      %c0_463 = arith.constant 0 : index
      %c0_464 = arith.constant 0 : index
      %c0_465 = arith.constant 0 : index
      %1014 = vector.load %arg14[%c0_463, %c0_464, %c0_465] : memref<2x2x32xf32, #tpu.memory_space<vmem>>, vector<2x2x32xf32>
      tpu.vector_store %arg14[%c0_463, %c0_464, %c0_465], %1013 {strides = array<i32>} : memref<2x2x32xf32, #tpu.memory_space<vmem>>, vector<2x2x32xf32>,
    } else {
    }
    %c8_i32_350 = arith.constant 8 : i32
    %763 = arith.muli %arg0, %c8_i32_350 : i32
    %c6_i32 = arith.constant 6 : i32
    %764 = arith.addi %763, %c6_i32 : i32
    %c0_351 = arith.constant 0 : index
    %c0_352 = arith.constant 0 : index
    %c0_353 = arith.constant 0 : index
    %765 = vector.load %arg15[%c0_351, %c0_352, %c0_353] : memref<2x2x32xf32, #tpu.memory_space<vmem>>, vector<1x2x32xf32>
    %766 = vector.shape_cast %765 : vector<1x2x32xf32> to vector<2x32xf32>
    %c0_354 = arith.constant 0 : index
    %c0_355 = arith.constant 0 : index
    %c0_356 = arith.constant 0 : index
    %767 = vector.load %arg16[%c0_354, %c0_355, %c0_356] : memref<2x2x32xf32, #tpu.memory_space<vmem>>, vector<1x2x32xf32>
    %768 = vector.shape_cast %767 : vector<1x2x32xf32> to vector<2x32xf32>
    %c6 = arith.constant 6 : index
    %c0_357 = arith.constant 0 : index
    %c0_358 = arith.constant 0 : index
    %769 = vector.load %arg1[%c6, %c0_357, %c0_358] : memref<8x2x128xf32, #tpu.memory_space<vmem>>, vector<1x2x128xf32>
    %770 = vector.shape_cast %769 : vector<1x2x128xf32> to vector<2x128xf32>
    %cst_359 = arith.constant dense<0.000000e+00> : vector<2x128xf32>
    %771 = tpu.matmul %766, %3, %cst_359 {dimension_numbers = #tpu.dot_dimension_numbers<[1], [0], [0], [1], [0, 0, 1, 1], [], []>} : vector<2x32xf32>, vector<32x128xf32>, vector<2x128xf32> -> vector<2x128xf32>
    %772 = arith.addf %770, %771 : vector<2x128xf32>
    %773 = vector.extract_strided_slice %772 {offsets = [0, 0], sizes = [2, 32], strides = [1, 1]} : vector<2x128xf32> to vector<2x32xf32>
    %774 = arith.negf %773 : vector<2x32xf32>
    %775 = math.exp %774 : vector<2x32xf32>
    %cst_360 = arith.constant 1.000000e+00 : f32
    %776 = vector.broadcast %cst_360 : f32 to vector<2x32xf32>
    %777 = arith.addf %776, %775 : vector<2x32xf32>
    %778 = arith.divf %776, %777 : vector<2x32xf32>
    %779 = vector.extract_strided_slice %772 {offsets = [0, 32], sizes = [2, 32], strides = [1, 1]} : vector<2x128xf32> to vector<2x32xf32>
    %780 = arith.negf %779 : vector<2x32xf32>
    %781 = math.exp %780 : vector<2x32xf32>
    %cst_361 = arith.constant 1.000000e+00 : f32
    %782 = vector.broadcast %cst_361 : f32 to vector<2x32xf32>
    %783 = arith.addf %782, %781 : vector<2x32xf32>
    %784 = arith.divf %782, %783 : vector<2x32xf32>
    %785 = vector.extract_strided_slice %772 {offsets = [0, 64], sizes = [2, 32], strides = [1, 1]} : vector<2x128xf32> to vector<2x32xf32>
    %786 = math.tanh %785 : vector<2x32xf32>
    %787 = vector.extract_strided_slice %772 {offsets = [0, 96], sizes = [2, 32], strides = [1, 1]} : vector<2x128xf32> to vector<2x32xf32>
    %788 = arith.negf %787 : vector<2x32xf32>
    %789 = math.exp %788 : vector<2x32xf32>
    %cst_362 = arith.constant 1.000000e+00 : f32
    %790 = vector.broadcast %cst_362 : f32 to vector<2x32xf32>
    %791 = arith.addf %790, %789 : vector<2x32xf32>
    %792 = arith.divf %790, %791 : vector<2x32xf32>
    %793 = arith.mulf %784, %768 : vector<2x32xf32>
    %794 = arith.mulf %778, %786 : vector<2x32xf32>
    %795 = arith.addf %793, %794 : vector<2x32xf32>
    %796 = math.tanh %795 : vector<2x32xf32>
    %797 = arith.mulf %792, %796 : vector<2x32xf32>
    %cst_363 = arith.constant -5.000000e+01 : f32
    %cst_364 = arith.constant 5.000000e+01 : f32
    %798 = vector.broadcast %cst_363 : f32 to vector<2x32xf32>
    %799 = arith.maximumf %798, %797 : vector<2x32xf32>
    %800 = vector.broadcast %cst_364 : f32 to vector<2x32xf32>
    %801 = arith.minimumf %800, %799 : vector<2x32xf32>
    %c0_365 = arith.constant 0 : index
    %c0_366 = arith.constant 0 : index
    %c0_367 = arith.constant 0 : index
    %802 = vector.load %arg15[%c0_365, %c0_366, %c0_367] : memref<2x2x32xf32, #tpu.memory_space<vmem>>, vector<1x2x32xf32>
    %803 = vector.shape_cast %802 : vector<1x2x32xf32> to vector<2x32xf32>
    %804 = vector.shape_cast %801 : vector<2x32xf32> to vector<1x2x32xf32>
    tpu.vector_store %arg15[%c0_365, %c0_366, %c0_367], %804 {strides = array<i32>} : memref<2x2x32xf32, #tpu.memory_space<vmem>>, vector<1x2x32xf32>,
    %cst_368 = arith.constant -5.000000e+01 : f32
    %cst_369 = arith.constant 5.000000e+01 : f32
    %805 = vector.broadcast %cst_368 : f32 to vector<2x32xf32>
    %806 = arith.maximumf %805, %795 : vector<2x32xf32>
    %807 = vector.broadcast %cst_369 : f32 to vector<2x32xf32>
    %808 = arith.minimumf %807, %806 : vector<2x32xf32>
    %c0_370 = arith.constant 0 : index
    %c0_371 = arith.constant 0 : index
    %c0_372 = arith.constant 0 : index
    %809 = vector.load %arg16[%c0_370, %c0_371, %c0_372] : memref<2x2x32xf32, #tpu.memory_space<vmem>>, vector<1x2x32xf32>
    %810 = vector.shape_cast %809 : vector<1x2x32xf32> to vector<2x32xf32>
    %811 = vector.shape_cast %808 : vector<2x32xf32> to vector<1x2x32xf32>
    tpu.vector_store %arg16[%c0_370, %c0_371, %c0_372], %811 {strides = array<i32>} : memref<2x2x32xf32, #tpu.memory_space<vmem>>, vector<1x2x32xf32>,
    %c1_373 = arith.constant 1 : index
    %c0_374 = arith.constant 0 : index
    %c0_375 = arith.constant 0 : index
    %812 = vector.load %arg15[%c1_373, %c0_374, %c0_375] : memref<2x2x32xf32, #tpu.memory_space<vmem>>, vector<1x2x32xf32>
    %813 = vector.shape_cast %812 : vector<1x2x32xf32> to vector<2x32xf32>
    %c1_376 = arith.constant 1 : index
    %c0_377 = arith.constant 0 : index
    %c0_378 = arith.constant 0 : index
    %814 = vector.load %arg16[%c1_376, %c0_377, %c0_378] : memref<2x2x32xf32, #tpu.memory_space<vmem>>, vector<1x2x32xf32>
    %815 = vector.shape_cast %814 : vector<1x2x32xf32> to vector<2x32xf32>
    %cst_379 = arith.constant dense<0.000000e+00> : vector<2x128xf32>
    %816 = tpu.matmul %797, %5, %cst_379 {dimension_numbers = #tpu.dot_dimension_numbers<[1], [0], [0], [1], [0, 0, 1, 1], [], []>} : vector<2x32xf32>, vector<32x128xf32>, vector<2x128xf32> -> vector<2x128xf32>
    %cst_380 = arith.constant dense<0.000000e+00> : vector<2x128xf32>
    %817 = tpu.matmul %813, %4, %cst_380 {dimension_numbers = #tpu.dot_dimension_numbers<[1], [0], [0], [1], [0, 0, 1, 1], [], []>} : vector<2x32xf32>, vector<32x128xf32>, vector<2x128xf32> -> vector<2x128xf32>
    %818 = arith.addf %816, %817 : vector<2x128xf32>
    %819 = vector.broadcast %6 : vector<1x128xf32> to vector<2x128xf32>
    %820 = arith.addf %818, %819 : vector<2x128xf32>
    %821 = vector.extract_strided_slice %820 {offsets = [0, 0], sizes = [2, 32], strides = [1, 1]} : vector<2x128xf32> to vector<2x32xf32>
    %822 = arith.negf %821 : vector<2x32xf32>
    %823 = math.exp %822 : vector<2x32xf32>
    %cst_381 = arith.constant 1.000000e+00 : f32
    %824 = vector.broadcast %cst_381 : f32 to vector<2x32xf32>
    %825 = arith.addf %824, %823 : vector<2x32xf32>
    %826 = arith.divf %824, %825 : vector<2x32xf32>
    %827 = vector.extract_strided_slice %820 {offsets = [0, 32], sizes = [2, 32], strides = [1, 1]} : vector<2x128xf32> to vector<2x32xf32>
    %828 = arith.negf %827 : vector<2x32xf32>
    %829 = math.exp %828 : vector<2x32xf32>
    %cst_382 = arith.constant 1.000000e+00 : f32
    %830 = vector.broadcast %cst_382 : f32 to vector<2x32xf32>
    %831 = arith.addf %830, %829 : vector<2x32xf32>
    %832 = arith.divf %830, %831 : vector<2x32xf32>
    %833 = vector.extract_strided_slice %820 {offsets = [0, 64], sizes = [2, 32], strides = [1, 1]} : vector<2x128xf32> to vector<2x32xf32>
    %834 = math.tanh %833 : vector<2x32xf32>
    %835 = vector.extract_strided_slice %820 {offsets = [0, 96], sizes = [2, 32], strides = [1, 1]} : vector<2x128xf32> to vector<2x32xf32>
    %836 = arith.negf %835 : vector<2x32xf32>
    %837 = math.exp %836 : vector<2x32xf32>
    %cst_383 = arith.constant 1.000000e+00 : f32
    %838 = vector.broadcast %cst_383 : f32 to vector<2x32xf32>
    %839 = arith.addf %838, %837 : vector<2x32xf32>
    %840 = arith.divf %838, %839 : vector<2x32xf32>
    %841 = arith.mulf %832, %815 : vector<2x32xf32>
    %842 = arith.mulf %826, %834 : vector<2x32xf32>
    %843 = arith.addf %841, %842 : vector<2x32xf32>
    %844 = math.tanh %843 : vector<2x32xf32>
    %845 = arith.mulf %840, %844 : vector<2x32xf32>
    %cst_384 = arith.constant -5.000000e+01 : f32
    %cst_385 = arith.constant 5.000000e+01 : f32
    %846 = vector.broadcast %cst_384 : f32 to vector<2x32xf32>
    %847 = arith.maximumf %846, %845 : vector<2x32xf32>
    %848 = vector.broadcast %cst_385 : f32 to vector<2x32xf32>
    %849 = arith.minimumf %848, %847 : vector<2x32xf32>
    %c1_386 = arith.constant 1 : index
    %c0_387 = arith.constant 0 : index
    %c0_388 = arith.constant 0 : index
    %850 = vector.load %arg15[%c1_386, %c0_387, %c0_388] : memref<2x2x32xf32, #tpu.memory_space<vmem>>, vector<1x2x32xf32>
    %851 = vector.shape_cast %850 : vector<1x2x32xf32> to vector<2x32xf32>
    %852 = vector.shape_cast %849 : vector<2x32xf32> to vector<1x2x32xf32>
    tpu.vector_store %arg15[%c1_386, %c0_387, %c0_388], %852 {strides = array<i32>} : memref<2x2x32xf32, #tpu.memory_space<vmem>>, vector<1x2x32xf32>,
    %cst_389 = arith.constant -5.000000e+01 : f32
    %cst_390 = arith.constant 5.000000e+01 : f32
    %853 = vector.broadcast %cst_389 : f32 to vector<2x32xf32>
    %854 = arith.maximumf %853, %843 : vector<2x32xf32>
    %855 = vector.broadcast %cst_390 : f32 to vector<2x32xf32>
    %856 = arith.minimumf %855, %854 : vector<2x32xf32>
    %c1_391 = arith.constant 1 : index
    %c0_392 = arith.constant 0 : index
    %c0_393 = arith.constant 0 : index
    %857 = vector.load %arg16[%c1_391, %c0_392, %c0_393] : memref<2x2x32xf32, #tpu.memory_space<vmem>>, vector<1x2x32xf32>
    %858 = vector.shape_cast %857 : vector<1x2x32xf32> to vector<2x32xf32>
    %859 = vector.shape_cast %856 : vector<2x32xf32> to vector<1x2x32xf32>
    tpu.vector_store %arg16[%c1_391, %c0_392, %c0_393], %859 {strides = array<i32>} : memref<2x2x32xf32, #tpu.memory_space<vmem>>, vector<1x2x32xf32>,
    %cst_394 = arith.constant dense<0.000000e+00> : vector<2x8xf32>
    %860 = tpu.matmul %845, %7, %cst_394 {dimension_numbers = #tpu.dot_dimension_numbers<[1], [0], [0], [1], [0, 0, 1, 1], [], []>} : vector<2x32xf32>, vector<32x8xf32>, vector<2x8xf32> -> vector<2x8xf32>
    %861 = vector.broadcast %8 : vector<1x8xf32> to vector<2x8xf32>
    %862 = arith.addf %860, %861 : vector<2x8xf32>
    %cst_395 = arith.constant dense<0xFF800000> : vector<2xf32>
    %863 = vector.multi_reduction <maximumf>, %862, %cst_395 [1] : vector<2x8xf32> to vector<2xf32>
    %864 = vector.shape_cast %863 : vector<2xf32> to vector<2x1xf32>
    %865 = vector.broadcast %864 : vector<2x1xf32> to vector<2x8xf32>
    %866 = arith.subf %862, %865 : vector<2x8xf32>
    %867 = math.exp %866 : vector<2x8xf32>
    %cst_396 = arith.constant dense<0.000000e+00> : vector<2xf32>
    %868 = vector.multi_reduction <add>, %867, %cst_396 [1] : vector<2x8xf32> to vector<2xf32>
    %869 = vector.shape_cast %868 : vector<2xf32> to vector<2x1xf32>
    %870 = tpu.reciprocal %869 {approx = true} : vector<2x1xf32> -> vector<2x1xf32>
    %871 = vector.broadcast %870 : vector<2x1xf32> to vector<2x8xf32>
    %872 = arith.mulf %867, %871 : vector<2x8xf32>
    %873 = vector.shape_cast %872 : vector<2x8xf32> to vector<2x1x8xf32>
    "tpu.trace_start"() <{level = 10 : i32, message = "bqs,bsh->bqh"}> : () -> ()
    %cst_397 = arith.constant dense<0.000000e+00> : vector<2x1x32xf32>
    %874 = tpu.matmul %873, %12, %cst_397 {dimension_numbers = #tpu.dot_dimension_numbers<[2], [1], [1], [2], [0, 0, 0, 1, 1, 2], [0], [0]>} : vector<2x1x8xf32>, vector<2x8x32xf32>, vector<2x1x32xf32> -> vector<2x1x32xf32>
    "tpu.trace_stop"() : () -> ()
    %875 = vector.shape_cast %874 : vector<2x1x32xf32> to vector<2x32xf32>
    %cst_398 = arith.constant dense<0.000000e+00> : vector<2x32xf32>
    %876 = tpu.matmul %845, %9, %cst_398 {dimension_numbers = #tpu.dot_dimension_numbers<[1], [0], [0], [1], [0, 0, 1, 1], [], []>} : vector<2x32xf32>, vector<32x32xf32>, vector<2x32xf32> -> vector<2x32xf32>
    %cst_399 = arith.constant dense<0.000000e+00> : vector<2x32xf32>
    %877 = tpu.matmul %875, %10, %cst_399 {dimension_numbers = #tpu.dot_dimension_numbers<[1], [0], [0], [1], [0, 0, 1, 1], [], []>} : vector<2x32xf32>, vector<32x32xf32>, vector<2x32xf32> -> vector<2x32xf32>
    %878 = arith.addf %876, %877 : vector<2x32xf32>
    %879 = vector.broadcast %11 : vector<1x32xf32> to vector<2x32xf32>
    %880 = arith.addf %878, %879 : vector<2x32xf32>
    %881 = math.tanh %880 : vector<2x32xf32>
    %c6_400 = arith.constant 6 : index
    %c0_401 = arith.constant 0 : index
    %c0_402 = arith.constant 0 : index
    %882 = vector.load %arg13[%c6_400, %c0_401, %c0_402] : memref<8x2x32xf32, #tpu.memory_space<vmem>>, vector<1x2x32xf32>
    %883 = vector.shape_cast %882 : vector<1x2x32xf32> to vector<2x32xf32>
    %884 = vector.shape_cast %881 : vector<2x32xf32> to vector<1x2x32xf32>
    tpu.vector_store %arg13[%c6_400, %c0_401, %c0_402], %884 {strides = array<i32>} : memref<8x2x32xf32, #tpu.memory_space<vmem>>, vector<1x2x32xf32>,
    %c8_i32_403 = arith.constant 8 : i32
    %885 = arith.cmpi eq, %764, %c8_i32_403 : i32
    %886 = arith.extui %885 : i1 to i32
    %c0_i32_404 = arith.constant 0 : i32
    %887 = arith.cmpi ne, %886, %c0_i32_404 : i32
    scf.if %887 {
      %c0_460 = arith.constant 0 : index
      %c0_461 = arith.constant 0 : index
      %c0_462 = arith.constant 0 : index
      %1013 = vector.load %arg15[%c0_460, %c0_461, %c0_462] : memref<2x2x32xf32, #tpu.memory_space<vmem>>, vector<2x2x32xf32>
      %c0_463 = arith.constant 0 : index
      %c0_464 = arith.constant 0 : index
      %c0_465 = arith.constant 0 : index
      %1014 = vector.load %arg14[%c0_463, %c0_464, %c0_465] : memref<2x2x32xf32, #tpu.memory_space<vmem>>, vector<2x2x32xf32>
      tpu.vector_store %arg14[%c0_463, %c0_464, %c0_465], %1013 {strides = array<i32>} : memref<2x2x32xf32, #tpu.memory_space<vmem>>, vector<2x2x32xf32>,
    } else {
    }
    %c8_i32_405 = arith.constant 8 : i32
    %888 = arith.muli %arg0, %c8_i32_405 : i32
    %c7_i32 = arith.constant 7 : i32
    %889 = arith.addi %888, %c7_i32 : i32
    %c0_406 = arith.constant 0 : index
    %c0_407 = arith.constant 0 : index
    %c0_408 = arith.constant 0 : index
    %890 = vector.load %arg15[%c0_406, %c0_407, %c0_408] : memref<2x2x32xf32, #tpu.memory_space<vmem>>, vector<1x2x32xf32>
    %891 = vector.shape_cast %890 : vector<1x2x32xf32> to vector<2x32xf32>
    %c0_409 = arith.constant 0 : index
    %c0_410 = arith.constant 0 : index
    %c0_411 = arith.constant 0 : index
    %892 = vector.load %arg16[%c0_409, %c0_410, %c0_411] : memref<2x2x32xf32, #tpu.memory_space<vmem>>, vector<1x2x32xf32>
    %893 = vector.shape_cast %892 : vector<1x2x32xf32> to vector<2x32xf32>
    %c7 = arith.constant 7 : index
    %c0_412 = arith.constant 0 : index
    %c0_413 = arith.constant 0 : index
    %894 = vector.load %arg1[%c7, %c0_412, %c0_413] : memref<8x2x128xf32, #tpu.memory_space<vmem>>, vector<1x2x128xf32>
    %895 = vector.shape_cast %894 : vector<1x2x128xf32> to vector<2x128xf32>
    %cst_414 = arith.constant dense<0.000000e+00> : vector<2x128xf32>
    %896 = tpu.matmul %891, %3, %cst_414 {dimension_numbers = #tpu.dot_dimension_numbers<[1], [0], [0], [1], [0, 0, 1, 1], [], []>} : vector<2x32xf32>, vector<32x128xf32>, vector<2x128xf32> -> vector<2x128xf32>
    %897 = arith.addf %895, %896 : vector<2x128xf32>
    %898 = vector.extract_strided_slice %897 {offsets = [0, 0], sizes = [2, 32], strides = [1, 1]} : vector<2x128xf32> to vector<2x32xf32>
    %899 = arith.negf %898 : vector<2x32xf32>
    %900 = math.exp %899 : vector<2x32xf32>
    %cst_415 = arith.constant 1.000000e+00 : f32
    %901 = vector.broadcast %cst_415 : f32 to vector<2x32xf32>
    %902 = arith.addf %901, %900 : vector<2x32xf32>
    %903 = arith.divf %901, %902 : vector<2x32xf32>
    %904 = vector.extract_strided_slice %897 {offsets = [0, 32], sizes = [2, 32], strides = [1, 1]} : vector<2x128xf32> to vector<2x32xf32>
    %905 = arith.negf %904 : vector<2x32xf32>
    %906 = math.exp %905 : vector<2x32xf32>
    %cst_416 = arith.constant 1.000000e+00 : f32
    %907 = vector.broadcast %cst_416 : f32 to vector<2x32xf32>
    %908 = arith.addf %907, %906 : vector<2x32xf32>
    %909 = arith.divf %907, %908 : vector<2x32xf32>
    %910 = vector.extract_strided_slice %897 {offsets = [0, 64], sizes = [2, 32], strides = [1, 1]} : vector<2x128xf32> to vector<2x32xf32>
    %911 = math.tanh %910 : vector<2x32xf32>
    %912 = vector.extract_strided_slice %897 {offsets = [0, 96], sizes = [2, 32], strides = [1, 1]} : vector<2x128xf32> to vector<2x32xf32>
    %913 = arith.negf %912 : vector<2x32xf32>
    %914 = math.exp %913 : vector<2x32xf32>
    %cst_417 = arith.constant 1.000000e+00 : f32
    %915 = vector.broadcast %cst_417 : f32 to vector<2x32xf32>
    %916 = arith.addf %915, %914 : vector<2x32xf32>
    %917 = arith.divf %915, %916 : vector<2x32xf32>
    %918 = arith.mulf %909, %893 : vector<2x32xf32>
    %919 = arith.mulf %903, %911 : vector<2x32xf32>
    %920 = arith.addf %918, %919 : vector<2x32xf32>
    %921 = math.tanh %920 : vector<2x32xf32>
    %922 = arith.mulf %917, %921 : vector<2x32xf32>
    %cst_418 = arith.constant -5.000000e+01 : f32
    %cst_419 = arith.constant 5.000000e+01 : f32
    %923 = vector.broadcast %cst_418 : f32 to vector<2x32xf32>
    %924 = arith.maximumf %923, %922 : vector<2x32xf32>
    %925 = vector.broadcast %cst_419 : f32 to vector<2x32xf32>
    %926 = arith.minimumf %925, %924 : vector<2x32xf32>
    %c0_420 = arith.constant 0 : index
    %c0_421 = arith.constant 0 : index
    %c0_422 = arith.constant 0 : index
    %927 = vector.load %arg15[%c0_420, %c0_421, %c0_422] : memref<2x2x32xf32, #tpu.memory_space<vmem>>, vector<1x2x32xf32>
    %928 = vector.shape_cast %927 : vector<1x2x32xf32> to vector<2x32xf32>
    %929 = vector.shape_cast %926 : vector<2x32xf32> to vector<1x2x32xf32>
    tpu.vector_store %arg15[%c0_420, %c0_421, %c0_422], %929 {strides = array<i32>} : memref<2x2x32xf32, #tpu.memory_space<vmem>>, vector<1x2x32xf32>,
    %cst_423 = arith.constant -5.000000e+01 : f32
    %cst_424 = arith.constant 5.000000e+01 : f32
    %930 = vector.broadcast %cst_423 : f32 to vector<2x32xf32>
    %931 = arith.maximumf %930, %920 : vector<2x32xf32>
    %932 = vector.broadcast %cst_424 : f32 to vector<2x32xf32>
    %933 = arith.minimumf %932, %931 : vector<2x32xf32>
    %c0_425 = arith.constant 0 : index
    %c0_426 = arith.constant 0 : index
    %c0_427 = arith.constant 0 : index
    %934 = vector.load %arg16[%c0_425, %c0_426, %c0_427] : memref<2x2x32xf32, #tpu.memory_space<vmem>>, vector<1x2x32xf32>
    %935 = vector.shape_cast %934 : vector<1x2x32xf32> to vector<2x32xf32>
    %936 = vector.shape_cast %933 : vector<2x32xf32> to vector<1x2x32xf32>
    tpu.vector_store %arg16[%c0_425, %c0_426, %c0_427], %936 {strides = array<i32>} : memref<2x2x32xf32, #tpu.memory_space<vmem>>, vector<1x2x32xf32>,
    %c1_428 = arith.constant 1 : index
    %c0_429 = arith.constant 0 : index
    %c0_430 = arith.constant 0 : index
    %937 = vector.load %arg15[%c1_428, %c0_429, %c0_430] : memref<2x2x32xf32, #tpu.memory_space<vmem>>, vector<1x2x32xf32>
    %938 = vector.shape_cast %937 : vector<1x2x32xf32> to vector<2x32xf32>
    %c1_431 = arith.constant 1 : index
    %c0_432 = arith.constant 0 : index
    %c0_433 = arith.constant 0 : index
    %939 = vector.load %arg16[%c1_431, %c0_432, %c0_433] : memref<2x2x32xf32, #tpu.memory_space<vmem>>, vector<1x2x32xf32>
    %940 = vector.shape_cast %939 : vector<1x2x32xf32> to vector<2x32xf32>
    %cst_434 = arith.constant dense<0.000000e+00> : vector<2x128xf32>
    %941 = tpu.matmul %922, %5, %cst_434 {dimension_numbers = #tpu.dot_dimension_numbers<[1], [0], [0], [1], [0, 0, 1, 1], [], []>} : vector<2x32xf32>, vector<32x128xf32>, vector<2x128xf32> -> vector<2x128xf32>
    %cst_435 = arith.constant dense<0.000000e+00> : vector<2x128xf32>
    %942 = tpu.matmul %938, %4, %cst_435 {dimension_numbers = #tpu.dot_dimension_numbers<[1], [0], [0], [1], [0, 0, 1, 1], [], []>} : vector<2x32xf32>, vector<32x128xf32>, vector<2x128xf32> -> vector<2x128xf32>
    %943 = arith.addf %941, %942 : vector<2x128xf32>
    %944 = vector.broadcast %6 : vector<1x128xf32> to vector<2x128xf32>
    %945 = arith.addf %943, %944 : vector<2x128xf32>
    %946 = vector.extract_strided_slice %945 {offsets = [0, 0], sizes = [2, 32], strides = [1, 1]} : vector<2x128xf32> to vector<2x32xf32>
    %947 = arith.negf %946 : vector<2x32xf32>
    %948 = math.exp %947 : vector<2x32xf32>
    %cst_436 = arith.constant 1.000000e+00 : f32
    %949 = vector.broadcast %cst_436 : f32 to vector<2x32xf32>
    %950 = arith.addf %949, %948 : vector<2x32xf32>
    %951 = arith.divf %949, %950 : vector<2x32xf32>
    %952 = vector.extract_strided_slice %945 {offsets = [0, 32], sizes = [2, 32], strides = [1, 1]} : vector<2x128xf32> to vector<2x32xf32>
    %953 = arith.negf %952 : vector<2x32xf32>
    %954 = math.exp %953 : vector<2x32xf32>
    %cst_437 = arith.constant 1.000000e+00 : f32
    %955 = vector.broadcast %cst_437 : f32 to vector<2x32xf32>
    %956 = arith.addf %955, %954 : vector<2x32xf32>
    %957 = arith.divf %955, %956 : vector<2x32xf32>
    %958 = vector.extract_strided_slice %945 {offsets = [0, 64], sizes = [2, 32], strides = [1, 1]} : vector<2x128xf32> to vector<2x32xf32>
    %959 = math.tanh %958 : vector<2x32xf32>
    %960 = vector.extract_strided_slice %945 {offsets = [0, 96], sizes = [2, 32], strides = [1, 1]} : vector<2x128xf32> to vector<2x32xf32>
    %961 = arith.negf %960 : vector<2x32xf32>
    %962 = math.exp %961 : vector<2x32xf32>
    %cst_438 = arith.constant 1.000000e+00 : f32
    %963 = vector.broadcast %cst_438 : f32 to vector<2x32xf32>
    %964 = arith.addf %963, %962 : vector<2x32xf32>
    %965 = arith.divf %963, %964 : vector<2x32xf32>
    %966 = arith.mulf %957, %940 : vector<2x32xf32>
    %967 = arith.mulf %951, %959 : vector<2x32xf32>
    %968 = arith.addf %966, %967 : vector<2x32xf32>
    %969 = math.tanh %968 : vector<2x32xf32>
    %970 = arith.mulf %965, %969 : vector<2x32xf32>
    %cst_439 = arith.constant -5.000000e+01 : f32
    %cst_440 = arith.constant 5.000000e+01 : f32
    %971 = vector.broadcast %cst_439 : f32 to vector<2x32xf32>
    %972 = arith.maximumf %971, %970 : vector<2x32xf32>
    %973 = vector.broadcast %cst_440 : f32 to vector<2x32xf32>
    %974 = arith.minimumf %973, %972 : vector<2x32xf32>
    %c1_441 = arith.constant 1 : index
    %c0_442 = arith.constant 0 : index
    %c0_443 = arith.constant 0 : index
    %975 = vector.load %arg15[%c1_441, %c0_442, %c0_443] : memref<2x2x32xf32, #tpu.memory_space<vmem>>, vector<1x2x32xf32>
    %976 = vector.shape_cast %975 : vector<1x2x32xf32> to vector<2x32xf32>
    %977 = vector.shape_cast %974 : vector<2x32xf32> to vector<1x2x32xf32>
    tpu.vector_store %arg15[%c1_441, %c0_442, %c0_443], %977 {strides = array<i32>} : memref<2x2x32xf32, #tpu.memory_space<vmem>>, vector<1x2x32xf32>,
    %cst_444 = arith.constant -5.000000e+01 : f32
    %cst_445 = arith.constant 5.000000e+01 : f32
    %978 = vector.broadcast %cst_444 : f32 to vector<2x32xf32>
    %979 = arith.maximumf %978, %968 : vector<2x32xf32>
    %980 = vector.broadcast %cst_445 : f32 to vector<2x32xf32>
    %981 = arith.minimumf %980, %979 : vector<2x32xf32>
    %c1_446 = arith.constant 1 : index
    %c0_447 = arith.constant 0 : index
    %c0_448 = arith.constant 0 : index
    %982 = vector.load %arg16[%c1_446, %c0_447, %c0_448] : memref<2x2x32xf32, #tpu.memory_space<vmem>>, vector<1x2x32xf32>
    %983 = vector.shape_cast %982 : vector<1x2x32xf32> to vector<2x32xf32>
    %984 = vector.shape_cast %981 : vector<2x32xf32> to vector<1x2x32xf32>
    tpu.vector_store %arg16[%c1_446, %c0_447, %c0_448], %984 {strides = array<i32>} : memref<2x2x32xf32, #tpu.memory_space<vmem>>, vector<1x2x32xf32>,
    %cst_449 = arith.constant dense<0.000000e+00> : vector<2x8xf32>
    %985 = tpu.matmul %970, %7, %cst_449 {dimension_numbers = #tpu.dot_dimension_numbers<[1], [0], [0], [1], [0, 0, 1, 1], [], []>} : vector<2x32xf32>, vector<32x8xf32>, vector<2x8xf32> -> vector<2x8xf32>
    %986 = vector.broadcast %8 : vector<1x8xf32> to vector<2x8xf32>
    %987 = arith.addf %985, %986 : vector<2x8xf32>
    %cst_450 = arith.constant dense<0xFF800000> : vector<2xf32>
    %988 = vector.multi_reduction <maximumf>, %987, %cst_450 [1] : vector<2x8xf32> to vector<2xf32>
    %989 = vector.shape_cast %988 : vector<2xf32> to vector<2x1xf32>
    %990 = vector.broadcast %989 : vector<2x1xf32> to vector<2x8xf32>
    %991 = arith.subf %987, %990 : vector<2x8xf32>
    %992 = math.exp %991 : vector<2x8xf32>
    %cst_451 = arith.constant dense<0.000000e+00> : vector<2xf32>
    %993 = vector.multi_reduction <add>, %992, %cst_451 [1] : vector<2x8xf32> to vector<2xf32>
    %994 = vector.shape_cast %993 : vector<2xf32> to vector<2x1xf32>
    %995 = tpu.reciprocal %994 {approx = true} : vector<2x1xf32> -> vector<2x1xf32>
    %996 = vector.broadcast %995 : vector<2x1xf32> to vector<2x8xf32>
    %997 = arith.mulf %992, %996 : vector<2x8xf32>
    %998 = vector.shape_cast %997 : vector<2x8xf32> to vector<2x1x8xf32>
    "tpu.trace_start"() <{level = 10 : i32, message = "bqs,bsh->bqh"}> : () -> ()
    %cst_452 = arith.constant dense<0.000000e+00> : vector<2x1x32xf32>
    %999 = tpu.matmul %998, %12, %cst_452 {dimension_numbers = #tpu.dot_dimension_numbers<[2], [1], [1], [2], [0, 0, 0, 1, 1, 2], [0], [0]>} : vector<2x1x8xf32>, vector<2x8x32xf32>, vector<2x1x32xf32> -> vector<2x1x32xf32>
    "tpu.trace_stop"() : () -> ()
    %1000 = vector.shape_cast %999 : vector<2x1x32xf32> to vector<2x32xf32>
    %cst_453 = arith.constant dense<0.000000e+00> : vector<2x32xf32>
    %1001 = tpu.matmul %970, %9, %cst_453 {dimension_numbers = #tpu.dot_dimension_numbers<[1], [0], [0], [1], [0, 0, 1, 1], [], []>} : vector<2x32xf32>, vector<32x32xf32>, vector<2x32xf32> -> vector<2x32xf32>
    %cst_454 = arith.constant dense<0.000000e+00> : vector<2x32xf32>
    %1002 = tpu.matmul %1000, %10, %cst_454 {dimension_numbers = #tpu.dot_dimension_numbers<[1], [0], [0], [1], [0, 0, 1, 1], [], []>} : vector<2x32xf32>, vector<32x32xf32>, vector<2x32xf32> -> vector<2x32xf32>
    %1003 = arith.addf %1001, %1002 : vector<2x32xf32>
    %1004 = vector.broadcast %11 : vector<1x32xf32> to vector<2x32xf32>
    %1005 = arith.addf %1003, %1004 : vector<2x32xf32>
    %1006 = math.tanh %1005 : vector<2x32xf32>
    %c7_455 = arith.constant 7 : index
    %c0_456 = arith.constant 0 : index
    %c0_457 = arith.constant 0 : index
    %1007 = vector.load %arg13[%c7_455, %c0_456, %c0_457] : memref<8x2x32xf32, #tpu.memory_space<vmem>>, vector<1x2x32xf32>
    %1008 = vector.shape_cast %1007 : vector<1x2x32xf32> to vector<2x32xf32>
    %1009 = vector.shape_cast %1006 : vector<2x32xf32> to vector<1x2x32xf32>
    tpu.vector_store %arg13[%c7_455, %c0_456, %c0_457], %1009 {strides = array<i32>} : memref<8x2x32xf32, #tpu.memory_space<vmem>>, vector<1x2x32xf32>,
    %c8_i32_458 = arith.constant 8 : i32
    %1010 = arith.cmpi eq, %889, %c8_i32_458 : i32
    %1011 = arith.extui %1010 : i1 to i32
    %c0_i32_459 = arith.constant 0 : i32
    %1012 = arith.cmpi ne, %1011, %c0_i32_459 : i32
    scf.if %1012 {
      %c0_460 = arith.constant 0 : index
      %c0_461 = arith.constant 0 : index
      %c0_462 = arith.constant 0 : index
      %1013 = vector.load %arg15[%c0_460, %c0_461, %c0_462] : memref<2x2x32xf32, #tpu.memory_space<vmem>>, vector<2x2x32xf32>
      %c0_463 = arith.constant 0 : index
      %c0_464 = arith.constant 0 : index
      %c0_465 = arith.constant 0 : index
      %1014 = vector.load %arg14[%c0_463, %c0_464, %c0_465] : memref<2x2x32xf32, #tpu.memory_space<vmem>>, vector<2x2x32xf32>
      tpu.vector_store %arg14[%c0_463, %c0_464, %c0_465], %1013 {strides = array<i32>} : memref<2x2x32xf32, #tpu.memory_space<vmem>>, vector<2x2x32xf32>,
    } else {
    }
    return
  }
  func.func @transform_0(%arg0: i32) -> (i32, i32, i32) {
    %c0_i32 = arith.constant 0 : i32
    %c0_i32_0 = arith.constant 0 : i32
    %c0_i32_1 = arith.constant 0 : i32
    return %arg0, %c0_i32, %c0_i32_0 : i32, i32, i32
  }
  func.func @transform_1(%arg0: i32) -> (i32, i32, i32) {
    %c0_i32 = arith.constant 0 : i32
    %c0_i32_0 = arith.constant 0 : i32
    %c0_i32_1 = arith.constant 0 : i32
    %c0_i32_2 = arith.constant 0 : i32
    return %c0_i32, %c0_i32_0, %c0_i32_1 : i32, i32, i32
  }
  func.func @transform_2(%arg0: i32) -> (i32, i32, i32) {
    %c0_i32 = arith.constant 0 : i32
    %c0_i32_0 = arith.constant 0 : i32
    %c0_i32_1 = arith.constant 0 : i32
    %c0_i32_2 = arith.constant 0 : i32
    return %c0_i32, %c0_i32_0, %c0_i32_1 : i32, i32, i32
  }
  func.func @transform_3(%arg0: i32) -> (i32, i32, i32) {
    %c0_i32 = arith.constant 0 : i32
    %c0_i32_0 = arith.constant 0 : i32
    %c0_i32_1 = arith.constant 0 : i32
    %c0_i32_2 = arith.constant 0 : i32
    return %c0_i32, %c0_i32_0, %c0_i32_1 : i32, i32, i32
  }
  func.func @transform_4(%arg0: i32) -> (i32, i32) {
    %c0_i32 = arith.constant 0 : i32
    %c0_i32_0 = arith.constant 0 : i32
    %c0_i32_1 = arith.constant 0 : i32
    return %c0_i32, %c0_i32_0 : i32, i32
  }
  func.func @transform_5(%arg0: i32) -> (i32, i32) {
    %c0_i32 = arith.constant 0 : i32
    %c0_i32_0 = arith.constant 0 : i32
    %c0_i32_1 = arith.constant 0 : i32
    return %c0_i32, %c0_i32_0 : i32, i32
  }
  func.func @transform_6(%arg0: i32) -> (i32, i32) {
    %c0_i32 = arith.constant 0 : i32
    %c0_i32_0 = arith.constant 0 : i32
    %c0_i32_1 = arith.constant 0 : i32
    return %c0_i32, %c0_i32_0 : i32, i32
  }
  func.func @transform_7(%arg0: i32) -> (i32, i32) {
    %c0_i32 = arith.constant 0 : i32
    %c0_i32_0 = arith.constant 0 : i32
    %c0_i32_1 = arith.constant 0 : i32
    return %c0_i32, %c0_i32_0 : i32, i32
  }
  func.func @transform_8(%arg0: i32) -> (i32, i32) {
    %c0_i32 = arith.constant 0 : i32
    %c0_i32_0 = arith.constant 0 : i32
    %c0_i32_1 = arith.constant 0 : i32
    return %c0_i32, %c0_i32_0 : i32, i32
  }
  func.func @transform_9(%arg0: i32) -> (i32, i32) {
    %c0_i32 = arith.constant 0 : i32
    %c0_i32_0 = arith.constant 0 : i32
    %c0_i32_1 = arith.constant 0 : i32
    return %c0_i32, %c0_i32_0 : i32, i32
  }
  func.func @transform_10(%arg0: i32) -> (i32, i32) {
    %c0_i32 = arith.constant 0 : i32
    %c0_i32_0 = arith.constant 0 : i32
    %c0_i32_1 = arith.constant 0 : i32
    return %c0_i32, %c0_i32_0 : i32, i32
  }
  func.func @transform_11(%arg0: i32) -> (i32, i32) {
    %c0_i32 = arith.constant 0 : i32
    %c0_i32_0 = arith.constant 0 : i32
    %c0_i32_1 = arith.constant 0 : i32
    return %c0_i32, %c0_i32_0 : i32, i32
  }
  func.func @transform_12(%arg0: i32) -> (i32, i32, i32) {
    %c0_i32 = arith.constant 0 : i32
    %c0_i32_0 = arith.constant 0 : i32
    %c0_i32_1 = arith.constant 0 : i32
    return %arg0, %c0_i32, %c0_i32_0 : i32, i32, i32
  }
  func.func @transform_13(%arg0: i32) -> (i32, i32, i32) {
    %c0_i32 = arith.constant 0 : i32
    %c0_i32_0 = arith.constant 0 : i32
    %c0_i32_1 = arith.constant 0 : i32
    %c0_i32_2 = arith.constant 0 : i32
    return %c0_i32, %c0_i32_0, %c0_i32_1 : i32, i32, i32
  }
}

</mosaic_0001>

<bundles_post_ra>
// kernel: tpu_custom_call.1
= control target key start
LH: loop header
LB: loop body
LE: loop exit
PB: predicated region body
PF: predicated region fallthrough
CT: control target
= control target key end

     0   :  { %s9243_s0 = inlined_call_operand.vmem [shape: f32[16,2,128], index: 0, kind: input, shape index: {}]   ;;  %s9244_s1 = inlined_call_operand.vmem [shape: f32[2,8,32], index: 1, kind: input, shape index: {}]   ;;  %s9245_s2 = inlined_call_operand.vmem [shape: f32[2,2,32], index: 2, kind: input, shape index: {}]   ;;  %s9246_s3 = inlined_call_operand.vmem [shape: f32[2,2,32], index: 3, kind: input, shape index: {}]   ;;  %s9247_s4 = inlined_call_operand.vmem [shape: f32[32,128], index: 4, kind: input, shape index: {}]   ;;  %s9248_s5 = inlined_call_operand.vmem [shape: f32[32,128], index: 5, kind: input, shape index: {}]   ;;  %s9249_s6 = inlined_call_operand.hbm [shape: f32[32,128], index: 6, kind: input, shape index: {}]   ;;  %s9250_s7 = inlined_call_operand.vmem [shape: f32[1,128], index: 7, kind: input, shape index: {}]   ;;  %s9251_s8 = inlined_call_operand.vmem [shape: f32[32,8], index: 8, kind: input, shape index: {}]   ;;  %s9252_s9 = inlined_call_operand.vmem [shape: f32[1,8], index: 9, kind: input, shape index: {}]   ;;  %s9253_s10 = inlined_call_operand.vmem [shape: f32[64,32], index: 10, kind: input, shape index: {}]   ;;  %s9254_s11 = inlined_call_operand.vmem [shape: f32[1,32], index: 11, kind: input, shape index: {}]   ;;  %s9255_s12 = inlined_call_operand.hbm [shape: f32[16,2,32], index: 12, kind: output, shape index: {0}]   ;;  %s9256_s13 = inlined_call_operand.hbm [shape: f32[2,2,32], index: 13, kind: output, shape index: {1}]  }
   0x1   :  { %9273 = sst [smem:[#allocation16_spill]] %s9243_s0 }
   0x2   :  { %9274 = sst [smem:[#allocation17_spill]] %s9249_s6 }
   0x3   :  { %19 = vsyncpa [#allocation5], 0 }
   0x4   :  { %20 = vsyncpa [#allocation6], 0 }
   0x5   :  { %22 = vsyncpa [#allocation6 + $0x1], 0 }
   0x6   :  { %23 = vsyncpa [#allocation9], 0  ;;  %s8209_s25 = smov 0   ;;  %s8211_s26 = smov 0  }
   0x7   :  { %s8213_s27 = smov 0   ;;  %s8215_s28 = smov 0  }
   0x8 LB: > { %9275 = sst [smem:[#allocation13_spill]] %s8120_s27  ;;  %s8230_s29 = sadd.s32 4294967295, %s8124_s28   ;;  %s8124_s28 = sphi %s8215_s28, %s9303_s28   ;;  %s8120_s27 = sphi %s8213_s27, %s9305_s27   ;;  %s8116_s26 = sphi %s8211_s26, %s9307_s26   ;;  %s8112_s25 = sphi %s8209_s25, %s9306_s25  }
   0x9   : > { %s6433_s30 = sadd.s32 4294967294, %s8124_s28   ;;  %s8234_s14 = sadd.s32 1, %s8124_s28  }
   0xa   : > { %9276 = sst [smem:[#allocation14_spill]] %s8234_s14  ;;  %s293_s15 = sadd.s32 1, %s8120_s27 }
   0xb   : > { %s290_s16 = ssub.s32 %s8124_s28, %s8234_s14  ;;  %p303_p0 = scmp.ne.s32.totalorder %s8120_s27, %s8116_s26 }
   0xc   : > { %p291_p1 = scmp.eq.s32.totalorder %s290_s16, 0  ;;  %p9260_p2 = scmp.eq.s32.totalorder %s8230_s29, 1 }
   0xd   : > { %p309_p3 = scmp.ne.s32.totalorder %s8116_s26, %s8112_s25  ;;  %p310_p4 = scmp.eq.s32.totalorder %s6433_s30, 1 }
   0xe   : > { %s8245_s17 = scalar_select %p291_p1, %s8120_s27, %s293_s15  }
   0xf   : > { %p8249_p5 = por %p9260_p2, %p303_p0  ;;  %p8253_p6 = por %p310_p4, %p309_p3 }
  0x10   : > { %9277 = sst [smem:[#allocation15_spill]] %s8245_s17  ;;  %p6434_p7 = scmp.ge.s32.totalorder %s8124_s28, 1 }
  0x11   : > { %s9278_s18 = scalar_select %p8249_p5, 1, 0 }
  0x12   : > { %s9279_s19 = scalar_select %p8253_p6, 1, 0 }
  0x13   : > { %p338_p8 = scmp.lt.s32.totalorder %s8124_s28, 3  ;;  %p9261_p10 = scmp.eq.s32.totalorder %s8230_s29, 0 }
  0x14   : > { %s8126_s21 = smov [#allocation4]   ;;  %s9282_s6 = sld [smem:[#allocation17_spill]] }
  0x15   : > { %p8261_p11 = pnand %p6434_p7, %p338_p8  ;;  %s365_s22 = sshll.u32 %s8126_s21, 4  ;;  %s366_s22 = int_to_ptr.vmem [resolvable:$true] %s365_s22 }
  0x17   : > { %s9280_s20 = scalar_select %p8261_p11, 1, 0 }
  0x18   : > { %p7767_p12 = pneg %p8261_p11 }
  0x1a   : > { %p8269_p13 = pnand %p9261_p10, %p7767_p12  ;;  %s8000_s15 = scalar_lea.hbm %s9282_s6, 512 }
  0x1b   : > { %p8001_p0 = scmp.ne.s32.totalorder %s9282_s6, %s8000_s15  ;;  %p8007_p7 = scmp.lt.u32.totalorder %s8000_s15, %s9282_s6 }
  0x1c   : > { %p8002_p1 = pneg %p8269_p13 }
  0x1e   : > { %p8003_p3 = pnand %p8002_p1, %p8001_p0 }
  0x20   : > { %p8004_p4 = pneg %p8003_p3 }
  0x22   : > { %p8009_p8 = pnand %p8007_p7, %p8004_p4 }
  0x24   : > { %8012 = shalt.err (!%p8009_p8)
}
  0x25   : > { %s8013_s14 = scalar_lea.vmem %s366_s22, 512  ;;  %p8021_p10 = scmp.lt.s32.totalorder %s366_s22, %s366_s22 }
  0x26   : > { %p8014_p12 = scmp.ne.s32.totalorder %s366_s22, %s8013_s14  ;;  %p8022_p6 = scmp.lt.s32.totalorder %s8013_s14, %s8013_s14 }
  0x28   : > { %p8016_p2 = pnand %p8014_p12, %p8002_p1  ;;  %p8023_p5 = por %p8022_p6, %p8021_p10 }
  0x2a   : > { %p8017_p9 = pneg %p8016_p2 }
  0x2c   : > { %p8024_p11 = pnand %p8023_p5, %p8017_p9 }
  0x2e   : > { %8027 = shalt.err (!%p8024_p11)
}
  0x2f   : > { %s8127_s17 = smov 128   ;;  %s8128_s24 = smov 8  }
  0x30   : > { %7770 = dma.hbm_to_vmem [thread:$0]  (!%p8269_p13), %s9282_s6, 512, %s366_s22, [#allocation5], %s8127_s17, %s8127_s17, %s8128_s24  }
  0x31   : > { %p9283_p0 = scmp.ne.s32.totalorder %s9280_s20, 0 }
  0x32   : > { %p9284_p3 = scmp.eq.s32.totalorder (!%p9283_p0), %s8230_s29, 0 }
  0x33   : > { %405 = sbr.rel (%p9283_p0) target bundleno = 19257 (0x4b39), region = 68 }
  0x3a   : > { %8099 = dma.done.wait (%p9284_p3), [#allocation5], 512   ;;  %p9285_p2 = pmov %p9284_p3 }
  0x3b   : > { %s9264_s27 = sand.u32 1, %s8116_s26   ;;  %s8297_s14 = sshll.u32 %s8230_s29, 3 }
  0x3c   : > { %8101 = vsyncadd (%p9285_p2), [#allocation5], 4294966784  ;;  %s6439_s23 = sshll.u32 %s9264_s27, 4  ;;  %p450_p5 = scmp.lt.s32.totalorder %s8297_s14, 15 }
  0x3d   : > { %s9286_s0 = sld [smem:[#allocation16_spill]]  ;;  %s8308_s24 = scalar_lea.vmem [#allocation7], %s6439_s23 }
  0x3e   : > { %s451_s22 = scalar_select %p450_p5, %s8297_s14, 15 }
  0x3f   : > { %p9287_p6 = scmp.ne.s32.totalorder %s8230_s29, 0 }
  0x40   : > { %s6441_s20 = sshll.u32 %s451_s22, 1  ;;  %v460_v0 = vld [vmem:[%s9245_s2] sm:$0x3] (!%p9287_p6)  ;;  %vm462_vm0 = vcmask (!%p9287_p6), 254976   ;;  %v461_v1 = vld [vmem:[%s9245_s2 + $0x2] sm:$0x3] (!%p9287_p6) }
  0x41   : > { %459 = sbr.rel (%p9287_p6) target bundleno = 72 (0x48), region = 76  ;;  %463 = vst.msk [vmem:[#allocation2] sm:$0x3] (!%p9287_p6), %vm462_vm0, %v460_v0  ;;  %464 = vst.msk [vmem:[#allocation2 + $0x2] sm:$0x3] (!%p9287_p6), %vm462_vm0, %v461_v1 }
  0x42   : > { %v465_v2 = vld [vmem:[%s9246_s3] sm:$0x3] (!%p9287_p6)  ;;  %v466_v3 = vld [vmem:[%s9246_s3 + $0x2] sm:$0x3] (!%p9287_p6) }
  0x43   : > { %s8306_s17 = scalar_lea.vmem %s9286_s0, %s6441_s20  ;;  %467 = vst.msk [vmem:[#allocation3] sm:$0x3] (!%p9287_p6), %vm462_vm0, %v465_v2  ;;  %468 = vst.msk [vmem:[#allocation3 + $0x2] sm:$0x3] (!%p9287_p6), %vm462_vm0, %v466_v3 }
  0x48 PF: > { %v469_v4 = vld [vmem:[%s9248_s5] sm:$0xff]  ;;  %v470_v5 = vld [vmem:[%s9248_s5 + $0x8] sm:$0xff]  ;;  %v471_v6 = vld [vmem:[%s9248_s5 + $0x10] sm:$0xff]  ;;  %v8129_v7 = vmov 0.0|0.0   ;;  %vm8130_vm1 = vmmov 0   ;;  %v8131_v10 = vmov 0.0  }
  0x49   : > { %7469 = vmatprep.subr.bf16.mxu0 %v8129_v7  ;;  %v8334_v8 = vpack.c.bf16 %v470_v5, %v469_v4  ;;  %v472_v9 = vld [vmem:[%s9248_s5 + $0x18] sm:$0xff]  ;;  %6869 = vmatprep.mubr.msk.f32.mxu0 %vm8130_vm1, %v8131_v10  ;;  %v499_v12 = vld [vmem:[#allocation2] sm:$0x3]  ;;  %vm502_vm2 = vcmask 261120   ;;  %s8132_s0 = smov 64   ;;  %s8133_s23 = smov 32  }
  0x4a   : > { %7475 = vmatprep.subr.bf16.mxu1 %v8129_v7  ;;  %6880 = vmatprep.mubr.msk.f32.mxu1 %vm8130_vm1, %v8131_v10  ;;  %v8345_v11 = vpack.c.bf16 %v472_v9, %v471_v6  ;;  %v501_v13 = vld [vmem:[%s8306_s17] sm:$0x3]  ;;  %v500_v18 = vld [vmem:[#allocation3] sm:$0x3]  ;;  %v473_v29 = vld [vmem:[#allocation4] sm:$0xff]  ;;  %vm902_vm3 = vcmask 58368  }
  0x4b   : > { %7471 = vmatpush3.bf16.msra.mxu0 %v8334_v8  ;;  %v474_v30 = vld [vmem:[#allocation4 + $0x8] sm:$0xff]  ;;  %v477_v31 = vld [vmem:[%s9247_s4] sm:$0xff]  ;;  %v478_v33 = vld [vmem:[%s9247_s4 + $0x8] sm:$0xff]  ;;  %vm611_vm4 = vcmask 254976   ;;  %s9265_s6 = smov 96   ;;  %vm937_vm5 = vcmask 64512  }
  0x4c   : > { %7472 = vmatprep.subr.bf16.mxu0 %v8129_v7  ;;  %v8363_v32 = vpack.c.bf16 %v474_v30, %v473_v29  ;;  %v475_v34 = vld [vmem:[#allocation4 + $0x10] sm:$0xff]  ;;  %v476_v35 = vld [vmem:[#allocation4 + $0x18] sm:$0xff]  ;;  %v8368_v36 = vpack.c.bf16 %v478_v33, %v477_v31  ;;  %v479_v37 = vld [vmem:[%s9247_s4 + $0x10] sm:$0xff]  ;;  %vm1085_vm6 = vcmask 1041409   ;;  %p6461_p9 = scmp.ne.s32.totalorder %s8297_s14, 8 }
  0x4d   : > { %v480_v38 = vld [vmem:[%s9247_s4 + $0x18] sm:$0xff]  ;;  %v8377_v39 = vpack.c.bf16 %v476_v35, %v475_v34  ;;  %v621_v41 = vld [vmem:[#allocation2 + $0x2] sm:$0x3]  ;;  %v623_v45 = vld [vmem:[#allocation3 + $0x2] sm:$0x3] }
  0x4e   : > { %7477 = vmatpush3.bf16.msra.mxu1 %v8363_v32  ;;  %v8381_v40 = vpack.c.bf16 %v480_v38, %v479_v37  ;;  %v8400_v49 = vld [vmem:[%s9250_s7] ss:$0 sm:$0xff]  ;;  %v483_v2 = vld [vmem:[%s9251_s8 + $0x8] sm:$0xff]  ;;  %v484_v3 = vld [vmem:[%s9251_s8 + $0x10] sm:$0xff]  ;;  %v8135_v35 = vmov 1966171168   ;;  %v918_v38 = vlaneseq }
  0x4f   : > { %7474 = vmatpush3.bf16.msra.mxu0 %v8345_v11  ;;  %7478 = vmatprep.subr.bf16.mxu1 %v8129_v7  ;;  %v482_v1 = vld [vmem:[%s9251_s8] sm:$0xff]  ;;  %v485_v5 = vld [vmem:[%s9251_s8 + $0x18] sm:$0xff]  ;;  %v8451_v33 = vld [vmem:[%s9244_s1 + $0x8] sm:$0xff]  ;;  %v916_v37 = vunpack.c.l.s4 %v8135_v35 }
  0x50   : > { %7481 = vmatprep.subr.bf16.mxu0 %v8129_v7  ;;  %v8414_v4 = vpack.c.bf16 %v483_v2, %v482_v1  ;;  %v8420_v6 = vpack.c.bf16 %v485_v5, %v484_v3  ;;  %v8456_v34 = vld [vmem:[%s9244_s1] sm:$0xff] }
  0x52   : > { %6870 = vmatmul.mubr.msk.f32.vlgmr.msra.gmra.mrb[0].mxu0 %vm502_vm2, %v499_v12  ;;  %7480 = vmatpush3.bf16.msra.mxu1 %v8377_v39 }
  0x53   : > { %6891 = vmatprep.mubr.msk.f32.mxu0 %vm8130_vm1, %v8131_v10  ;;  %7483 = vmatpush3.bf16.msra.mxu0 %v8368_v36 }
  0x54   : > { %7484 = vmatprep.subr.bf16.mxu0 %v8129_v7  ;;  %7487 = vmatprep.subr.bf16.mxu1 %v8129_v7 }
  0x55   : > { %6881 = vmatmul.mubr.msk.f32.vlgmr.msra.gmra.mrb[0].mxu1 %vm502_vm2, %v621_v41 }
  0x56   : > { %6902 = vmatprep.mubr.msk.f32.mxu1 %vm8130_vm1, %v8131_v10  ;;  %7489 = vmatpush3.bf16.msra.mxu1 %v8414_v4 }
  0x57   : > { %7486 = vmatpush3.bf16.msra.mxu0 %v8381_v40  ;;  %7490 = vmatprep.subr.bf16.mxu1 %v8129_v7 }
  0x58   : > { %6905 = vmatprep.subr.mxu0 %v8131_v10 }
  0x5a   : > { %7492 = vmatpush3.bf16.msra.mxu1 %v8420_v6 }
  0x5b   : > { %6910 = vmatprep.subr.mxu1 %v8131_v10 }
 0x125   : > { %v572_v14 = vpop.f32.mrb[0].mxu0 }
 0x126   : > { %v576_v15 = vadd.f32 %v572_v14, %v501_v13  ;;  %v6871_v16 = vpop.f32.mrb[1].mxu0 }
 0x128   : > { %7824 = vtanh.f32 %v576_v15  ;;  %v6445_v19 = vmul.f32 -1.442695, %v576_v15  ;;  %v693_v46 = vpop.f32.mrb[0].mxu1  ;;  %v8436_v15 = vld [vmem:[%s9252_s9] ss:$0 sm:$0xff] }
 0x129   : > { %v6882_v47 = vpop.f32.mrb[1].mxu1 }
 0x12a   : > { %7826 = vpow2.f32 %v6445_v19 }
 0x132   : > { %v7825_v17 = vpop.eup %7824 }
 0x133   : > { %590 = vrot.lane.b32.xlu0 %v7825_v17, %s8132_s0 }
 0x134   : > { %v7827_v20 = vpop.eup %7826 }
 0x135   : > { %v580_v21 = vadd.f32 1.0, %v7827_v20 }
 0x137   : > { %585 = vrot.lane.b32.xlu0 %v500_v18, %s8133_s23  ;;  %7828 = vrcp.f32 %v580_v21 }
 0x141   : > { %v7829_v22 = vpop.eup %7828 }
 0x1a5   : > { %v591_v23 = vpop.permute.xlu0 %590 }
 0x1a6   : > { %v593_v24 = vmul.f32 %v7829_v22, %v591_v23 }
 0x1a8   : > { %595 = vrot.lane.b32.xlu1 %v593_v24, %s8133_s23 }
 0x1a9   : > { %v586_v25 = vpop.permute.xlu0 %585 }
 0x1aa   : > { %v588_v26 = vmul.f32 %v7829_v22, %v586_v25 }
 0x21a   : > { %v596_v27 = vpop.permute.xlu1 %595 }
 0x21b   : > { %v8357_v28 = vadd.f32 %v596_v27, %v588_v26 }
 0x21d   : > { %7830 = vtanh.f32 %v8357_v28  ;;  %v6447_v30 = vclamps-f32 %v8357_v28, 50.0 }
 0x227   : > { %v7831_v42 = vpop.eup %7830 }
 0x228   : > { %601 = vrot.lane.b32.xlu1 %v7831_v42, %s8132_s0  ;;  %v917_v42 = vunpack.c.0.s8 %v916_v37 }
 0x29a   : > { %v602_v43 = vpop.permute.xlu1 %601 }
 0x29b   : > { %v604_v44 = vmul.f32 %v7829_v22, %v602_v43  ;;  %v919_v43 = vshrl.u32 %v918_v38, 7 }
 0x29d   : > { %698 = vrot.lane.b32.xlu0 %v604_v44, %s8133_s23  ;;  %v6446_v20 = vclamps-f32 %v604_v44, 50.0 }
 0x2a1   : > { %787 = vrot.lane.b32.xlu0 %v623_v45, %s8133_s23  ;;  %v8464_v45 = vsub.s32 %v917_v42, %v919_v43 }
 0x30f   : > { %v699_v48 = vpop.permute.xlu0 %698 }
 0x310   : > { %6892 = vmatmul.mubr.msk.f32.vlgmr.msra.gmra.mrb[2].mxu0 %vm502_vm2, %v699_v48  ;;  %v491_v48 = vld [vmem:[%s9253_s10 + $0x20] sm:$0xff] }
 0x311   : > { %6907 = vmatprep.mubr.msk.f32.mxu0 %vm8130_vm1, %v8131_v10  ;;  %6906 = vmatpush3.msra.mxu0 %v8456_v34 }
 0x312   : > { %7493 = vmatprep.subr.bf16.mxu0 %v8129_v7 }
 0x313   : > { %v788_v61 = vpop.permute.xlu0 %787 }
 0x3e3   : > { %v768_v50 = vpop.f32.mrb[2].mxu0 }
 0x3e4   : > { %v769_v51 = vadd.f32 %v768_v50, %v693_v46  ;;  %v6893_v52 = vpop.f32.mrb[3].mxu0  ;;  %v492_v50 = vld [vmem:[%s9253_s10 + $0x28] sm:$0xff] }
 0x3e5   : > { %v487_v52 = vld [vmem:[%s9253_s10] sm:$0xff] }
 0x3e6   : > { %v778_v53 = vadd.f32 %v8400_v49, %v769_v51 }
 0x3e8   : > { %7832 = vtanh.f32 %v778_v53  ;;  %v6451_v55 = vmul.f32 -1.442695, %v778_v53  ;;  %v488_v53 = vld [vmem:[%s9253_s10 + $0x8] sm:$0xff] }
 0x3ea   : > { %7834 = vpow2.f32 %v6451_v55 }
 0x3f2   : > { %v7833_v54 = vpop.eup %7832 }
 0x3f3   : > { %792 = vrot.lane.b32.xlu1 %v7833_v54, %s8132_s0  ;;  %v8479_v54 = vpack.c.bf16 %v492_v50, %v491_v48 }
 0x3f4   : > { %v7835_v56 = vpop.eup %7834 }
 0x3f5   : > { %v782_v57 = vadd.f32 1.0, %v7835_v56 }
 0x3f7   : > { %7836 = vrcp.f32 %v782_v57  ;;  %v8482_v57 = vpack.c.bf16 %v488_v53, %v487_v52 }
 0x401   : > { %v7837_v58 = vpop.eup %7836 }
 0x402   : > { %v790_v62 = vmul.f32 %v7837_v58, %v788_v61 }
 0x465   : > { %v793_v59 = vpop.permute.xlu1 %792 }
 0x466   : > { %v795_v60 = vmul.f32 %v7837_v58, %v793_v59  ;;  %v489_v59 = vld [vmem:[%s9253_s10 + $0x10] sm:$0xff] }
 0x468   : > { %797 = vrot.lane.b32.xlu1 %v795_v60, %s8133_s23  ;;  %v490_v60 = vld [vmem:[%s9253_s10 + $0x18] sm:$0xff] }
 0x469   : > { %v8498_v61 = vpack.c.bf16 %v490_v60, %v489_v59 }
 0x4da   : > { %v798_v63 = vpop.permute.xlu1 %797 }
 0x4db   : > { %v800_v0 = vadd.f32 %v798_v63, %v790_v62  ;;  %v493_v62 = vld [vmem:[%s9253_s10 + $0x30] sm:$0xff]  ;;  %v494_v63 = vld [vmem:[%s9253_s10 + $0x38] sm:$0xff] }
 0x4dd   : > { %7838 = vtanh.f32 %v800_v0  ;;  %v6453_v31 = vclamps-f32 %v800_v0, 50.0  ;;  %v8512_v0 = vpack.c.bf16 %v494_v63, %v493_v62 }
 0x4e7   : > { %v7839_v9 = vpop.eup %7838 }
 0x4e8   : > { %803 = vrot.lane.b32.xlu0 %v7839_v9, %s8132_s0 }
 0x55a   : > { %v804_v12 = vpop.permute.xlu0 %803 }
 0x55b   : > { %v806_v13 = vmul.f32 %v7837_v58, %v804_v12 }
 0x55d   : > { %828 = vrot.lane.b32.xlu1 %v806_v13, %s8133_s23  ;;  %v6452_v21 = vclamps-f32 %v806_v13, 50.0 }
 0x5cf   : > { %v8427_v14 = vpop.permute.xlu1 %828 }
 0x5d0   : > { %6903 = vmatmul.mubr.msk.f32.vlgmr.msra.gmra.mrb[2].mxu1 %vm502_vm2, %v8427_v14 }
 0x5d1   : > { %6912 = vmatprep.mubr.msk.f32.mxu1 %vm8130_vm1, %v8131_v10  ;;  %6911 = vmatpush3.msra.mxu1 %v8451_v33 }
 0x5d2   : > { %7499 = vmatprep.subr.bf16.mxu1 %v8129_v7 }
 0x6a3   : > { %v898_v16 = vpop.f32.mrb[2].mxu1 }
 0x6a4   : > { %v899_v17 = vadd.f32 %v8436_v15, %v898_v16  ;;  %v6904_v18 = vpop.f32.mrb[3].mxu1  ;;  %v8520_v16 = vld [vmem:[%s9254_s11] ss:$0 sm:$0xff] }
 0x6a6   : > { %v903_v19 = vsel %vm902_vm3, %v899_v17, -inf }
 0x6a7   : > { %904 = vmax.xlane.f32.xlu0 %v903_v19 }
 0x6bd   : > { %608 = vrot.lane.b32.xlu0 %v6446_v20, %s8133_s23 }
 0x6c1   : > { %810 = vrot.lane.b32.xlu0 %v6452_v21, %s8133_s23 }
 0x734   : > { %v905_v22 = vpop.xlane.xlu0 %904 }
 0x735   : > { %v906_v23 = vsub.f32 %v899_v17, %v905_v22 }
 0x737   : > { %v907_v24 = vmul.f32 1.442695, %v906_v23 }
 0x738   : > { %v609_v25 = vpop.permute.xlu0 %608 }
 0x739   : > { %7840 = vpow2.f32 %v907_v24  ;;  %612 = vst.msk [vmem:[#allocation2] sm:$0x3] %vm611_vm4, %v609_v25 }
 0x73c   : > { %v811_v26 = vpop.permute.xlu0 %810 }
 0x73d   : > { %813 = vst.msk [vmem:[#allocation2 + $0x2] sm:$0x3] %vm611_vm4, %v811_v26 }
 0x740   : > { %v1242_v22 = vld [vmem:[#allocation2] sm:$0x3] (!%p6461_p9) }
 0x741   : > { %1244 = vst.msk [vmem:[#allocation8] sm:$0x3] (!%p6461_p9), %vm611_vm4, %v1242_v22 }
 0x743   : > { %v7841_v27 = vpop.eup %7840 }
 0x744   : > { %v909_v29 = vsel %vm902_vm3, %v7841_v27, 0.0  ;;  %v1243_v23 = vld [vmem:[#allocation2 + $0x2] sm:$0x3] (!%p6461_p9) }
 0x745   : > { %910 = vadd.xlane.f32.xlu1 %v909_v29  ;;  %1245 = vst.msk [vmem:[#allocation8 + $0x2] sm:$0x3] (!%p6461_p9), %vm611_vm4, %v1243_v23 }
 0x756   : > { %616 = vrot.lane.b32.xlu1 %v6447_v30, %s9265_s6 }
 0x75a   : > { %817 = vrot.lane.b32.xlu1 %v6453_v31, %s9265_s6 }
 0x7d2   : > { %v911_v28 = vpop.xlane.xlu1 %910 }
 0x7d3   : > { %7842 = vrcp.f32 %v911_v28 }
 0x7d6   : > { %v617_v41 = vpop.permute.xlu1 %616 }
 0x7d7   : > { %619 = vst.msk [vmem:[#allocation3] sm:$0x3] %vm611_vm4, %v617_v41 }
 0x7da   : > { %v818_v44 = vpop.permute.xlu1 %817 }
 0x7db   : > { %820 = vst.msk [vmem:[#allocation3 + $0x2] sm:$0x3] %vm611_vm4, %v818_v44 }
 0x7dd   : > { %v7843_v46 = vpop.eup %7842 }
 0x7de   : > { %v913_v47 = vmul.f32 %v7843_v46, %v7841_v27 }
 0x7e0   : > { %v921_v51 = vrot.slane %v913_v47, %v8464_v45 }
 0x7e2   : > { %v929_v55 = vrot.slane %v921_v51, %v8464_v45  ;;  %v922_v56 = vcombine.high %v921_v51, %v921_v51 }
 0x7e4   : > { %6908 = vmatmul.mubr.msk.f32.vlgmr.msra.gmra.mrb[4].mxu0 %vm937_vm5, %v929_v55  ;;  %v936_v58 = vrot.slane %v922_v56, %v8464_v45 }
 0x7e5   : > { %7495 = vmatpush3.bf16.msra.mxu0 %v8479_v54  ;;  %6923 = vmatprep.mubr.msk.f32.mxu0 %vm8130_vm1, %v8131_v10 }
 0x7e6   : > { %6913 = vmatmul.mubr.msk.f32.vlgmr.msra.gmra.mrb[4].mxu1 %vm937_vm5, %v936_v58  ;;  %7496 = vmatprep.subr.bf16.mxu0 %v8129_v7 }
 0x7e7   : > { %7501 = vmatpush3.bf16.msra.mxu1 %v8482_v57  ;;  %6934 = vmatprep.mubr.msk.f32.mxu1 %vm8130_vm1, %v8131_v10 }
 0x7e8   : > { %7502 = vmatprep.subr.bf16.mxu1 %v8129_v7 }
 0x7e9   : > { %7498 = vmatpush3.bf16.msra.mxu0 %v8512_v0 }
 0x7eb   : > { %7504 = vmatpush3.bf16.msra.mxu1 %v8498_v61 }
 0x7ee   : > { %6935 = vmatmul.mubr.msk.f32.vlgmr.msra.gmra.mrb[6].mxu1 %vm502_vm2, %v8427_v14 }
 0x8b7   : > { %v1006_v1 = vpop.f32.mrb[4].mxu0 }
 0x8b8   : > { %v6909_v2 = vpop.f32.mrb[5].mxu0 }
 0x8b9   : > { %v1078_v3 = vpop.f32.mrb[4].mxu1 }
 0x8ba   : > { %v1084_v5 = vrot.slane %v1078_v3, 7  ;;  %v6914_v9 = vpop.f32.mrb[5].mxu1 }
 0x8bc   : > { %v1086_v12 = vsel %vm1085_vm6, %v1084_v5, %v1006_v1 }
 0x8bd   : > { %6924 = vmatmul.mubr.msk.f32.vlgmr.msra.gmra.mrb[6].mxu0 %vm502_vm2, %v1086_v12 }
 0x8c1   : > { %v1225_v13 = vpop.f32.mrb[6].mxu1 }
 0x8c2   : > { %v6936_v14 = vpop.f32.mrb[7].mxu1 }
 0x990   : > { %v1155_v17 = vpop.f32.mrb[6].mxu0 }
 0x991   : > { %v1226_v18 = vadd.f32 %v1225_v13, %v1155_v17  ;;  %v6925_v19 = vpop.f32.mrb[7].mxu0 }
 0x993   : > { %v1235_v20 = vadd.f32 %v8520_v16, %v1226_v18 }
 0x995   : > { %7844 = vtanh.f32 %v1235_v20 }
 0x99a   : > { %1241 = sbr.rel (%p6461_p9) target bundleno = 2465 (0x9a1), region = 80 }
 0x99f   : > { %v7845_v21 = vpop.eup %7844 }
 0x9a0   : > { %1237 = vst.msk [vmem:[%s8308_s24] sm:$0x3] %vm611_vm4, %v7845_v21 }
 0x9a1 PF: > { %s1246_s16 = sadd.s32 1, %s8297_s14  ;;  %7505 = vmatprep.subr.bf16.mxu0 %v8129_v7  ;;  %6945 = vmatprep.mubr.msk.f32.mxu0 %vm8130_vm1, %v8131_v10  ;;  %v1247_v24 = vld [vmem:[#allocation2] sm:$0x3]  ;;  %v6462_v25 = vld [vmem:[%s8306_s17 + $0x2] sm:$0x3]  ;;  %s9288_s27 = smov 96  }
 0x9a2   : > { %7507 = vmatpush3.bf16.msra.mxu0 %v8334_v8  ;;  %7511 = vmatprep.subr.bf16.mxu1 %v8129_v7  ;;  %v1248_v31 = vld [vmem:[#allocation3] sm:$0x3]  ;;  %v1367_v48 = vld [vmem:[#allocation2 + $0x2] sm:$0x3]  ;;  %v1368_v53 = vld [vmem:[#allocation3 + $0x2] sm:$0x3] }
 0x9a3   : > { %7508 = vmatprep.subr.bf16.mxu0 %v8129_v7  ;;  %7513 = vmatpush3.bf16.msra.mxu1 %v8363_v32  ;;  %p6478_p10 = scmp.ne.s32.totalorder %s1246_s16, 8 }
 0x9a4   : > { %7514 = vmatprep.subr.bf16.mxu1 %v8129_v7  ;;  %6956 = vmatprep.mubr.msk.f32.mxu1 %vm8130_vm1, %v8131_v10 }
 0x9a6   : > { %7510 = vmatpush3.bf16.msra.mxu0 %v8345_v11 }
 0x9a7   : > { %7517 = vmatprep.subr.bf16.mxu0 %v8129_v7  ;;  %7516 = vmatpush3.bf16.msra.mxu1 %v8377_v39 }
 0x9a8   : > { %7523 = vmatprep.subr.bf16.mxu1 %v8129_v7 }
 0x9a9   : > { %6946 = vmatmul.mubr.msk.f32.vlgmr.msra.gmra.mrb[8].mxu0 %vm502_vm2, %v1247_v24 }
 0x9aa   : > { %7519 = vmatpush3.bf16.msra.mxu0 %v8368_v36  ;;  %6967 = vmatprep.mubr.msk.f32.mxu0 %vm8130_vm1, %v8131_v10 }
 0x9ab   : > { %7520 = vmatprep.subr.bf16.mxu0 %v8129_v7  ;;  %6957 = vmatmul.mubr.msk.f32.vlgmr.msra.gmra.mrb[8].mxu1 %vm502_vm2, %v1367_v48 }
 0x9ac   : > { %7525 = vmatpush3.bf16.msra.mxu1 %v8414_v4  ;;  %6978 = vmatprep.mubr.msk.f32.mxu1 %vm8130_vm1, %v8131_v10 }
 0x9ad   : > { %7526 = vmatprep.subr.bf16.mxu1 %v8129_v7 }
 0x9ae   : > { %7522 = vmatpush3.bf16.msra.mxu0 %v8381_v40 }
 0x9af   : > { %6981 = vmatprep.subr.mxu0 %v8131_v10 }
 0x9b0   : > { %7528 = vmatpush3.bf16.msra.mxu1 %v8420_v6 }
 0x9b1   : > { %6986 = vmatprep.subr.mxu1 %v8131_v10 }
 0xa7c   : > { %v1320_v26 = vpop.f32.mrb[8].mxu0 }
 0xa7d   : > { %v1324_v27 = vadd.f32 %v6462_v25, %v1320_v26  ;;  %v6947_v29 = vpop.f32.mrb[9].mxu0 }
 0xa7e   : > { %v1438_v55 = vpop.f32.mrb[8].mxu1 }
 0xa7f   : > { %7846 = vtanh.f32 %v1324_v27  ;;  %v6464_v28 = vmul.f32 -1.442695, %v1324_v27  ;;  %v6958_v56 = vpop.f32.mrb[9].mxu1 }
 0xa81   : > { %7848 = vpow2.f32 %v6464_v28 }
 0xa89   : > { %v7847_v30 = vpop.eup %7846 }
 0xa8a   : > { %1338 = vrot.lane.b32.xlu0 %v7847_v30, %s8132_s0 }
 0xa8b   : > { %v7849_v35 = vpop.eup %7848 }
 0xa8c   : > { %v1328_v37 = vadd.f32 1.0, %v7849_v35 }
 0xa8e   : > { %1333 = vrot.lane.b32.xlu0 %v1248_v31, %s8133_s23  ;;  %7850 = vrcp.f32 %v1328_v37 }
 0xa98   : > { %v7851_v38 = vpop.eup %7850 }
 0xafc   : > { %v1339_v41 = vpop.permute.xlu0 %1338 }
 0xafd   : > { %v1341_v42 = vmul.f32 %v7851_v38, %v1339_v41 }
 0xaff   : > { %1343 = vrot.lane.b32.xlu1 %v1341_v42, %s8133_s23 }
 0xb00   : > { %v1334_v43 = vpop.permute.xlu0 %1333 }
 0xb01   : > { %v1336_v44 = vmul.f32 %v7851_v38, %v1334_v43 }
 0xb71   : > { %v1344_v46 = vpop.permute.xlu1 %1343 }
 0xb72   : > { %v8554_v47 = vadd.f32 %v1344_v46, %v1336_v44 }
 0xb74   : > { %7852 = vtanh.f32 %v8554_v47  ;;  %v6466_v43 = vclamps-f32 %v8554_v47, 50.0 }
 0xb7e   : > { %v7853_v50 = vpop.eup %7852 }
 0xb7f   : > { %1349 = vrot.lane.b32.xlu1 %v7853_v50, %s8132_s0 }
 0xbf1   : > { %v1350_v51 = vpop.permute.xlu1 %1349 }
 0xbf2   : > { %v1352_v52 = vmul.f32 %v7851_v38, %v1350_v51 }
 0xbf4   : > { %1443 = vrot.lane.b32.xlu0 %v1352_v52, %s8133_s23  ;;  %v6465_v29 = vclamps-f32 %v1352_v52, 50.0 }
 0xbf8   : > { %1526 = vrot.lane.b32.xlu0 %v1368_v53, %s8133_s23 }
 0xc66   : > { %v1444_v58 = vpop.permute.xlu0 %1443 }
 0xc67   : > { %6968 = vmatmul.mubr.msk.f32.vlgmr.msra.gmra.mrb[10].mxu0 %vm502_vm2, %v1444_v58 }
 0xc68   : > { %6982 = vmatpush3.msra.mxu0 %v8456_v34  ;;  %6983 = vmatprep.mubr.msk.f32.mxu0 %vm8130_vm1, %v8131_v10 }
 0xc69   : > { %7529 = vmatprep.subr.bf16.mxu0 %v8129_v7 }
 0xc6a   : > { %v1527_v14 = vpop.permute.xlu0 %1526 }
 0xd3a   : > { %v1513_v59 = vpop.f32.mrb[10].mxu0 }
 0xd3b   : > { %v1514_v60 = vadd.f32 %v1513_v59, %v1438_v55  ;;  %v6969_v62 = vpop.f32.mrb[11].mxu0 }
 0xd3d   : > { %v1517_v63 = vadd.f32 %v8400_v49, %v1514_v60 }
 0xd3f   : > { %7854 = vtanh.f32 %v1517_v63  ;;  %v6469_v2 = vmul.f32 -1.442695, %v1517_v63 }
 0xd41   : > { %7856 = vpow2.f32 %v6469_v2 }
 0xd49   : > { %v7855_v1 = vpop.eup %7854 }
 0xd4a   : > { %1531 = vrot.lane.b32.xlu1 %v7855_v1, %s8132_s0 }
 0xd4b   : > { %v7857_v3 = vpop.eup %7856 }
 0xd4c   : > { %v1521_v5 = vadd.f32 1.0, %v7857_v3 }
 0xd4e   : > { %7858 = vrcp.f32 %v1521_v5 }
 0xd58   : > { %v7859_v9 = vpop.eup %7858 }
 0xd59   : > { %v1529_v17 = vmul.f32 %v7859_v9, %v1527_v14 }
 0xdbc   : > { %v1532_v12 = vpop.permute.xlu1 %1531 }
 0xdbd   : > { %v1534_v13 = vmul.f32 %v7859_v9, %v1532_v12 }
 0xdbf   : > { %1536 = vrot.lane.b32.xlu1 %v1534_v13, %s8133_s23 }
 0xe31   : > { %v1537_v18 = vpop.permute.xlu1 %1536 }
 0xe32   : > { %v1539_v19 = vadd.f32 %v1537_v18, %v1529_v17 }
 0xe34   : > { %7860 = vtanh.f32 %v1539_v19  ;;  %v6471_v44 = vclamps-f32 %v1539_v19, 50.0 }
 0xe3e   : > { %v7861_v20 = vpop.eup %7860 }
 0xe3f   : > { %1542 = vrot.lane.b32.xlu0 %v7861_v20, %s8132_s0 }
 0xeb1   : > { %v1543_v21 = vpop.permute.xlu0 %1542 }
 0xeb2   : > { %v1545_v22 = vmul.f32 %v7859_v9, %v1543_v21 }
 0xeb4   : > { %1561 = vrot.lane.b32.xlu1 %v1545_v22, %s8133_s23  ;;  %v6470_v30 = vclamps-f32 %v1545_v22, 50.0 }
 0xf26   : > { %v1562_v23 = vpop.permute.xlu1 %1561 }
 0xf27   : > { %6979 = vmatmul.mubr.msk.f32.vlgmr.msra.gmra.mrb[10].mxu1 %vm502_vm2, %v1562_v23 }
 0xf28   : > { %6987 = vmatpush3.msra.mxu1 %v8451_v33  ;;  %6988 = vmatprep.mubr.msk.f32.mxu1 %vm8130_vm1, %v8131_v10 }
 0xf29   : > { %7535 = vmatprep.subr.bf16.mxu1 %v8129_v7 }
 0xffa   : > { %v1631_v24 = vpop.f32.mrb[10].mxu1 }
 0xffb   : > { %v1632_v25 = vadd.f32 %v8436_v15, %v1631_v24  ;;  %v6980_v26 = vpop.f32.mrb[11].mxu1 }
 0xffd   : > { %v1635_v27 = vsel %vm902_vm3, %v1632_v25, -inf }
 0xffe   : > { %1636 = vmax.xlane.f32.xlu0 %v1635_v27 }
0x1014   : > { %1356 = vrot.lane.b32.xlu0 %v6465_v29, %s8133_s23 }
0x1018   : > { %1549 = vrot.lane.b32.xlu0 %v6470_v30, %s8133_s23 }
0x108b   : > { %v1637_v31 = vpop.xlane.xlu0 %1636 }
0x108c   : > { %v1638_v28 = vsub.f32 %v1632_v25, %v1637_v31 }
0x108e   : > { %v1639_v35 = vmul.f32 1.442695, %v1638_v28 }
0x108f   : > { %v1357_v37 = vpop.permute.xlu0 %1356 }
0x1090   : > { %7862 = vpow2.f32 %v1639_v35  ;;  %1359 = vst.msk [vmem:[#allocation2] sm:$0x3] %vm611_vm4, %v1357_v37 }
0x1093   : > { %v1550_v38 = vpop.permute.xlu0 %1549 }
0x1094   : > { %1552 = vst.msk [vmem:[#allocation2 + $0x2] sm:$0x3] %vm611_vm4, %v1550_v38 }
0x1097   : > { %v1967_v17 = vld [vmem:[#allocation2] sm:$0x3] (!%p6478_p10) }
0x1098   : > { %1969 = vst.msk [vmem:[#allocation8] sm:$0x3] (!%p6478_p10), %vm611_vm4, %v1967_v17 }
0x109a   : > { %v7863_v41 = vpop.eup %7862 }
0x109b   : > { %v1641_v42 = vsel %vm902_vm3, %v7863_v41, 0.0  ;;  %v1968_v18 = vld [vmem:[#allocation2 + $0x2] sm:$0x3] (!%p6478_p10) }
0x109c   : > { %1642 = vadd.xlane.f32.xlu1 %v1641_v42  ;;  %1970 = vst.msk [vmem:[#allocation8 + $0x2] sm:$0x3] (!%p6478_p10), %vm611_vm4, %v1968_v18 }
0x10ad   : > { %1363 = vrot.lane.b32.xlu1 %v6466_v43, %s9288_s27 }
0x10b1   : > { %1556 = vrot.lane.b32.xlu1 %v6471_v44, %s9288_s27 }
0x1129   : > { %v1643_v46 = vpop.xlane.xlu1 %1642 }
0x112a   : > { %7864 = vrcp.f32 %v1643_v46 }
0x112d   : > { %v1364_v48 = vpop.permute.xlu1 %1363 }
0x112e   : > { %1366 = vst.msk [vmem:[#allocation3] sm:$0x3] %vm611_vm4, %v1364_v48 }
0x1131   : > { %v1557_v50 = vpop.permute.xlu1 %1556 }
0x1132   : > { %1559 = vst.msk [vmem:[#allocation3 + $0x2] sm:$0x3] %vm611_vm4, %v1557_v50 }
0x1134   : > { %v7865_v51 = vpop.eup %7864 }
0x1135   : > { %v1645_v52 = vmul.f32 %v7865_v51, %v7863_v41 }
0x1137   : > { %v1653_v53 = vrot.slane %v1645_v52, %v8464_v45 }
0x1139   : > { %v1661_v55 = vrot.slane %v1653_v53, %v8464_v45  ;;  %v1654_v47 = vcombine.high %v1653_v53, %v1653_v53 }
0x113b   : > { %6984 = vmatmul.mubr.msk.f32.vlgmr.msra.gmra.mrb[12].mxu0 %vm937_vm5, %v1661_v55  ;;  %v1668_v56 = vrot.slane %v1654_v47, %v8464_v45 }
0x113c   : > { %7531 = vmatpush3.bf16.msra.mxu0 %v8479_v54  ;;  %6999 = vmatprep.mubr.msk.f32.mxu0 %vm8130_vm1, %v8131_v10 }
0x113d   : > { %6989 = vmatmul.mubr.msk.f32.vlgmr.msra.gmra.mrb[12].mxu1 %vm937_vm5, %v1668_v56  ;;  %7532 = vmatprep.subr.bf16.mxu0 %v8129_v7 }
0x113e   : > { %7537 = vmatpush3.bf16.msra.mxu1 %v8482_v57  ;;  %7010 = vmatprep.mubr.msk.f32.mxu1 %vm8130_vm1, %v8131_v10 }
0x113f   : > { %7538 = vmatprep.subr.bf16.mxu1 %v8129_v7 }
0x1140   : > { %7534 = vmatpush3.bf16.msra.mxu0 %v8512_v0 }
0x1142   : > { %7540 = vmatpush3.bf16.msra.mxu1 %v8498_v61 }
0x1145   : > { %7011 = vmatmul.mubr.msk.f32.vlgmr.msra.gmra.mrb[14].mxu1 %vm502_vm2, %v1562_v23 }
0x120e   : > { %v1737_v58 = vpop.f32.mrb[12].mxu0 }
0x120f   : > { %v6985_v59 = vpop.f32.mrb[13].mxu0 }
0x1210   : > { %v1809_v60 = vpop.f32.mrb[12].mxu1 }
0x1211   : > { %v1815_v62 = vrot.slane %v1809_v60, 7  ;;  %v6990_v63 = vpop.f32.mrb[13].mxu1 }
0x1213   : > { %v1816_v1 = vsel %vm1085_vm6, %v1815_v62, %v1737_v58 }
0x1214   : > { %7000 = vmatmul.mubr.msk.f32.vlgmr.msra.gmra.mrb[14].mxu0 %vm502_vm2, %v1816_v1 }
0x1218   : > { %v1955_v2 = vpop.f32.mrb[14].mxu1 }
0x1219   : > { %v7012_v3 = vpop.f32.mrb[15].mxu1 }
0x12e7   : > { %v1885_v5 = vpop.f32.mrb[14].mxu0 }
0x12e8   : > { %v1956_v9 = vadd.f32 %v1955_v2, %v1885_v5  ;;  %v7001_v12 = vpop.f32.mrb[15].mxu0 }
0x12ea   : > { %v1959_v13 = vadd.f32 %v8520_v16, %v1956_v9 }
0x12ec   : > { %7866 = vtanh.f32 %v1959_v13 }
0x12f1   : > { %1966 = sbr.rel (%p6478_p10) target bundleno = 4856 (0x12f8), region = 84 }
0x12f6   : > { %v7867_v14 = vpop.eup %7866 }
0x12f7   : > { %6477 = vst.msk [vmem:[%s8308_s24 + $0x2] sm:$0x3] %vm611_vm4, %v7867_v14 }
0x12f8 PF: > { %s1971_s6 = sadd.s32 2, %s8297_s14  ;;  %7541 = vmatprep.subr.bf16.mxu0 %v8129_v7  ;;  %7021 = vmatprep.mubr.msk.f32.mxu0 %vm8130_vm1, %v8131_v10  ;;  %v1972_v19 = vld [vmem:[#allocation2] sm:$0x3]  ;;  %v6479_v20 = vld [vmem:[%s8306_s17 + $0x4] sm:$0x3]  ;;  %s9289_s22 = smov 96  }
0x12f9   : > { %7543 = vmatpush3.bf16.msra.mxu0 %v8334_v8  ;;  %7547 = vmatprep.subr.bf16.mxu1 %v8129_v7  ;;  %v1973_v25 = vld [vmem:[#allocation3] sm:$0x3]  ;;  %v2092_v42 = vld [vmem:[#allocation2 + $0x2] sm:$0x3]  ;;  %v2093_v48 = vld [vmem:[#allocation3 + $0x2] sm:$0x3] }
0x12fa   : > { %7544 = vmatprep.subr.bf16.mxu0 %v8129_v7  ;;  %7549 = vmatpush3.bf16.msra.mxu1 %v8363_v32  ;;  %p6495_p11 = scmp.ne.s32.totalorder %s1971_s6, 8 }
0x12fb   : > { %7550 = vmatprep.subr.bf16.mxu1 %v8129_v7  ;;  %7032 = vmatprep.mubr.msk.f32.mxu1 %vm8130_vm1, %v8131_v10 }
0x12fd   : > { %7546 = vmatpush3.bf16.msra.mxu0 %v8345_v11 }
0x12fe   : > { %7553 = vmatprep.subr.bf16.mxu0 %v8129_v7  ;;  %7552 = vmatpush3.bf16.msra.mxu1 %v8377_v39 }
0x12ff   : > { %7559 = vmatprep.subr.bf16.mxu1 %v8129_v7 }
0x1300   : > { %7022 = vmatmul.mubr.msk.f32.vlgmr.msra.gmra.mrb[16].mxu0 %vm502_vm2, %v1972_v19 }
0x1301   : > { %7555 = vmatpush3.bf16.msra.mxu0 %v8368_v36  ;;  %7043 = vmatprep.mubr.msk.f32.mxu0 %vm8130_vm1, %v8131_v10 }
0x1302   : > { %7556 = vmatprep.subr.bf16.mxu0 %v8129_v7  ;;  %7033 = vmatmul.mubr.msk.f32.vlgmr.msra.gmra.mrb[16].mxu1 %vm502_vm2, %v2092_v42 }
0x1303   : > { %7561 = vmatpush3.bf16.msra.mxu1 %v8414_v4  ;;  %7054 = vmatprep.mubr.msk.f32.mxu1 %vm8130_vm1, %v8131_v10 }
0x1304   : > { %7562 = vmatprep.subr.bf16.mxu1 %v8129_v7 }
0x1305   : > { %7558 = vmatpush3.bf16.msra.mxu0 %v8381_v40 }
0x1306   : > { %7057 = vmatprep.subr.mxu0 %v8131_v10 }
0x1307   : > { %7564 = vmatpush3.bf16.msra.mxu1 %v8420_v6 }
0x1308   : > { %7062 = vmatprep.subr.mxu1 %v8131_v10 }
0x13d3   : > { %v2045_v21 = vpop.f32.mrb[16].mxu0 }
0x13d4   : > { %v2049_v22 = vadd.f32 %v6479_v20, %v2045_v21  ;;  %v7023_v23 = vpop.f32.mrb[17].mxu0 }
0x13d5   : > { %v2163_v50 = vpop.f32.mrb[16].mxu1 }
0x13d6   : > { %7868 = vtanh.f32 %v2049_v22  ;;  %v6481_v26 = vmul.f32 -1.442695, %v2049_v22  ;;  %v7034_v51 = vpop.f32.mrb[17].mxu1 }
0x13d8   : > { %7870 = vpow2.f32 %v6481_v26 }
0x13e0   : > { %v7869_v24 = vpop.eup %7868 }
0x13e1   : > { %2063 = vrot.lane.b32.xlu0 %v7869_v24, %s8132_s0 }
0x13e2   : > { %v7871_v27 = vpop.eup %7870 }
0x13e3   : > { %v2053_v29 = vadd.f32 1.0, %v7871_v27 }
0x13e5   : > { %2058 = vrot.lane.b32.xlu0 %v1973_v25, %s8133_s23  ;;  %7872 = vrcp.f32 %v2053_v29 }
0x13ef   : > { %v7873_v30 = vpop.eup %7872 }
0x1453   : > { %v2064_v31 = vpop.permute.xlu0 %2063 }
0x1454   : > { %v2066_v28 = vmul.f32 %v7873_v30, %v2064_v31 }
0x1456   : > { %2068 = vrot.lane.b32.xlu1 %v2066_v28, %s8133_s23 }
0x1457   : > { %v2059_v35 = vpop.permute.xlu0 %2058 }
0x1458   : > { %v2061_v37 = vmul.f32 %v7873_v30, %v2059_v35 }
0x14c8   : > { %v2069_v38 = vpop.permute.xlu1 %2068 }
0x14c9   : > { %v8645_v41 = vadd.f32 %v2069_v38, %v2061_v37 }
0x14cb   : > { %7874 = vtanh.f32 %v8645_v41  ;;  %v6483_v35 = vclamps-f32 %v8645_v41, 50.0 }
0x14d5   : > { %v7875_v43 = vpop.eup %7874 }
0x14d6   : > { %2074 = vrot.lane.b32.xlu1 %v7875_v43, %s8132_s0 }
0x1548   : > { %v2075_v44 = vpop.permute.xlu1 %2074 }
0x1549   : > { %v2077_v46 = vmul.f32 %v7873_v30, %v2075_v44 }
0x154b   : > { %2168 = vrot.lane.b32.xlu0 %v2077_v46, %s8133_s23  ;;  %v6482_v23 = vclamps-f32 %v2077_v46, 50.0 }
0x154f   : > { %2251 = vrot.lane.b32.xlu0 %v2093_v48, %s8133_s23 }
0x15bd   : > { %v2169_v52 = vpop.permute.xlu0 %2168 }
0x15be   : > { %7044 = vmatmul.mubr.msk.f32.vlgmr.msra.gmra.mrb[18].mxu0 %vm502_vm2, %v2169_v52 }
0x15bf   : > { %7058 = vmatpush3.msra.mxu0 %v8456_v34  ;;  %7059 = vmatprep.mubr.msk.f32.mxu0 %vm8130_vm1, %v8131_v10 }
0x15c0   : > { %7565 = vmatprep.subr.bf16.mxu0 %v8129_v7 }
0x15c1   : > { %v2252_v3 = vpop.permute.xlu0 %2251 }
0x1691   : > { %v2238_v53 = vpop.f32.mrb[18].mxu0 }
0x1692   : > { %v2239_v55 = vadd.f32 %v2238_v53, %v2163_v50  ;;  %v7045_v47 = vpop.f32.mrb[19].mxu0 }
0x1694   : > { %v2242_v56 = vadd.f32 %v8400_v49, %v2239_v55 }
0x1696   : > { %7876 = vtanh.f32 %v2242_v56  ;;  %v6486_v59 = vmul.f32 -1.442695, %v2242_v56 }
0x1698   : > { %7878 = vpow2.f32 %v6486_v59 }
0x16a0   : > { %v7877_v58 = vpop.eup %7876 }
0x16a1   : > { %2256 = vrot.lane.b32.xlu1 %v7877_v58, %s8132_s0 }
0x16a2   : > { %v7879_v60 = vpop.eup %7878 }
0x16a3   : > { %v2246_v62 = vadd.f32 1.0, %v7879_v60 }
0x16a5   : > { %7880 = vrcp.f32 %v2246_v62 }
0x16af   : > { %v7881_v63 = vpop.eup %7880 }
0x16b0   : > { %v2254_v5 = vmul.f32 %v7881_v63, %v2252_v3 }
0x1713   : > { %v2257_v1 = vpop.permute.xlu1 %2256 }
0x1714   : > { %v2259_v2 = vmul.f32 %v7881_v63, %v2257_v1 }
0x1716   : > { %2261 = vrot.lane.b32.xlu1 %v2259_v2, %s8133_s23 }
0x1788   : > { %v2262_v9 = vpop.permute.xlu1 %2261 }
0x1789   : > { %v2264_v12 = vadd.f32 %v2262_v9, %v2254_v5 }
0x178b   : > { %7882 = vtanh.f32 %v2264_v12  ;;  %v6488_v37 = vclamps-f32 %v2264_v12, 50.0 }
0x1795   : > { %v7883_v13 = vpop.eup %7882 }
0x1796   : > { %2267 = vrot.lane.b32.xlu0 %v7883_v13, %s8132_s0 }
0x1808   : > { %v2268_v14 = vpop.permute.xlu0 %2267 }
0x1809   : > { %v2270_v17 = vmul.f32 %v7881_v63, %v2268_v14 }
0x180b   : > { %2286 = vrot.lane.b32.xlu1 %v2270_v17, %s8133_s23  ;;  %v6487_v24 = vclamps-f32 %v2270_v17, 50.0 }
0x187d   : > { %v2287_v18 = vpop.permute.xlu1 %2286 }
0x187e   : > { %7055 = vmatmul.mubr.msk.f32.vlgmr.msra.gmra.mrb[18].mxu1 %vm502_vm2, %v2287_v18 }
0x187f   : > { %7063 = vmatpush3.msra.mxu1 %v8451_v33  ;;  %7064 = vmatprep.mubr.msk.f32.mxu1 %vm8130_vm1, %v8131_v10 }
0x1880   : > { %7571 = vmatprep.subr.bf16.mxu1 %v8129_v7 }
0x1951   : > { %v2356_v19 = vpop.f32.mrb[18].mxu1 }
0x1952   : > { %v2357_v20 = vadd.f32 %v8436_v15, %v2356_v19  ;;  %v7056_v21 = vpop.f32.mrb[19].mxu1 }
0x1954   : > { %v2360_v22 = vsel %vm902_vm3, %v2357_v20, -inf }
0x1955   : > { %2361 = vmax.xlane.f32.xlu0 %v2360_v22 }
0x196b   : > { %2081 = vrot.lane.b32.xlu0 %v6482_v23, %s8133_s23 }
0x196f   : > { %2274 = vrot.lane.b32.xlu0 %v6487_v24, %s8133_s23 }
0x19e2   : > { %v2362_v25 = vpop.xlane.xlu0 %2361 }
0x19e3   : > { %v2363_v26 = vsub.f32 %v2357_v20, %v2362_v25 }
0x19e5   : > { %v2364_v27 = vmul.f32 1.442695, %v2363_v26 }
0x19e6   : > { %v2082_v29 = vpop.permute.xlu0 %2081 }
0x19e7   : > { %7884 = vpow2.f32 %v2364_v27  ;;  %2084 = vst.msk [vmem:[#allocation2] sm:$0x3] %vm611_vm4, %v2082_v29 }
0x19ea   : > { %v2275_v30 = vpop.permute.xlu0 %2274 }
0x19eb   : > { %2277 = vst.msk [vmem:[#allocation2 + $0x2] sm:$0x3] %vm611_vm4, %v2275_v30 }
0x19ee   : > { %v2692_v5 = vld [vmem:[#allocation2] sm:$0x3] (!%p6495_p11) }
0x19ef   : > { %2694 = vst.msk [vmem:[#allocation8] sm:$0x3] (!%p6495_p11), %vm611_vm4, %v2692_v5 }
0x19f1   : > { %v7885_v31 = vpop.eup %7884 }
0x19f2   : > { %v2366_v28 = vsel %vm902_vm3, %v7885_v31, 0.0  ;;  %v2693_v9 = vld [vmem:[#allocation2 + $0x2] sm:$0x3] (!%p6495_p11) }
0x19f3   : > { %2367 = vadd.xlane.f32.xlu1 %v2366_v28  ;;  %2695 = vst.msk [vmem:[#allocation8 + $0x2] sm:$0x3] (!%p6495_p11), %vm611_vm4, %v2693_v9 }
0x1a04   : > { %2088 = vrot.lane.b32.xlu1 %v6483_v35, %s9289_s22 }
0x1a08   : > { %2281 = vrot.lane.b32.xlu1 %v6488_v37, %s9289_s22 }
0x1a80   : > { %v2368_v38 = vpop.xlane.xlu1 %2367 }
0x1a81   : > { %7886 = vrcp.f32 %v2368_v38 }
0x1a84   : > { %v2089_v42 = vpop.permute.xlu1 %2088 }
0x1a85   : > { %2091 = vst.msk [vmem:[#allocation3] sm:$0x3] %vm611_vm4, %v2089_v42 }
0x1a88   : > { %v2282_v43 = vpop.permute.xlu1 %2281 }
0x1a89   : > { %2284 = vst.msk [vmem:[#allocation3 + $0x2] sm:$0x3] %vm611_vm4, %v2282_v43 }
0x1a8b   : > { %v7887_v44 = vpop.eup %7886 }
0x1a8c   : > { %v2370_v46 = vmul.f32 %v7887_v44, %v7885_v31 }
0x1a8e   : > { %v2378_v48 = vrot.slane %v2370_v46, %v8464_v45 }
0x1a90   : > { %v2386_v50 = vrot.slane %v2378_v48, %v8464_v45  ;;  %v2379_v41 = vcombine.high %v2378_v48, %v2378_v48 }
0x1a92   : > { %7060 = vmatmul.mubr.msk.f32.vlgmr.msra.gmra.mrb[20].mxu0 %vm937_vm5, %v2386_v50  ;;  %v2393_v51 = vrot.slane %v2379_v41, %v8464_v45 }
0x1a93   : > { %7567 = vmatpush3.bf16.msra.mxu0 %v8479_v54  ;;  %7075 = vmatprep.mubr.msk.f32.mxu0 %vm8130_vm1, %v8131_v10 }
0x1a94   : > { %7065 = vmatmul.mubr.msk.f32.vlgmr.msra.gmra.mrb[20].mxu1 %vm937_vm5, %v2393_v51  ;;  %7568 = vmatprep.subr.bf16.mxu0 %v8129_v7 }
0x1a95   : > { %7573 = vmatpush3.bf16.msra.mxu1 %v8482_v57  ;;  %7086 = vmatprep.mubr.msk.f32.mxu1 %vm8130_vm1, %v8131_v10 }
0x1a96   : > { %7574 = vmatprep.subr.bf16.mxu1 %v8129_v7 }
0x1a97   : > { %7570 = vmatpush3.bf16.msra.mxu0 %v8512_v0 }
0x1a99   : > { %7576 = vmatpush3.bf16.msra.mxu1 %v8498_v61 }
0x1a9c   : > { %7087 = vmatmul.mubr.msk.f32.vlgmr.msra.gmra.mrb[22].mxu1 %vm502_vm2, %v2287_v18 }
0x1b65   : > { %v2462_v52 = vpop.f32.mrb[20].mxu0 }
0x1b66   : > { %v7061_v53 = vpop.f32.mrb[21].mxu0 }
0x1b67   : > { %v2534_v55 = vpop.f32.mrb[20].mxu1 }
0x1b68   : > { %v2540_v47 = vrot.slane %v2534_v55, 7  ;;  %v7066_v56 = vpop.f32.mrb[21].mxu1 }
0x1b6a   : > { %v2541_v58 = vsel %vm1085_vm6, %v2540_v47, %v2462_v52 }
0x1b6b   : > { %7076 = vmatmul.mubr.msk.f32.vlgmr.msra.gmra.mrb[22].mxu0 %vm502_vm2, %v2541_v58 }
0x1b6f   : > { %v2680_v59 = vpop.f32.mrb[22].mxu1 }
0x1b70   : > { %v7088_v60 = vpop.f32.mrb[23].mxu1 }
0x1c3e   : > { %v2610_v62 = vpop.f32.mrb[22].mxu0 }
0x1c3f   : > { %v2681_v63 = vadd.f32 %v2680_v59, %v2610_v62  ;;  %v7077_v1 = vpop.f32.mrb[23].mxu0 }
0x1c41   : > { %v2684_v2 = vadd.f32 %v8520_v16, %v2681_v63 }
0x1c43   : > { %7888 = vtanh.f32 %v2684_v2 }
0x1c48   : > { %2691 = sbr.rel (%p6495_p11) target bundleno = 7247 (0x1c4f), region = 88 }
0x1c4d   : > { %v7889_v3 = vpop.eup %7888 }
0x1c4e   : > { %6494 = vst.msk [vmem:[%s8308_s24 + $0x4] sm:$0x3] %vm611_vm4, %v7889_v3 }
0x1c4f PF: > { %s2696_s15 = sadd.s32 3, %s8297_s14  ;;  %7577 = vmatprep.subr.bf16.mxu0 %v8129_v7  ;;  %7097 = vmatprep.mubr.msk.f32.mxu0 %vm8130_vm1, %v8131_v10  ;;  %v2697_v12 = vld [vmem:[#allocation2] sm:$0x3]  ;;  %v6496_v13 = vld [vmem:[%s8306_s17 + $0x6] sm:$0x3]  ;;  %s9290_s20 = smov 96  }
0x1c50   : > { %7579 = vmatpush3.bf16.msra.mxu0 %v8334_v8  ;;  %7583 = vmatprep.subr.bf16.mxu1 %v8129_v7  ;;  %v2698_v20 = vld [vmem:[#allocation3] sm:$0x3]  ;;  %v2817_v28 = vld [vmem:[#allocation2 + $0x2] sm:$0x3]  ;;  %v2818_v42 = vld [vmem:[#allocation3 + $0x2] sm:$0x3] }
0x1c51   : > { %7580 = vmatprep.subr.bf16.mxu0 %v8129_v7  ;;  %7585 = vmatpush3.bf16.msra.mxu1 %v8363_v32  ;;  %p6512_p13 = scmp.ne.s32.totalorder %s2696_s15, 8 }
0x1c52   : > { %7586 = vmatprep.subr.bf16.mxu1 %v8129_v7  ;;  %7108 = vmatprep.mubr.msk.f32.mxu1 %vm8130_vm1, %v8131_v10 }
0x1c54   : > { %7582 = vmatpush3.bf16.msra.mxu0 %v8345_v11 }
0x1c55   : > { %7589 = vmatprep.subr.bf16.mxu0 %v8129_v7  ;;  %7588 = vmatpush3.bf16.msra.mxu1 %v8377_v39 }
0x1c56   : > { %7595 = vmatprep.subr.bf16.mxu1 %v8129_v7 }
0x1c57   : > { %7098 = vmatmul.mubr.msk.f32.vlgmr.msra.gmra.mrb[24].mxu0 %vm502_vm2, %v2697_v12 }
0x1c58   : > { %7591 = vmatpush3.bf16.msra.mxu0 %v8368_v36  ;;  %7119 = vmatprep.mubr.msk.f32.mxu0 %vm8130_vm1, %v8131_v10 }
0x1c59   : > { %7592 = vmatprep.subr.bf16.mxu0 %v8129_v7  ;;  %7109 = vmatmul.mubr.msk.f32.vlgmr.msra.gmra.mrb[24].mxu1 %vm502_vm2, %v2817_v28 }
0x1c5a   : > { %7597 = vmatpush3.bf16.msra.mxu1 %v8414_v4  ;;  %7130 = vmatprep.mubr.msk.f32.mxu1 %vm8130_vm1, %v8131_v10 }
0x1c5b   : > { %7598 = vmatprep.subr.bf16.mxu1 %v8129_v7 }
0x1c5c   : > { %7594 = vmatpush3.bf16.msra.mxu0 %v8381_v40 }
0x1c5d   : > { %7133 = vmatprep.subr.mxu0 %v8131_v10 }
0x1c5e   : > { %7600 = vmatpush3.bf16.msra.mxu1 %v8420_v6 }
0x1c5f   : > { %7138 = vmatprep.subr.mxu1 %v8131_v10 }
0x1d2a   : > { %v2770_v14 = vpop.f32.mrb[24].mxu0 }
0x1d2b   : > { %v2774_v17 = vadd.f32 %v6496_v13, %v2770_v14  ;;  %v7099_v18 = vpop.f32.mrb[25].mxu0 }
0x1d2c   : > { %v2888_v43 = vpop.f32.mrb[24].mxu1 }
0x1d2d   : > { %7890 = vtanh.f32 %v2774_v17  ;;  %v6498_v21 = vmul.f32 -1.442695, %v2774_v17  ;;  %v7110_v44 = vpop.f32.mrb[25].mxu1 }
0x1d2f   : > { %7892 = vpow2.f32 %v6498_v21 }
0x1d37   : > { %v7891_v19 = vpop.eup %7890 }
0x1d38   : > { %2788 = vrot.lane.b32.xlu0 %v7891_v19, %s8132_s0 }
0x1d39   : > { %v7893_v22 = vpop.eup %7892 }
0x1d3a   : > { %v2778_v23 = vadd.f32 1.0, %v7893_v22 }
0x1d3c   : > { %2783 = vrot.lane.b32.xlu0 %v2698_v20, %s8133_s23  ;;  %7894 = vrcp.f32 %v2778_v23 }
0x1d46   : > { %v7895_v24 = vpop.eup %7894 }
0x1daa   : > { %v2789_v25 = vpop.permute.xlu0 %2788 }
0x1dab   : > { %v2791_v26 = vmul.f32 %v7895_v24, %v2789_v25 }
0x1dad   : > { %2793 = vrot.lane.b32.xlu1 %v2791_v26, %s8133_s23 }
0x1dae   : > { %v2784_v27 = vpop.permute.xlu0 %2783 }
0x1daf   : > { %v2786_v29 = vmul.f32 %v7895_v24, %v2784_v27 }
0x1e1f   : > { %v2794_v30 = vpop.permute.xlu1 %2793 }
0x1e20   : > { %v8736_v31 = vadd.f32 %v2794_v30, %v2786_v29 }
0x1e22   : > { %7896 = vtanh.f32 %v8736_v31  ;;  %v6500_v27 = vclamps-f32 %v8736_v31, 50.0 }
0x1e2c   : > { %v7897_v35 = vpop.eup %7896 }
0x1e2d   : > { %2799 = vrot.lane.b32.xlu1 %v7897_v35, %s8132_s0 }
0x1e9f   : > { %v2800_v37 = vpop.permute.xlu1 %2799 }
0x1ea0   : > { %v2802_v38 = vmul.f32 %v7895_v24, %v2800_v37 }
0x1ea2   : > { %2893 = vrot.lane.b32.xlu0 %v2802_v38, %s8133_s23  ;;  %v6499_v18 = vclamps-f32 %v2802_v38, 50.0 }
0x1ea6   : > { %2976 = vrot.lane.b32.xlu0 %v2818_v42, %s8133_s23 }
0x1f14   : > { %v2894_v46 = vpop.permute.xlu0 %2893 }
0x1f15   : > { %7120 = vmatmul.mubr.msk.f32.vlgmr.msra.gmra.mrb[26].mxu0 %vm502_vm2, %v2894_v46 }
0x1f16   : > { %7134 = vmatpush3.msra.mxu0 %v8456_v34  ;;  %7135 = vmatprep.mubr.msk.f32.mxu0 %vm8130_vm1, %v8131_v10 }
0x1f17   : > { %7601 = vmatprep.subr.bf16.mxu0 %v8129_v7 }
0x1f18   : > { %v2977_v60 = vpop.permute.xlu0 %2976 }
0x1fe8   : > { %v2963_v48 = vpop.f32.mrb[26].mxu0 }
0x1fe9   : > { %v2964_v50 = vadd.f32 %v2963_v48, %v2888_v43  ;;  %v7121_v41 = vpop.f32.mrb[27].mxu0 }
0x1feb   : > { %v2967_v51 = vadd.f32 %v8400_v49, %v2964_v50 }
0x1fed   : > { %7898 = vtanh.f32 %v2967_v51  ;;  %v6503_v53 = vmul.f32 -1.442695, %v2967_v51 }
0x1fef   : > { %7900 = vpow2.f32 %v6503_v53 }
0x1ff7   : > { %v7899_v52 = vpop.eup %7898 }
0x1ff8   : > { %2981 = vrot.lane.b32.xlu1 %v7899_v52, %s8132_s0 }
0x1ff9   : > { %v7901_v55 = vpop.eup %7900 }
0x1ffa   : > { %v2971_v47 = vadd.f32 1.0, %v7901_v55 }
0x1ffc   : > { %7902 = vrcp.f32 %v2971_v47 }
0x2006   : > { %v7903_v56 = vpop.eup %7902 }
0x2007   : > { %v2979_v62 = vmul.f32 %v7903_v56, %v2977_v60 }
0x206a   : > { %v2982_v58 = vpop.permute.xlu1 %2981 }
0x206b   : > { %v2984_v59 = vmul.f32 %v7903_v56, %v2982_v58 }
0x206d   : > { %2986 = vrot.lane.b32.xlu1 %v2984_v59, %s8133_s23 }
0x20df   : > { %v2987_v63 = vpop.permute.xlu1 %2986 }
0x20e0   : > { %v2989_v1 = vadd.f32 %v2987_v63, %v2979_v62 }
0x20e2   : > { %7904 = vtanh.f32 %v2989_v1  ;;  %v6505_v29 = vclamps-f32 %v2989_v1, 50.0 }
0x20ec   : > { %v7905_v2 = vpop.eup %7904 }
0x20ed   : > { %2992 = vrot.lane.b32.xlu0 %v7905_v2, %s8132_s0 }
0x215f   : > { %v2993_v3 = vpop.permute.xlu0 %2992 }
0x2160   : > { %v2995_v5 = vmul.f32 %v7903_v56, %v2993_v3 }
0x2162   : > { %3011 = vrot.lane.b32.xlu1 %v2995_v5, %s8133_s23  ;;  %v6504_v19 = vclamps-f32 %v2995_v5, 50.0 }
0x21d4   : > { %v3012_v9 = vpop.permute.xlu1 %3011 }
0x21d5   : > { %7131 = vmatmul.mubr.msk.f32.vlgmr.msra.gmra.mrb[26].mxu1 %vm502_vm2, %v3012_v9 }
0x21d6   : > { %7139 = vmatpush3.msra.mxu1 %v8451_v33  ;;  %7140 = vmatprep.mubr.msk.f32.mxu1 %vm8130_vm1, %v8131_v10 }
0x21d7   : > { %7607 = vmatprep.subr.bf16.mxu1 %v8129_v7 }
0x22a8   : > { %v3081_v12 = vpop.f32.mrb[26].mxu1 }
0x22a9   : > { %v3082_v13 = vadd.f32 %v8436_v15, %v3081_v12  ;;  %v7132_v14 = vpop.f32.mrb[27].mxu1 }
0x22ab   : > { %v3085_v17 = vsel %vm902_vm3, %v3082_v13, -inf }
0x22ac   : > { %3086 = vmax.xlane.f32.xlu0 %v3085_v17 }
0x22c2   : > { %2806 = vrot.lane.b32.xlu0 %v6499_v18, %s8133_s23 }
0x22c6   : > { %2999 = vrot.lane.b32.xlu0 %v6504_v19, %s8133_s23 }
0x2339   : > { %v3087_v20 = vpop.xlane.xlu0 %3086 }
0x233a   : > { %v3088_v21 = vsub.f32 %v3082_v13, %v3087_v20 }
0x233c   : > { %v3089_v22 = vmul.f32 1.442695, %v3088_v21 }
0x233d   : > { %v2807_v23 = vpop.permute.xlu0 %2806 }
0x233e   : > { %7906 = vpow2.f32 %v3089_v22  ;;  %2809 = vst.msk [vmem:[#allocation2] sm:$0x3] %vm611_vm4, %v2807_v23 }
0x2341   : > { %v3000_v24 = vpop.permute.xlu0 %2999 }
0x2342   : > { %3002 = vst.msk [vmem:[#allocation2 + $0x2] sm:$0x3] %vm611_vm4, %v3000_v24 }
0x2345   : > { %v3417_v62 = vld [vmem:[#allocation2] sm:$0x3] (!%p6512_p13) }
0x2346   : > { %3419 = vst.msk [vmem:[#allocation8] sm:$0x3] (!%p6512_p13), %vm611_vm4, %v3417_v62 }
0x2348   : > { %v7907_v25 = vpop.eup %7906 }
0x2349   : > { %v3091_v26 = vsel %vm902_vm3, %v7907_v25, 0.0  ;;  %v3418_v63 = vld [vmem:[#allocation2 + $0x2] sm:$0x3] (!%p6512_p13) }
0x234a   : > { %3092 = vadd.xlane.f32.xlu1 %v3091_v26  ;;  %3420 = vst.msk [vmem:[#allocation8 + $0x2] sm:$0x3] (!%p6512_p13), %vm611_vm4, %v3418_v63 }
0x235b   : > { %2813 = vrot.lane.b32.xlu1 %v6500_v27, %s9290_s20 }
0x235f   : > { %3006 = vrot.lane.b32.xlu1 %v6505_v29, %s9290_s20 }
0x23d7   : > { %v3093_v30 = vpop.xlane.xlu1 %3092 }
0x23d8   : > { %7908 = vrcp.f32 %v3093_v30 }
0x23db   : > { %v2814_v28 = vpop.permute.xlu1 %2813 }
0x23dc   : > { %2816 = vst.msk [vmem:[#allocation3] sm:$0x3] %vm611_vm4, %v2814_v28 }
0x23df   : > { %v3007_v35 = vpop.permute.xlu1 %3006 }
0x23e0   : > { %3009 = vst.msk [vmem:[#allocation3 + $0x2] sm:$0x3] %vm611_vm4, %v3007_v35 }
0x23e2   : > { %v7909_v37 = vpop.eup %7908 }
0x23e3   : > { %v3095_v38 = vmul.f32 %v7909_v37, %v7907_v25 }
0x23e5   : > { %v3103_v42 = vrot.slane %v3095_v38, %v8464_v45 }
0x23e7   : > { %v3111_v43 = vrot.slane %v3103_v42, %v8464_v45  ;;  %v3104_v31 = vcombine.high %v3103_v42, %v3103_v42 }
0x23e9   : > { %7136 = vmatmul.mubr.msk.f32.vlgmr.msra.gmra.mrb[28].mxu0 %vm937_vm5, %v3111_v43  ;;  %v3118_v44 = vrot.slane %v3104_v31, %v8464_v45 }
0x23ea   : > { %7603 = vmatpush3.bf16.msra.mxu0 %v8479_v54  ;;  %7151 = vmatprep.mubr.msk.f32.mxu0 %vm8130_vm1, %v8131_v10 }
0x23eb   : > { %7141 = vmatmul.mubr.msk.f32.vlgmr.msra.gmra.mrb[28].mxu1 %vm937_vm5, %v3118_v44  ;;  %7604 = vmatprep.subr.bf16.mxu0 %v8129_v7 }
0x23ec   : > { %7609 = vmatpush3.bf16.msra.mxu1 %v8482_v57  ;;  %7162 = vmatprep.mubr.msk.f32.mxu1 %vm8130_vm1, %v8131_v10 }
0x23ed   : > { %7610 = vmatprep.subr.bf16.mxu1 %v8129_v7 }
0x23ee   : > { %7606 = vmatpush3.bf16.msra.mxu0 %v8512_v0 }
0x23f0   : > { %7612 = vmatpush3.bf16.msra.mxu1 %v8498_v61 }
0x23f3   : > { %7163 = vmatmul.mubr.msk.f32.vlgmr.msra.gmra.mrb[30].mxu1 %vm502_vm2, %v3012_v9 }
0x24bc   : > { %v3187_v46 = vpop.f32.mrb[28].mxu0 }
0x24bd   : > { %v7137_v48 = vpop.f32.mrb[29].mxu0 }
0x24be   : > { %v3259_v50 = vpop.f32.mrb[28].mxu1 }
0x24bf   : > { %v3265_v41 = vrot.slane %v3259_v50, 7  ;;  %v7142_v51 = vpop.f32.mrb[29].mxu1 }
0x24c1   : > { %v3266_v52 = vsel %vm1085_vm6, %v3265_v41, %v3187_v46 }
0x24c2   : > { %7152 = vmatmul.mubr.msk.f32.vlgmr.msra.gmra.mrb[30].mxu0 %vm502_vm2, %v3266_v52 }
0x24c6   : > { %v3405_v53 = vpop.f32.mrb[30].mxu1 }
0x24c7   : > { %v7164_v55 = vpop.f32.mrb[31].mxu1 }
0x2595   : > { %v3335_v47 = vpop.f32.mrb[30].mxu0 }
0x2596   : > { %v3406_v56 = vadd.f32 %v3405_v53, %v3335_v47  ;;  %v7153_v58 = vpop.f32.mrb[31].mxu0 }
0x2598   : > { %v3409_v59 = vadd.f32 %v8520_v16, %v3406_v56 }
0x259a   : > { %7910 = vtanh.f32 %v3409_v59 }
0x259f   : > { %3416 = sbr.rel (%p6512_p13) target bundleno = 9638 (0x25a6), region = 92 }
0x25a4   : > { %v7911_v60 = vpop.eup %7910 }
0x25a5   : > { %6511 = vst.msk [vmem:[%s8308_s24 + $0x6] sm:$0x3] %vm611_vm4, %v7911_v60 }
0x25a6 PF: > { %s3421_s21 = sadd.s32 4, %s8297_s14  ;;  %7613 = vmatprep.subr.bf16.mxu0 %v8129_v7  ;;  %7173 = vmatprep.mubr.msk.f32.mxu0 %vm8130_vm1, %v8131_v10  ;;  %v3422_v1 = vld [vmem:[#allocation2] sm:$0x3]  ;;  %v6513_v2 = vld [vmem:[%s8306_s17 + $0x8] sm:$0x3]  ;;  %s9291_s30 = smov 96  }
0x25a7   : > { %7615 = vmatpush3.bf16.msra.mxu0 %v8334_v8  ;;  %7619 = vmatprep.subr.bf16.mxu1 %v8129_v7  ;;  %v3423_v13 = vld [vmem:[#allocation3] sm:$0x3]  ;;  %v3542_v26 = vld [vmem:[#allocation2 + $0x2] sm:$0x3]  ;;  %v3543_v28 = vld [vmem:[#allocation3 + $0x2] sm:$0x3] }
0x25a8   : > { %7616 = vmatprep.subr.bf16.mxu0 %v8129_v7  ;;  %7621 = vmatpush3.bf16.msra.mxu1 %v8363_v32  ;;  %p6529_p1 = scmp.ne.s32.totalorder %s3421_s21, 8 }
0x25a9   : > { %7622 = vmatprep.subr.bf16.mxu1 %v8129_v7  ;;  %7184 = vmatprep.mubr.msk.f32.mxu1 %vm8130_vm1, %v8131_v10 }
0x25ab   : > { %7618 = vmatpush3.bf16.msra.mxu0 %v8345_v11 }
0x25ac   : > { %7625 = vmatprep.subr.bf16.mxu0 %v8129_v7  ;;  %7624 = vmatpush3.bf16.msra.mxu1 %v8377_v39 }
0x25ad   : > { %7631 = vmatprep.subr.bf16.mxu1 %v8129_v7 }
0x25ae   : > { %7174 = vmatmul.mubr.msk.f32.vlgmr.msra.gmra.mrb[32].mxu0 %vm502_vm2, %v3422_v1 }
0x25af   : > { %7627 = vmatpush3.bf16.msra.mxu0 %v8368_v36  ;;  %7195 = vmatprep.mubr.msk.f32.mxu0 %vm8130_vm1, %v8131_v10 }
0x25b0   : > { %7628 = vmatprep.subr.bf16.mxu0 %v8129_v7  ;;  %7185 = vmatmul.mubr.msk.f32.vlgmr.msra.gmra.mrb[32].mxu1 %vm502_vm2, %v3542_v26 }
0x25b1   : > { %7633 = vmatpush3.bf16.msra.mxu1 %v8414_v4  ;;  %7206 = vmatprep.mubr.msk.f32.mxu1 %vm8130_vm1, %v8131_v10 }
0x25b2   : > { %7634 = vmatprep.subr.bf16.mxu1 %v8129_v7 }
0x25b3   : > { %7630 = vmatpush3.bf16.msra.mxu0 %v8381_v40 }
0x25b4   : > { %7209 = vmatprep.subr.mxu0 %v8131_v10 }
0x25b5   : > { %7636 = vmatpush3.bf16.msra.mxu1 %v8420_v6 }
0x25b6   : > { %7214 = vmatprep.subr.mxu1 %v8131_v10 }
0x2681   : > { %v3495_v3 = vpop.f32.mrb[32].mxu0 }
0x2682   : > { %v3499_v5 = vadd.f32 %v6513_v2, %v3495_v3  ;;  %v7175_v9 = vpop.f32.mrb[33].mxu0 }
0x2683   : > { %v3613_v35 = vpop.f32.mrb[32].mxu1 }
0x2684   : > { %7912 = vtanh.f32 %v3499_v5  ;;  %v6515_v14 = vmul.f32 -1.442695, %v3499_v5  ;;  %v7186_v37 = vpop.f32.mrb[33].mxu1 }
0x2686   : > { %7914 = vpow2.f32 %v6515_v14 }
0x268e   : > { %v7913_v12 = vpop.eup %7912 }
0x268f   : > { %3513 = vrot.lane.b32.xlu0 %v7913_v12, %s8132_s0 }
0x2690   : > { %v7915_v17 = vpop.eup %7914 }
0x2691   : > { %v3503_v18 = vadd.f32 1.0, %v7915_v17 }
0x2693   : > { %3508 = vrot.lane.b32.xlu0 %v3423_v13, %s8133_s23  ;;  %7916 = vrcp.f32 %v3503_v18 }
0x269d   : > { %v7917_v19 = vpop.eup %7916 }
0x2701   : > { %v3514_v20 = vpop.permute.xlu0 %3513 }
0x2702   : > { %v3516_v21 = vmul.f32 %v7917_v19, %v3514_v20 }
0x2704   : > { %3518 = vrot.lane.b32.xlu1 %v3516_v21, %s8133_s23 }
0x2705   : > { %v3509_v22 = vpop.permute.xlu0 %3508 }
0x2706   : > { %v3511_v23 = vmul.f32 %v7917_v19, %v3509_v22 }
0x2776   : > { %v3519_v24 = vpop.permute.xlu1 %3518 }
0x2777   : > { %v8827_v25 = vadd.f32 %v3519_v24, %v3511_v23 }
0x2779   : > { %7918 = vtanh.f32 %v8827_v25  ;;  %v6517_v22 = vclamps-f32 %v8827_v25, 50.0 }
0x2783   : > { %v7919_v27 = vpop.eup %7918 }
0x2784   : > { %3524 = vrot.lane.b32.xlu1 %v7919_v27, %s8132_s0 }
0x27f6   : > { %v3525_v29 = vpop.permute.xlu1 %3524 }
0x27f7   : > { %v3527_v30 = vmul.f32 %v7917_v19, %v3525_v29 }
0x27f9   : > { %3618 = vrot.lane.b32.xlu0 %v3527_v30, %s8133_s23  ;;  %v6516_v9 = vclamps-f32 %v3527_v30, 50.0 }
0x27fd   : > { %3701 = vrot.lane.b32.xlu0 %v3543_v28, %s8133_s23 }
0x286b   : > { %v3619_v38 = vpop.permute.xlu0 %3618 }
0x286c   : > { %7196 = vmatmul.mubr.msk.f32.vlgmr.msra.gmra.mrb[34].mxu0 %vm502_vm2, %v3619_v38 }
0x286d   : > { %7210 = vmatpush3.msra.mxu0 %v8456_v34  ;;  %7211 = vmatprep.mubr.msk.f32.mxu0 %vm8130_vm1, %v8131_v10 }
0x286e   : > { %7637 = vmatprep.subr.bf16.mxu0 %v8129_v7 }
0x286f   : > { %v3702_v55 = vpop.permute.xlu0 %3701 }
0x293f   : > { %v3688_v42 = vpop.f32.mrb[34].mxu0 }
0x2940   : > { %v3689_v43 = vadd.f32 %v3688_v42, %v3613_v35  ;;  %v7197_v31 = vpop.f32.mrb[35].mxu0 }
0x2942   : > { %v3692_v44 = vadd.f32 %v8400_v49, %v3689_v43 }
0x2944   : > { %7920 = vtanh.f32 %v3692_v44  ;;  %v6520_v48 = vmul.f32 -1.442695, %v3692_v44 }
0x2946   : > { %7922 = vpow2.f32 %v6520_v48 }
0x294e   : > { %v7921_v46 = vpop.eup %7920 }
0x294f   : > { %3706 = vrot.lane.b32.xlu1 %v7921_v46, %s8132_s0 }
0x2950   : > { %v7923_v50 = vpop.eup %7922 }
0x2951   : > { %v3696_v41 = vadd.f32 1.0, %v7923_v50 }
0x2953   : > { %7924 = vrcp.f32 %v3696_v41 }
0x295d   : > { %v7925_v51 = vpop.eup %7924 }
0x295e   : > { %v3704_v47 = vmul.f32 %v7925_v51, %v3702_v55 }
0x29c1   : > { %v3707_v52 = vpop.permute.xlu1 %3706 }
0x29c2   : > { %v3709_v53 = vmul.f32 %v7925_v51, %v3707_v52 }
0x29c4   : > { %3711 = vrot.lane.b32.xlu1 %v3709_v53, %s8133_s23 }
0x2a36   : > { %v3712_v56 = vpop.permute.xlu1 %3711 }
0x2a37   : > { %v3714_v58 = vadd.f32 %v3712_v56, %v3704_v47 }
0x2a39   : > { %7926 = vtanh.f32 %v3714_v58  ;;  %v6522_v23 = vclamps-f32 %v3714_v58, 50.0 }
0x2a43   : > { %v7927_v59 = vpop.eup %7926 }
0x2a44   : > { %3717 = vrot.lane.b32.xlu0 %v7927_v59, %s8132_s0 }
0x2ab6   : > { %v3718_v60 = vpop.permute.xlu0 %3717 }
0x2ab7   : > { %v3720_v62 = vmul.f32 %v7925_v51, %v3718_v60 }
0x2ab9   : > { %3736 = vrot.lane.b32.xlu1 %v3720_v62, %s8133_s23  ;;  %v6521_v12 = vclamps-f32 %v3720_v62, 50.0 }
0x2b2b   : > { %v3737_v63 = vpop.permute.xlu1 %3736 }
0x2b2c   : > { %7207 = vmatmul.mubr.msk.f32.vlgmr.msra.gmra.mrb[34].mxu1 %vm502_vm2, %v3737_v63 }
0x2b2d   : > { %7215 = vmatpush3.msra.mxu1 %v8451_v33  ;;  %7216 = vmatprep.mubr.msk.f32.mxu1 %vm8130_vm1, %v8131_v10 }
0x2b2e   : > { %7643 = vmatprep.subr.bf16.mxu1 %v8129_v7 }
0x2bff   : > { %v3806_v1 = vpop.f32.mrb[34].mxu1 }
0x2c00   : > { %v3807_v2 = vadd.f32 %v8436_v15, %v3806_v1  ;;  %v7208_v3 = vpop.f32.mrb[35].mxu1 }
0x2c02   : > { %v3810_v5 = vsel %vm902_vm3, %v3807_v2, -inf }
0x2c03   : > { %3811 = vmax.xlane.f32.xlu0 %v3810_v5 }
0x2c19   : > { %3531 = vrot.lane.b32.xlu0 %v6516_v9, %s8133_s23 }
0x2c1d   : > { %3724 = vrot.lane.b32.xlu0 %v6521_v12, %s8133_s23 }
0x2c90   : > { %v3812_v13 = vpop.xlane.xlu0 %3811 }
0x2c91   : > { %v3813_v14 = vsub.f32 %v3807_v2, %v3812_v13 }
0x2c93   : > { %v3814_v17 = vmul.f32 1.442695, %v3813_v14 }
0x2c94   : > { %v3532_v18 = vpop.permute.xlu0 %3531 }
0x2c95   : > { %7928 = vpow2.f32 %v3814_v17  ;;  %3534 = vst.msk [vmem:[#allocation2] sm:$0x3] %vm611_vm4, %v3532_v18 }
0x2c98   : > { %v3725_v19 = vpop.permute.xlu0 %3724 }
0x2c99   : > { %3727 = vst.msk [vmem:[#allocation2 + $0x2] sm:$0x3] %vm611_vm4, %v3725_v19 }
0x2c9c   : > { %v4142_v47 = vld [vmem:[#allocation2] sm:$0x3] (!%p6529_p1) }
0x2c9d   : > { %4144 = vst.msk [vmem:[#allocation8] sm:$0x3] (!%p6529_p1), %vm611_vm4, %v4142_v47 }
0x2c9f   : > { %v7929_v20 = vpop.eup %7928 }
0x2ca0   : > { %v3816_v21 = vsel %vm902_vm3, %v7929_v20, 0.0  ;;  %v4143_v56 = vld [vmem:[#allocation2 + $0x2] sm:$0x3] (!%p6529_p1) }
0x2ca1   : > { %3817 = vadd.xlane.f32.xlu1 %v3816_v21  ;;  %4145 = vst.msk [vmem:[#allocation8 + $0x2] sm:$0x3] (!%p6529_p1), %vm611_vm4, %v4143_v56 }
0x2cb2   : > { %3538 = vrot.lane.b32.xlu1 %v6517_v22, %s9291_s30 }
0x2cb6   : > { %3731 = vrot.lane.b32.xlu1 %v6522_v23, %s9291_s30 }
0x2d2e   : > { %v3818_v24 = vpop.xlane.xlu1 %3817 }
0x2d2f   : > { %7930 = vrcp.f32 %v3818_v24 }
0x2d32   : > { %v3539_v26 = vpop.permute.xlu1 %3538 }
0x2d33   : > { %3541 = vst.msk [vmem:[#allocation3] sm:$0x3] %vm611_vm4, %v3539_v26 }
0x2d36   : > { %v3732_v27 = vpop.permute.xlu1 %3731 }
0x2d37   : > { %3734 = vst.msk [vmem:[#allocation3 + $0x2] sm:$0x3] %vm611_vm4, %v3732_v27 }
0x2d39   : > { %v7931_v29 = vpop.eup %7930 }
0x2d3a   : > { %v3820_v30 = vmul.f32 %v7931_v29, %v7929_v20 }
0x2d3c   : > { %v3828_v28 = vrot.slane %v3820_v30, %v8464_v45 }
0x2d3e   : > { %v3836_v35 = vrot.slane %v3828_v28, %v8464_v45  ;;  %v3829_v25 = vcombine.high %v3828_v28, %v3828_v28 }
0x2d40   : > { %7212 = vmatmul.mubr.msk.f32.vlgmr.msra.gmra.mrb[36].mxu0 %vm937_vm5, %v3836_v35  ;;  %v3843_v37 = vrot.slane %v3829_v25, %v8464_v45 }
0x2d41   : > { %7639 = vmatpush3.bf16.msra.mxu0 %v8479_v54  ;;  %7227 = vmatprep.mubr.msk.f32.mxu0 %vm8130_vm1, %v8131_v10 }
0x2d42   : > { %7217 = vmatmul.mubr.msk.f32.vlgmr.msra.gmra.mrb[36].mxu1 %vm937_vm5, %v3843_v37  ;;  %7640 = vmatprep.subr.bf16.mxu0 %v8129_v7 }
0x2d43   : > { %7645 = vmatpush3.bf16.msra.mxu1 %v8482_v57  ;;  %7238 = vmatprep.mubr.msk.f32.mxu1 %vm8130_vm1, %v8131_v10 }
0x2d44   : > { %7646 = vmatprep.subr.bf16.mxu1 %v8129_v7 }
0x2d45   : > { %7642 = vmatpush3.bf16.msra.mxu0 %v8512_v0 }
0x2d47   : > { %7648 = vmatpush3.bf16.msra.mxu1 %v8498_v61 }
0x2d4a   : > { %7239 = vmatmul.mubr.msk.f32.vlgmr.msra.gmra.mrb[38].mxu1 %vm502_vm2, %v3737_v63 }
0x2e13   : > { %v3912_v38 = vpop.f32.mrb[36].mxu0 }
0x2e14   : > { %v7213_v42 = vpop.f32.mrb[37].mxu0 }
0x2e15   : > { %v3984_v43 = vpop.f32.mrb[36].mxu1 }
0x2e16   : > { %v3990_v31 = vrot.slane %v3984_v43, 7  ;;  %v7218_v44 = vpop.f32.mrb[37].mxu1 }
0x2e18   : > { %v3991_v46 = vsel %vm1085_vm6, %v3990_v31, %v3912_v38 }
0x2e19   : > { %7228 = vmatmul.mubr.msk.f32.vlgmr.msra.gmra.mrb[38].mxu0 %vm502_vm2, %v3991_v46 }
0x2e1d   : > { %v4130_v48 = vpop.f32.mrb[38].mxu1 }
0x2e1e   : > { %v7240_v50 = vpop.f32.mrb[39].mxu1 }
0x2eec   : > { %v4060_v41 = vpop.f32.mrb[38].mxu0 }
0x2eed   : > { %v4131_v51 = vadd.f32 %v4130_v48, %v4060_v41  ;;  %v7229_v52 = vpop.f32.mrb[39].mxu0 }
0x2eef   : > { %v4134_v53 = vadd.f32 %v8520_v16, %v4131_v51 }
0x2ef1   : > { %7932 = vtanh.f32 %v4134_v53 }
0x2ef6   : > { %4141 = sbr.rel (%p6529_p1) target bundleno = 12029 (0x2efd), region = 96 }
0x2efb   : > { %v7933_v55 = vpop.eup %7932 }
0x2efc   : > { %6528 = vst.msk [vmem:[%s8308_s24 + $0x8] sm:$0x3] %vm611_vm4, %v7933_v55 }
0x2efd PF: > { %s4146_s16 = sadd.s32 5, %s8297_s14  ;;  %7649 = vmatprep.subr.bf16.mxu0 %v8129_v7  ;;  %7249 = vmatprep.mubr.msk.f32.mxu0 %vm8130_vm1, %v8131_v10  ;;  %v4147_v58 = vld [vmem:[#allocation2] sm:$0x3]  ;;  %v6530_v59 = vld [vmem:[%s8306_s17 + $0xa] sm:$0x3]  ;;  %s9292_s27 = smov 96  }
0x2efe   : > { %7651 = vmatpush3.bf16.msra.mxu0 %v8334_v8  ;;  %7655 = vmatprep.subr.bf16.mxu1 %v8129_v7  ;;  %v4148_v2 = vld [vmem:[#allocation3] sm:$0x3]  ;;  %v4267_v21 = vld [vmem:[#allocation2 + $0x2] sm:$0x3]  ;;  %v4268_v26 = vld [vmem:[#allocation3 + $0x2] sm:$0x3] }
0x2eff   : > { %7652 = vmatprep.subr.bf16.mxu0 %v8129_v7  ;;  %7657 = vmatpush3.bf16.msra.mxu1 %v8363_v32  ;;  %p6546_p4 = scmp.ne.s32.totalorder %s4146_s16, 8 }
0x2f00   : > { %7658 = vmatprep.subr.bf16.mxu1 %v8129_v7  ;;  %7260 = vmatprep.mubr.msk.f32.mxu1 %vm8130_vm1, %v8131_v10 }
0x2f02   : > { %7654 = vmatpush3.bf16.msra.mxu0 %v8345_v11 }
0x2f03   : > { %7661 = vmatprep.subr.bf16.mxu0 %v8129_v7  ;;  %7660 = vmatpush3.bf16.msra.mxu1 %v8377_v39 }
0x2f04   : > { %7667 = vmatprep.subr.bf16.mxu1 %v8129_v7 }
0x2f05   : > { %7250 = vmatmul.mubr.msk.f32.vlgmr.msra.gmra.mrb[40].mxu0 %vm502_vm2, %v4147_v58 }
0x2f06   : > { %7663 = vmatpush3.bf16.msra.mxu0 %v8368_v36  ;;  %7271 = vmatprep.mubr.msk.f32.mxu0 %vm8130_vm1, %v8131_v10 }
0x2f07   : > { %7664 = vmatprep.subr.bf16.mxu0 %v8129_v7  ;;  %7261 = vmatmul.mubr.msk.f32.vlgmr.msra.gmra.mrb[40].mxu1 %vm502_vm2, %v4267_v21 }
0x2f08   : > { %7669 = vmatpush3.bf16.msra.mxu1 %v8414_v4  ;;  %7282 = vmatprep.mubr.msk.f32.mxu1 %vm8130_vm1, %v8131_v10 }
0x2f09   : > { %7670 = vmatprep.subr.bf16.mxu1 %v8129_v7 }
0x2f0a   : > { %7666 = vmatpush3.bf16.msra.mxu0 %v8381_v40 }
0x2f0b   : > { %7285 = vmatprep.subr.mxu0 %v8131_v10 }
0x2f0c   : > { %7672 = vmatpush3.bf16.msra.mxu1 %v8420_v6 }
0x2f0d   : > { %7290 = vmatprep.subr.mxu1 %v8131_v10 }
0x2fd8   : > { %v4220_v60 = vpop.f32.mrb[40].mxu0 }
0x2fd9   : > { %v4224_v62 = vadd.f32 %v6530_v59, %v4220_v60  ;;  %v7251_v63 = vpop.f32.mrb[41].mxu0 }
0x2fda   : > { %v4338_v27 = vpop.f32.mrb[40].mxu1 }
0x2fdb   : > { %7934 = vtanh.f32 %v4224_v62  ;;  %v6532_v3 = vmul.f32 -1.442695, %v4224_v62  ;;  %v7262_v29 = vpop.f32.mrb[41].mxu1 }
0x2fdd   : > { %7936 = vpow2.f32 %v6532_v3 }
0x2fe5   : > { %v7935_v1 = vpop.eup %7934 }
0x2fe6   : > { %4238 = vrot.lane.b32.xlu0 %v7935_v1, %s8132_s0 }
0x2fe7   : > { %v7937_v5 = vpop.eup %7936 }
0x2fe8   : > { %v4228_v9 = vadd.f32 1.0, %v7937_v5 }
0x2fea   : > { %4233 = vrot.lane.b32.xlu0 %v4148_v2, %s8133_s23  ;;  %7938 = vrcp.f32 %v4228_v9 }
0x2ff4   : > { %v7939_v12 = vpop.eup %7938 }
0x3058   : > { %v4239_v13 = vpop.permute.xlu0 %4238 }
0x3059   : > { %v4241_v14 = vmul.f32 %v7939_v12, %v4239_v13 }
0x305b   : > { %4243 = vrot.lane.b32.xlu1 %v4241_v14, %s8133_s23 }
0x305c   : > { %v4234_v17 = vpop.permute.xlu0 %4233 }
0x305d   : > { %v4236_v18 = vmul.f32 %v7939_v12, %v4234_v17 }
0x30cd   : > { %v4244_v19 = vpop.permute.xlu1 %4243 }
0x30ce   : > { %v8918_v20 = vadd.f32 %v4244_v19, %v4236_v18 }
0x30d0   : > { %7940 = vtanh.f32 %v8918_v20  ;;  %v6534_v17 = vclamps-f32 %v8918_v20, 50.0 }
0x30da   : > { %v7941_v22 = vpop.eup %7940 }
0x30db   : > { %4249 = vrot.lane.b32.xlu1 %v7941_v22, %s8132_s0 }
0x314d   : > { %v4250_v23 = vpop.permute.xlu1 %4249 }
0x314e   : > { %v4252_v24 = vmul.f32 %v7939_v12, %v4250_v23 }
0x3150   : > { %4343 = vrot.lane.b32.xlu0 %v4252_v24, %s8133_s23  ;;  %v6533_v63 = vclamps-f32 %v4252_v24, 50.0 }
0x3154   : > { %4426 = vrot.lane.b32.xlu0 %v4268_v26, %s8133_s23 }
0x31c2   : > { %v4344_v30 = vpop.permute.xlu0 %4343 }
0x31c3   : > { %7272 = vmatmul.mubr.msk.f32.vlgmr.msra.gmra.mrb[42].mxu0 %vm502_vm2, %v4344_v30 }
0x31c4   : > { %7286 = vmatpush3.msra.mxu0 %v8456_v34  ;;  %7287 = vmatprep.mubr.msk.f32.mxu0 %vm8130_vm1, %v8131_v10 }
0x31c5   : > { %7673 = vmatprep.subr.bf16.mxu0 %v8129_v7 }
0x31c6   : > { %v4427_v50 = vpop.permute.xlu0 %4426 }
0x3296   : > { %v4413_v28 = vpop.f32.mrb[42].mxu0 }
0x3297   : > { %v4414_v35 = vadd.f32 %v4413_v28, %v4338_v27  ;;  %v7273_v25 = vpop.f32.mrb[43].mxu0 }
0x3299   : > { %v4417_v37 = vadd.f32 %v8400_v49, %v4414_v35 }
0x329b   : > { %7942 = vtanh.f32 %v4417_v37  ;;  %v6537_v42 = vmul.f32 -1.442695, %v4417_v37 }
0x329d   : > { %7944 = vpow2.f32 %v6537_v42 }
0x32a5   : > { %v7943_v38 = vpop.eup %7942 }
0x32a6   : > { %4431 = vrot.lane.b32.xlu1 %v7943_v38, %s8132_s0 }
0x32a7   : > { %v7945_v43 = vpop.eup %7944 }
0x32a8   : > { %v4421_v31 = vadd.f32 1.0, %v7945_v43 }
0x32aa   : > { %7946 = vrcp.f32 %v4421_v31 }
0x32b4   : > { %v7947_v44 = vpop.eup %7946 }
0x32b5   : > { %v4429_v41 = vmul.f32 %v7947_v44, %v4427_v50 }
0x3318   : > { %v4432_v46 = vpop.permute.xlu1 %4431 }
0x3319   : > { %v4434_v48 = vmul.f32 %v7947_v44, %v4432_v46 }
0x331b   : > { %4436 = vrot.lane.b32.xlu1 %v4434_v48, %s8133_s23 }
0x338d   : > { %v4437_v51 = vpop.permute.xlu1 %4436 }
0x338e   : > { %v4439_v52 = vadd.f32 %v4437_v51, %v4429_v41 }
0x3390   : > { %7948 = vtanh.f32 %v4439_v52  ;;  %v6539_v18 = vclamps-f32 %v4439_v52, 50.0 }
0x339a   : > { %v7949_v53 = vpop.eup %7948 }
0x339b   : > { %4442 = vrot.lane.b32.xlu0 %v7949_v53, %s8132_s0 }
0x340d   : > { %v4443_v55 = vpop.permute.xlu0 %4442 }
0x340e   : > { %v4445_v47 = vmul.f32 %v7947_v44, %v4443_v55 }
0x3410   : > { %4461 = vrot.lane.b32.xlu1 %v4445_v47, %s8133_s23  ;;  %v6538_v1 = vclamps-f32 %v4445_v47, 50.0 }
0x3482   : > { %v4462_v56 = vpop.permute.xlu1 %4461 }
0x3483   : > { %7283 = vmatmul.mubr.msk.f32.vlgmr.msra.gmra.mrb[42].mxu1 %vm502_vm2, %v4462_v56 }
0x3484   : > { %7291 = vmatpush3.msra.mxu1 %v8451_v33  ;;  %7292 = vmatprep.mubr.msk.f32.mxu1 %vm8130_vm1, %v8131_v10 }
0x3485   : > { %7679 = vmatprep.subr.bf16.mxu1 %v8129_v7 }
0x3556   : > { %v4531_v58 = vpop.f32.mrb[42].mxu1 }
0x3557   : > { %v4532_v59 = vadd.f32 %v8436_v15, %v4531_v58  ;;  %v7284_v60 = vpop.f32.mrb[43].mxu1 }
0x3559   : > { %v4535_v62 = vsel %vm902_vm3, %v4532_v59, -inf }
0x355a   : > { %4536 = vmax.xlane.f32.xlu0 %v4535_v62 }
0x3570   : > { %4256 = vrot.lane.b32.xlu0 %v6533_v63, %s8133_s23 }
0x3574   : > { %4449 = vrot.lane.b32.xlu0 %v6538_v1, %s8133_s23 }
0x35e7   : > { %v4537_v2 = vpop.xlane.xlu0 %4536 }
0x35e8   : > { %v4538_v3 = vsub.f32 %v4532_v59, %v4537_v2 }
0x35ea   : > { %v4539_v5 = vmul.f32 1.442695, %v4538_v3 }
0x35eb   : > { %v4257_v9 = vpop.permute.xlu0 %4256 }
0x35ec   : > { %7950 = vpow2.f32 %v4539_v5  ;;  %4259 = vst.msk [vmem:[#allocation2] sm:$0x3] %vm611_vm4, %v4257_v9 }
0x35ef   : > { %v4450_v12 = vpop.permute.xlu0 %4449 }
0x35f0   : > { %4452 = vst.msk [vmem:[#allocation2 + $0x2] sm:$0x3] %vm611_vm4, %v4450_v12 }
0x35f3   : > { %v4867_v41 = vld [vmem:[#allocation2] sm:$0x3] (!%p6546_p4) }
0x35f4   : > { %4869 = vst.msk [vmem:[#allocation8] sm:$0x3] (!%p6546_p4), %vm611_vm4, %v4867_v41 }
0x35f6   : > { %v7951_v13 = vpop.eup %7950 }
0x35f7   : > { %v4541_v14 = vsel %vm902_vm3, %v7951_v13, 0.0  ;;  %v4868_v51 = vld [vmem:[#allocation2 + $0x2] sm:$0x3] (!%p6546_p4) }
0x35f8   : > { %4542 = vadd.xlane.f32.xlu1 %v4541_v14  ;;  %4870 = vst.msk [vmem:[#allocation8 + $0x2] sm:$0x3] (!%p6546_p4), %vm611_vm4, %v4868_v51 }
0x3609   : > { %4263 = vrot.lane.b32.xlu1 %v6534_v17, %s9292_s27 }
0x360d   : > { %4456 = vrot.lane.b32.xlu1 %v6539_v18, %s9292_s27 }
0x3685   : > { %v4543_v19 = vpop.xlane.xlu1 %4542 }
0x3686   : > { %7952 = vrcp.f32 %v4543_v19 }
0x3689   : > { %v4264_v21 = vpop.permute.xlu1 %4263 }
0x368a   : > { %4266 = vst.msk [vmem:[#allocation3] sm:$0x3] %vm611_vm4, %v4264_v21 }
0x368d   : > { %v4457_v22 = vpop.permute.xlu1 %4456 }
0x368e   : > { %4459 = vst.msk [vmem:[#allocation3 + $0x2] sm:$0x3] %vm611_vm4, %v4457_v22 }
0x3690   : > { %v7953_v23 = vpop.eup %7952 }
0x3691   : > { %v4545_v24 = vmul.f32 %v7953_v23, %v7951_v13 }
0x3693   : > { %v4553_v26 = vrot.slane %v4545_v24, %v8464_v45 }
0x3695   : > { %v4561_v27 = vrot.slane %v4553_v26, %v8464_v45  ;;  %v4554_v20 = vcombine.high %v4553_v26, %v4553_v26 }
0x3697   : > { %7288 = vmatmul.mubr.msk.f32.vlgmr.msra.gmra.mrb[44].mxu0 %vm937_vm5, %v4561_v27  ;;  %v4568_v29 = vrot.slane %v4554_v20, %v8464_v45 }
0x3698   : > { %7675 = vmatpush3.bf16.msra.mxu0 %v8479_v54  ;;  %7303 = vmatprep.mubr.msk.f32.mxu0 %vm8130_vm1, %v8131_v10 }
0x3699   : > { %7293 = vmatmul.mubr.msk.f32.vlgmr.msra.gmra.mrb[44].mxu1 %vm937_vm5, %v4568_v29  ;;  %7676 = vmatprep.subr.bf16.mxu0 %v8129_v7 }
0x369a   : > { %7681 = vmatpush3.bf16.msra.mxu1 %v8482_v57  ;;  %7314 = vmatprep.mubr.msk.f32.mxu1 %vm8130_vm1, %v8131_v10 }
0x369b   : > { %7682 = vmatprep.subr.bf16.mxu1 %v8129_v7 }
0x369c   : > { %7678 = vmatpush3.bf16.msra.mxu0 %v8512_v0 }
0x369e   : > { %7684 = vmatpush3.bf16.msra.mxu1 %v8498_v61 }
0x36a1   : > { %7315 = vmatmul.mubr.msk.f32.vlgmr.msra.gmra.mrb[46].mxu1 %vm502_vm2, %v4462_v56 }
0x376a   : > { %v4637_v30 = vpop.f32.mrb[44].mxu0 }
0x376b   : > { %v7289_v28 = vpop.f32.mrb[45].mxu0 }
0x376c   : > { %v4709_v35 = vpop.f32.mrb[44].mxu1 }
0x376d   : > { %v4715_v25 = vrot.slane %v4709_v35, 7  ;;  %v7294_v37 = vpop.f32.mrb[45].mxu1 }
0x376f   : > { %v4716_v38 = vsel %vm1085_vm6, %v4715_v25, %v4637_v30 }
0x3770   : > { %7304 = vmatmul.mubr.msk.f32.vlgmr.msra.gmra.mrb[46].mxu0 %vm502_vm2, %v4716_v38 }
0x3774   : > { %v4855_v42 = vpop.f32.mrb[46].mxu1 }
0x3775   : > { %v7316_v43 = vpop.f32.mrb[47].mxu1 }
0x3843   : > { %v4785_v31 = vpop.f32.mrb[46].mxu0 }
0x3844   : > { %v4856_v44 = vadd.f32 %v4855_v42, %v4785_v31  ;;  %v7305_v46 = vpop.f32.mrb[47].mxu0 }
0x3846   : > { %v4859_v48 = vadd.f32 %v8520_v16, %v4856_v44 }
0x3848   : > { %7954 = vtanh.f32 %v4859_v48 }
0x384d   : > { %4866 = sbr.rel (%p6546_p4) target bundleno = 14420 (0x3854), region = 100 }
0x3852   : > { %v7955_v50 = vpop.eup %7954 }
0x3853   : > { %6545 = vst.msk [vmem:[%s8308_s24 + $0xa] sm:$0x3] %vm611_vm4, %v7955_v50 }
0x3854 PF: > { %s4871_s6 = sadd.s32 6, %s8297_s14  ;;  %7685 = vmatprep.subr.bf16.mxu0 %v8129_v7  ;;  %7325 = vmatprep.mubr.msk.f32.mxu0 %vm8130_vm1, %v8131_v10  ;;  %v4872_v52 = vld [vmem:[#allocation2] sm:$0x3]  ;;  %v6547_v53 = vld [vmem:[%s8306_s17 + $0xc] sm:$0x3]  ;;  %s9293_s22 = smov 96  }
0x3855   : > { %7687 = vmatpush3.bf16.msra.mxu0 %v8334_v8  ;;  %7691 = vmatprep.subr.bf16.mxu1 %v8129_v7  ;;  %v4873_v59 = vld [vmem:[#allocation3] sm:$0x3]  ;;  %v4992_v14 = vld [vmem:[#allocation2 + $0x2] sm:$0x3]  ;;  %v4993_v21 = vld [vmem:[#allocation3 + $0x2] sm:$0x3] }
0x3856   : > { %7688 = vmatprep.subr.bf16.mxu0 %v8129_v7  ;;  %7693 = vmatpush3.bf16.msra.mxu1 %v8363_v32  ;;  %p6563_p7 = scmp.ne.s32.totalorder %s4871_s6, 8 }
0x3857   : > { %7694 = vmatprep.subr.bf16.mxu1 %v8129_v7  ;;  %7336 = vmatprep.mubr.msk.f32.mxu1 %vm8130_vm1, %v8131_v10 }
0x3859   : > { %7690 = vmatpush3.bf16.msra.mxu0 %v8345_v11 }
0x385a   : > { %7697 = vmatprep.subr.bf16.mxu0 %v8129_v7  ;;  %7696 = vmatpush3.bf16.msra.mxu1 %v8377_v39 }
0x385b   : > { %7703 = vmatprep.subr.bf16.mxu1 %v8129_v7 }
0x385c   : > { %7326 = vmatmul.mubr.msk.f32.vlgmr.msra.gmra.mrb[48].mxu0 %vm502_vm2, %v4872_v52 }
0x385d   : > { %7699 = vmatpush3.bf16.msra.mxu0 %v8368_v36  ;;  %7347 = vmatprep.mubr.msk.f32.mxu0 %vm8130_vm1, %v8131_v10 }
0x385e   : > { %7700 = vmatprep.subr.bf16.mxu0 %v8129_v7  ;;  %7337 = vmatmul.mubr.msk.f32.vlgmr.msra.gmra.mrb[48].mxu1 %vm502_vm2, %v4992_v14 }
0x385f   : > { %7705 = vmatpush3.bf16.msra.mxu1 %v8414_v4  ;;  %7358 = vmatprep.mubr.msk.f32.mxu1 %vm8130_vm1, %v8131_v10 }
0x3860   : > { %7706 = vmatprep.subr.bf16.mxu1 %v8129_v7 }
0x3861   : > { %7702 = vmatpush3.bf16.msra.mxu0 %v8381_v40 }
0x3862   : > { %7361 = vmatprep.subr.mxu0 %v8131_v10 }
0x3863   : > { %7708 = vmatpush3.bf16.msra.mxu1 %v8420_v6 }
0x3864   : > { %7366 = vmatprep.subr.mxu1 %v8131_v10 }
0x392f   : > { %v4945_v55 = vpop.f32.mrb[48].mxu0 }
0x3930   : > { %v4949_v47 = vadd.f32 %v6547_v53, %v4945_v55  ;;  %v7327_v56 = vpop.f32.mrb[49].mxu0 }
0x3931   : > { %v5063_v22 = vpop.f32.mrb[48].mxu1 }
0x3932   : > { %7956 = vtanh.f32 %v4949_v47  ;;  %v6549_v60 = vmul.f32 -1.442695, %v4949_v47  ;;  %v7338_v23 = vpop.f32.mrb[49].mxu1 }
0x3934   : > { %7958 = vpow2.f32 %v6549_v60 }
0x393c   : > { %v7957_v58 = vpop.eup %7956 }
0x393d   : > { %4963 = vrot.lane.b32.xlu0 %v7957_v58, %s8132_s0 }
0x393e   : > { %v7959_v62 = vpop.eup %7958 }
0x393f   : > { %v4953_v63 = vadd.f32 1.0, %v7959_v62 }
0x3941   : > { %4958 = vrot.lane.b32.xlu0 %v4873_v59, %s8133_s23  ;;  %7960 = vrcp.f32 %v4953_v63 }
0x394b   : > { %v7961_v1 = vpop.eup %7960 }
0x39af   : > { %v4964_v2 = vpop.permute.xlu0 %4963 }
0x39b0   : > { %v4966_v3 = vmul.f32 %v7961_v1, %v4964_v2 }
0x39b2   : > { %4968 = vrot.lane.b32.xlu1 %v4966_v3, %s8133_s23 }
0x39b3   : > { %v4959_v5 = vpop.permute.xlu0 %4958 }
0x39b4   : > { %v4961_v9 = vmul.f32 %v7961_v1, %v4959_v5 }
0x3a24   : > { %v4969_v12 = vpop.permute.xlu1 %4968 }
0x3a25   : > { %v9009_v13 = vadd.f32 %v4969_v12, %v4961_v9 }
0x3a27   : > { %7962 = vtanh.f32 %v9009_v13  ;;  %v6551_v5 = vclamps-f32 %v9009_v13, 50.0 }
0x3a31   : > { %v7963_v17 = vpop.eup %7962 }
0x3a32   : > { %4974 = vrot.lane.b32.xlu1 %v7963_v17, %s8132_s0 }
0x3aa4   : > { %v4975_v18 = vpop.permute.xlu1 %4974 }
0x3aa5   : > { %v4977_v19 = vmul.f32 %v7961_v1, %v4975_v18 }
0x3aa7   : > { %5068 = vrot.lane.b32.xlu0 %v4977_v19, %s8133_s23  ;;  %v6550_v56 = vclamps-f32 %v4977_v19, 50.0 }
0x3aab   : > { %5151 = vrot.lane.b32.xlu0 %v4993_v21, %s8133_s23 }
0x3b19   : > { %v5069_v24 = vpop.permute.xlu0 %5068 }
0x3b1a   : > { %7348 = vmatmul.mubr.msk.f32.vlgmr.msra.gmra.mrb[50].mxu0 %vm502_vm2, %v5069_v24 }
0x3b1b   : > { %7362 = vmatpush3.msra.mxu0 %v8456_v34  ;;  %7363 = vmatprep.mubr.msk.f32.mxu0 %vm8130_vm1, %v8131_v10 }
0x3b1c   : > { %7709 = vmatprep.subr.bf16.mxu0 %v8129_v7 }
0x3b1d   : > { %v5152_v43 = vpop.permute.xlu0 %5151 }
0x3bed   : > { %v5138_v26 = vpop.f32.mrb[50].mxu0 }
0x3bee   : > { %v5139_v27 = vadd.f32 %v5138_v26, %v5063_v22  ;;  %v7349_v20 = vpop.f32.mrb[51].mxu0 }
0x3bf0   : > { %v5142_v29 = vadd.f32 %v8400_v49, %v5139_v27 }
0x3bf2   : > { %7964 = vtanh.f32 %v5142_v29  ;;  %v6554_v28 = vmul.f32 -1.442695, %v5142_v29 }
0x3bf4   : > { %7966 = vpow2.f32 %v6554_v28 }
0x3bfc   : > { %v7965_v30 = vpop.eup %7964 }
0x3bfd   : > { %5156 = vrot.lane.b32.xlu1 %v7965_v30, %s8132_s0 }
0x3bfe   : > { %v7967_v35 = vpop.eup %7966 }
0x3bff   : > { %v5146_v25 = vadd.f32 1.0, %v7967_v35 }
0x3c01   : > { %7968 = vrcp.f32 %v5146_v25 }
0x3c0b   : > { %v7969_v37 = vpop.eup %7968 }
0x3c0c   : > { %v5154_v31 = vmul.f32 %v7969_v37, %v5152_v43 }
0x3c6f   : > { %v5157_v38 = vpop.permute.xlu1 %5156 }
0x3c70   : > { %v5159_v42 = vmul.f32 %v7969_v37, %v5157_v38 }
0x3c72   : > { %5161 = vrot.lane.b32.xlu1 %v5159_v42, %s8133_s23 }
0x3ce4   : > { %v5162_v44 = vpop.permute.xlu1 %5161 }
0x3ce5   : > { %v5164_v46 = vadd.f32 %v5162_v44, %v5154_v31 }
0x3ce7   : > { %7970 = vtanh.f32 %v5164_v46  ;;  %v6556_v9 = vclamps-f32 %v5164_v46, 50.0 }
0x3cf1   : > { %v7971_v48 = vpop.eup %7970 }
0x3cf2   : > { %5167 = vrot.lane.b32.xlu0 %v7971_v48, %s8132_s0 }
0x3d64   : > { %v5168_v50 = vpop.permute.xlu0 %5167 }
0x3d65   : > { %v5170_v41 = vmul.f32 %v7969_v37, %v5168_v50 }
0x3d67   : > { %5186 = vrot.lane.b32.xlu1 %v5170_v41, %s8133_s23  ;;  %v6555_v58 = vclamps-f32 %v5170_v41, 50.0 }
0x3dd9   : > { %v5187_v51 = vpop.permute.xlu1 %5186 }
0x3dda   : > { %7359 = vmatmul.mubr.msk.f32.vlgmr.msra.gmra.mrb[50].mxu1 %vm502_vm2, %v5187_v51 }
0x3ddb   : > { %7367 = vmatpush3.msra.mxu1 %v8451_v33  ;;  %7368 = vmatprep.mubr.msk.f32.mxu1 %vm8130_vm1, %v8131_v10 }
0x3ddc   : > { %7715 = vmatprep.subr.bf16.mxu1 %v8129_v7 }
0x3ead   : > { %v5256_v52 = vpop.f32.mrb[50].mxu1 }
0x3eae   : > { %v5257_v53 = vadd.f32 %v8436_v15, %v5256_v52  ;;  %v7360_v55 = vpop.f32.mrb[51].mxu1 }
0x3eb0   : > { %v5260_v47 = vsel %vm902_vm3, %v5257_v53, -inf }
0x3eb1   : > { %5261 = vmax.xlane.f32.xlu0 %v5260_v47 }
0x3ec7   : > { %4981 = vrot.lane.b32.xlu0 %v6550_v56, %s8133_s23 }
0x3ecb   : > { %5174 = vrot.lane.b32.xlu0 %v6555_v58, %s8133_s23 }
0x3f3e   : > { %v5262_v59 = vpop.xlane.xlu0 %5261 }
0x3f3f   : > { %v5263_v60 = vsub.f32 %v5257_v53, %v5262_v59 }
0x3f41   : > { %v5264_v62 = vmul.f32 1.442695, %v5263_v60 }
0x3f42   : > { %v4982_v63 = vpop.permute.xlu0 %4981 }
0x3f43   : > { %7972 = vpow2.f32 %v5264_v62  ;;  %4984 = vst.msk [vmem:[#allocation2] sm:$0x3] %vm611_vm4, %v4982_v63 }
0x3f46   : > { %v5175_v1 = vpop.permute.xlu0 %5174 }
0x3f47   : > { %5177 = vst.msk [vmem:[#allocation2 + $0x2] sm:$0x3] %vm611_vm4, %v5175_v1 }
0x3f4a   : > { %v5592_v31 = vld [vmem:[#allocation2] sm:$0x3] (!%p6563_p7) }
0x3f4b   : > { %5594 = vst.msk [vmem:[#allocation8] sm:$0x3] (!%p6563_p7), %vm611_vm4, %v5592_v31 }
0x3f4d   : > { %v7973_v2 = vpop.eup %7972 }
0x3f4e   : > { %v5266_v3 = vsel %vm902_vm3, %v7973_v2, 0.0  ;;  %v5593_v44 = vld [vmem:[#allocation2 + $0x2] sm:$0x3] (!%p6563_p7) }
0x3f4f   : > { %5267 = vadd.xlane.f32.xlu1 %v5266_v3  ;;  %5595 = vst.msk [vmem:[#allocation8 + $0x2] sm:$0x3] (!%p6563_p7), %vm611_vm4, %v5593_v44 }
0x3f60   : > { %4988 = vrot.lane.b32.xlu1 %v6551_v5, %s9293_s22 }
0x3f64   : > { %5181 = vrot.lane.b32.xlu1 %v6556_v9, %s9293_s22 }
0x3fdc   : > { %v5268_v12 = vpop.xlane.xlu1 %5267 }
0x3fdd   : > { %7974 = vrcp.f32 %v5268_v12 }
0x3fe0   : > { %v4989_v14 = vpop.permute.xlu1 %4988 }
0x3fe1   : > { %4991 = vst.msk [vmem:[#allocation3] sm:$0x3] %vm611_vm4, %v4989_v14 }
0x3fe4   : > { %v5182_v17 = vpop.permute.xlu1 %5181 }
0x3fe5   : > { %5184 = vst.msk [vmem:[#allocation3 + $0x2] sm:$0x3] %vm611_vm4, %v5182_v17 }
0x3fe7   : > { %v7975_v18 = vpop.eup %7974 }
0x3fe8   : > { %v5270_v19 = vmul.f32 %v7975_v18, %v7973_v2 }
0x3fea   : > { %v5278_v21 = vrot.slane %v5270_v19, %v8464_v45 }
0x3fec   : > { %v5286_v22 = vrot.slane %v5278_v21, %v8464_v45  ;;  %v5279_v13 = vcombine.high %v5278_v21, %v5278_v21 }
0x3fee   : > { %7364 = vmatmul.mubr.msk.f32.vlgmr.msra.gmra.mrb[52].mxu0 %vm937_vm5, %v5286_v22  ;;  %v5293_v23 = vrot.slane %v5279_v13, %v8464_v45 }
0x3fef   : > { %7711 = vmatpush3.bf16.msra.mxu0 %v8479_v54  ;;  %7379 = vmatprep.mubr.msk.f32.mxu0 %vm8130_vm1, %v8131_v10 }
0x3ff0   : > { %7369 = vmatmul.mubr.msk.f32.vlgmr.msra.gmra.mrb[52].mxu1 %vm937_vm5, %v5293_v23  ;;  %7712 = vmatprep.subr.bf16.mxu0 %v8129_v7 }
0x3ff1   : > { %7717 = vmatpush3.bf16.msra.mxu1 %v8482_v57  ;;  %7390 = vmatprep.mubr.msk.f32.mxu1 %vm8130_vm1, %v8131_v10 }
0x3ff2   : > { %7718 = vmatprep.subr.bf16.mxu1 %v8129_v7 }
0x3ff3   : > { %7714 = vmatpush3.bf16.msra.mxu0 %v8512_v0 }
0x3ff5   : > { %7720 = vmatpush3.bf16.msra.mxu1 %v8498_v61 }
0x3ff8   : > { %7391 = vmatmul.mubr.msk.f32.vlgmr.msra.gmra.mrb[54].mxu1 %vm502_vm2, %v5187_v51 }
0x40c1   : > { %v5362_v24 = vpop.f32.mrb[52].mxu0 }
0x40c2   : > { %v7365_v26 = vpop.f32.mrb[53].mxu0 }
0x40c3   : > { %v5434_v27 = vpop.f32.mrb[52].mxu1 }
0x40c4   : > { %v5440_v20 = vrot.slane %v5434_v27, 7  ;;  %v7370_v29 = vpop.f32.mrb[53].mxu1 }
0x40c6   : > { %v5441_v30 = vsel %vm1085_vm6, %v5440_v20, %v5362_v24 }
0x40c7   : > { %7380 = vmatmul.mubr.msk.f32.vlgmr.msra.gmra.mrb[54].mxu0 %vm502_vm2, %v5441_v30 }
0x40cb   : > { %v5580_v28 = vpop.f32.mrb[54].mxu1 }
0x40cc   : > { %v7392_v35 = vpop.f32.mrb[55].mxu1 }
0x419a   : > { %v5510_v25 = vpop.f32.mrb[54].mxu0 }
0x419b   : > { %v5581_v37 = vadd.f32 %v5580_v28, %v5510_v25  ;;  %v7381_v38 = vpop.f32.mrb[55].mxu0 }
0x419d   : > { %v5584_v42 = vadd.f32 %v8520_v16, %v5581_v37 }
0x419f   : > { %7976 = vtanh.f32 %v5584_v42 }
0x41a4   : > { %5591 = sbr.rel (%p6563_p7) target bundleno = 16811 (0x41ab), region = 104 }
0x41a9   : > { %v7977_v43 = vpop.eup %7976 }
0x41aa   : > { %6562 = vst.msk [vmem:[%s8308_s24 + $0xc] sm:$0x3] %vm611_vm4, %v7977_v43 }
0x41ab PF: > { %s5596_s15 = sadd.s32 7, %s8297_s14  ;;  %7721 = vmatprep.subr.bf16.mxu0 %v8129_v7  ;;  %7401 = vmatprep.mubr.msk.f32.mxu0 %vm8130_vm1, %v8131_v10  ;;  %v5597_v46 = vld [vmem:[#allocation2] sm:$0x3]  ;;  %v5598_v50 = vld [vmem:[#allocation3] sm:$0x3] }
0x41ac   : > { %7723 = vmatpush3.bf16.msra.mxu0 %v8334_v8  ;;  %7727 = vmatprep.subr.bf16.mxu1 %v8129_v7  ;;  %v6564_v8 = vld [vmem:[%s8306_s17 + $0xe] sm:$0x3]  ;;  %v5717_v59 = vld [vmem:[#allocation2 + $0x2] sm:$0x3]  ;;  %v5718_v1 = vld [vmem:[#allocation3 + $0x2] sm:$0x3] }
0x41ad   : > { %7724 = vmatprep.subr.bf16.mxu0 %v8129_v7  ;;  %7729 = vmatpush3.bf16.msra.mxu1 %v8363_v32  ;;  %s9294_s17 = smov 96   ;;  %p6580_p8 = scmp.ne.s32.totalorder %s5596_s15, 8 }
0x41ae   : > { %7730 = vmatprep.subr.bf16.mxu1 %v8129_v7  ;;  %7412 = vmatprep.mubr.msk.f32.mxu1 %vm8130_vm1, %v8131_v10 }
0x41b0   : > { %7726 = vmatpush3.bf16.msra.mxu0 %v8345_v11 }
0x41b1   : > { %7733 = vmatprep.subr.bf16.mxu0 %v8129_v7  ;;  %7732 = vmatpush3.bf16.msra.mxu1 %v8377_v39 }
0x41b2   : > { %7739 = vmatprep.subr.bf16.mxu1 %v8129_v7 }
0x41b3   : > { %7402 = vmatmul.mubr.msk.f32.vlgmr.msra.gmra.mrb[56].mxu0 %vm502_vm2, %v5597_v46 }
0x41b4   : > { %7735 = vmatpush3.bf16.msra.mxu0 %v8368_v36  ;;  %7423 = vmatprep.mubr.msk.f32.mxu0 %vm8130_vm1, %v8131_v10 }
0x41b5   : > { %7736 = vmatprep.subr.bf16.mxu0 %v8129_v7  ;;  %7413 = vmatmul.mubr.msk.f32.vlgmr.msra.gmra.mrb[56].mxu1 %vm502_vm2, %v5717_v59 }
0x41b6   : > { %7741 = vmatpush3.bf16.msra.mxu1 %v8414_v4  ;;  %7434 = vmatprep.mubr.msk.f32.mxu1 %vm8130_vm1, %v8131_v10 }
0x41b7   : > { %7742 = vmatprep.subr.bf16.mxu1 %v8129_v7 }
0x41b8   : > { %7738 = vmatpush3.bf16.msra.mxu0 %v8381_v40 }
0x41b9   : > { %7437 = vmatprep.subr.mxu0 %v8131_v10 }
0x41ba   : > { %7744 = vmatpush3.bf16.msra.mxu1 %v8420_v6 }
0x41bb   : > { %7442 = vmatprep.subr.mxu1 %v8131_v10 }
0x4286   : > { %v5670_v11 = vpop.f32.mrb[56].mxu0 }
0x4287   : > { %v5674_v32 = vadd.f32 %v6564_v8, %v5670_v11  ;;  %v7403_v48 = vpop.f32.mrb[57].mxu0 }
0x4288   : > { %v5788_v4 = vpop.f32.mrb[56].mxu1 }
0x4289   : > { %7978 = vtanh.f32 %v5674_v32  ;;  %v6566_v36 = vmul.f32 -1.442695, %v5674_v32  ;;  %v7414_v2 = vpop.f32.mrb[57].mxu1 }
0x428b   : > { %7980 = vpow2.f32 %v6566_v36 }
0x4293   : > { %v7979_v39 = vpop.eup %7978 }
0x4294   : > { %5688 = vrot.lane.b32.xlu0 %v7979_v39, %s8132_s0 }
0x4295   : > { %v7981_v41 = vpop.eup %7980 }
0x4296   : > { %v5678_v51 = vadd.f32 1.0, %v7981_v41 }
0x4298   : > { %5683 = vrot.lane.b32.xlu0 %v5598_v50, %s8133_s23  ;;  %7982 = vrcp.f32 %v5678_v51 }
0x42a2   : > { %v7983_v52 = vpop.eup %7982 }
0x4306   : > { %v5689_v40 = vpop.permute.xlu0 %5688 }
0x4307   : > { %v5691_v53 = vmul.f32 %v7983_v52, %v5689_v40 }
0x4309   : > { %5693 = vrot.lane.b32.xlu1 %v5691_v53, %s8133_s23 }
0x430a   : > { %v5684_v55 = vpop.permute.xlu0 %5683 }
0x430b   : > { %v5686_v47 = vmul.f32 %v7983_v52, %v5684_v55 }
0x437b   : > { %v5694_v56 = vpop.permute.xlu1 %5693 }
0x437c   : > { %v9100_v58 = vadd.f32 %v5694_v56, %v5686_v47 }
0x437e   : > { %7984 = vtanh.f32 %v9100_v58  ;;  %v6568_v8 = vclamps-f32 %v9100_v58, 50.0 }
0x4388   : > { %v7985_v60 = vpop.eup %7984 }
0x4389   : > { %5699 = vrot.lane.b32.xlu1 %v7985_v60, %s8132_s0 }
0x43fb   : > { %v5700_v62 = vpop.permute.xlu1 %5699 }
0x43fc   : > { %v5702_v63 = vmul.f32 %v7983_v52, %v5700_v62 }
0x43fe   : > { %5793 = vrot.lane.b32.xlu0 %v5702_v63, %s8133_s23  ;;  %v6567_v37 = vclamps-f32 %v5702_v63, 50.0 }
0x4402   : > { %5876 = vrot.lane.b32.xlu0 %v5718_v1, %s8133_s23 }
0x4470   : > { %v5794_v3 = vpop.permute.xlu0 %5793 }
0x4471   : > { %7424 = vmatmul.mubr.msk.f32.vlgmr.msra.gmra.mrb[58].mxu0 %vm502_vm2, %v5794_v3 }
0x4472   : > { %7438 = vmatpush3.msra.mxu0 %v8456_v34  ;;  %7439 = vmatprep.mubr.msk.f32.mxu0 %vm8130_vm1, %v8131_v10 }
0x4473   : > { %7745 = vmatprep.subr.bf16.mxu0 %v8129_v7 }
0x4474   : > { %v5877_v13 = vpop.permute.xlu0 %5876 }
0x4544   : > { %v5863_v6 = vpop.f32.mrb[58].mxu0 }
0x4545   : > { %v5864_v5 = vadd.f32 %v5863_v6, %v5788_v4  ;;  %v7425_v9 = vpop.f32.mrb[59].mxu0 }
0x4547   : > { %v5867_v12 = vadd.f32 %v8400_v49, %v5864_v5 }
0x4549   : > { %7986 = vtanh.f32 %v5867_v12  ;;  %v6571_v17 = vmul.f32 -1.442695, %v5867_v12 }
0x454b   : > { %7988 = vpow2.f32 %v6571_v17 }
0x4553   : > { %v7987_v14 = vpop.eup %7986 }
0x4554   : > { %5881 = vrot.lane.b32.xlu1 %v7987_v14, %s8132_s0 }
0x4555   : > { %v7989_v18 = vpop.eup %7988 }
0x4556   : > { %v5871_v19 = vadd.f32 1.0, %v7989_v18 }
0x4558   : > { %7990 = vrcp.f32 %v5871_v19 }
0x4562   : > { %v7991_v34 = vpop.eup %7990 }
0x4563   : > { %v5879_v23 = vmul.f32 %v7991_v34, %v5877_v13 }
0x45c6   : > { %v5882_v21 = vpop.permute.xlu1 %5881 }
0x45c7   : > { %v5884_v22 = vmul.f32 %v7991_v34, %v5882_v21 }
0x45c9   : > { %5886 = vrot.lane.b32.xlu1 %v5884_v22, %s8133_s23 }
0x463b   : > { %v5887_v24 = vpop.permute.xlu1 %5886 }
0x463c   : > { %v5889_v26 = vadd.f32 %v5887_v24, %v5879_v23 }
0x463e   : > { %7992 = vtanh.f32 %v5889_v26  ;;  %v6573_v11 = vclamps-f32 %v5889_v26, 50.0 }
0x4648   : > { %v7993_v49 = vpop.eup %7992 }
0x4649   : > { %5892 = vrot.lane.b32.xlu0 %v7993_v49, %s8132_s0 }
0x46bb   : > { %v5893_v27 = vpop.permute.xlu0 %5892 }
0x46bc   : > { %v5895_v20 = vmul.f32 %v7991_v34, %v5893_v27 }
0x46be   : > { %5911 = vrot.lane.b32.xlu1 %v5895_v20, %s8133_s23  ;;  %v6572_v38 = vclamps-f32 %v5895_v20, 50.0 }
0x4730   : > { %v5912_v29 = vpop.permute.xlu1 %5911 }
0x4731   : > { %7435 = vmatmul.mubr.msk.f32.vlgmr.msra.gmra.mrb[58].mxu1 %vm502_vm2, %v5912_v29 }
0x4732   : > { %7443 = vmatpush3.msra.mxu1 %v8451_v33  ;;  %7444 = vmatprep.mubr.msk.f32.mxu1 %vm8130_vm1, %v8131_v10 }
0x4733   : > { %7751 = vmatprep.subr.bf16.mxu1 %v8129_v7 }
0x4804   : > { %v5981_v30 = vpop.f32.mrb[58].mxu1 }
0x4805   : > { %v5982_v28 = vadd.f32 %v8436_v15, %v5981_v30  ;;  %v7436_v35 = vpop.f32.mrb[59].mxu1 }
0x4807   : > { %v5985_v25 = vsel %vm902_vm3, %v5982_v28, -inf }
0x4808   : > { %5986 = vmax.xlane.f32.xlu0 %v5985_v25 }
0x481e   : > { %5706 = vrot.lane.b32.xlu0 %v6567_v37, %s8133_s23 }
0x4822   : > { %5899 = vrot.lane.b32.xlu0 %v6572_v38, %s8133_s23 }
0x4895   : > { %v5987_v42 = vpop.xlane.xlu0 %5986 }
0x4896   : > { %v5988_v33 = vsub.f32 %v5982_v28, %v5987_v42 }
0x4898   : > { %v5989_v43 = vmul.f32 1.442695, %v5988_v33 }
0x4899   : > { %v5707_v31 = vpop.permute.xlu0 %5706 }
0x489a   : > { %7994 = vpow2.f32 %v5989_v43  ;;  %5709 = vst.msk [vmem:[#allocation2] sm:$0x3] %vm611_vm4, %v5707_v31 }
0x489d   : > { %v5900_v44 = vpop.permute.xlu0 %5899 }
0x489e   : > { %5902 = vst.msk [vmem:[#allocation2 + $0x2] sm:$0x3] %vm611_vm4, %v5900_v44 }
0x48a1   : > { %v6317_v60 = vld [vmem:[#allocation2] sm:$0x3] (!%p6580_p8) }
0x48a2   : > { %6319 = vst.msk [vmem:[#allocation8] sm:$0x3] (!%p6580_p8), %vm611_vm4, %v6317_v60 }
0x48a4   : > { %v7995_v15 = vpop.eup %7994 }
0x48a5   : > { %v5991_v46 = vsel %vm902_vm3, %v7995_v15, 0.0  ;;  %v6318_v62 = vld [vmem:[#allocation2 + $0x2] sm:$0x3] (!%p6580_p8) }
0x48a6   : > { %5992 = vadd.xlane.f32.xlu1 %v5991_v46  ;;  %6320 = vst.msk [vmem:[#allocation8 + $0x2] sm:$0x3] (!%p6580_p8), %vm611_vm4, %v6318_v62 }
0x48b7   : > { %5713 = vrot.lane.b32.xlu1 %v6568_v8, %s9294_s17 }
0x48bb   : > { %5906 = vrot.lane.b32.xlu1 %v6573_v11, %s9294_s17 }
0x4933   : > { %v5993_v32 = vpop.xlane.xlu1 %5992 }
0x4934   : > { %7996 = vrcp.f32 %v5993_v32 }
0x4937   : > { %v5714_v48 = vpop.permute.xlu1 %5713 }
0x4938   : > { %5716 = vst.msk [vmem:[#allocation3] sm:$0x3] %vm611_vm4, %v5714_v48 }
0x493b   : > { %v5907_v39 = vpop.permute.xlu1 %5906 }
0x493c   : > { %5909 = vst.msk [vmem:[#allocation3 + $0x2] sm:$0x3] %vm611_vm4, %v5907_v39 }
0x493e   : > { %v7997_v50 = vpop.eup %7996 }
0x493f   : > { %v5995_v36 = vmul.f32 %v7997_v50, %v7995_v15 }
0x4941   : > { %v6003_v41 = vrot.slane %v5995_v36, %v8464_v45 }
0x4943   : > { %v6011_v51 = vrot.slane %v6003_v41, %v8464_v45  ;;  %v6004_v52 = vcombine.high %v6003_v41, %v6003_v41 }
0x4945   : > { %7440 = vmatmul.mubr.msk.f32.vlgmr.msra.gmra.mrb[60].mxu0 %vm937_vm5, %v6011_v51  ;;  %v6018_v40 = vrot.slane %v6004_v52, %v8464_v45 }
0x4946   : > { %7747 = vmatpush3.bf16.msra.mxu0 %v8479_v54  ;;  %7455 = vmatprep.mubr.msk.f32.mxu0 %vm8130_vm1, %v8131_v10 }
0x4947   : > { %7445 = vmatmul.mubr.msk.f32.vlgmr.msra.gmra.mrb[60].mxu1 %vm937_vm5, %v6018_v40  ;;  %7748 = vmatprep.subr.bf16.mxu0 %v8129_v7 }
0x4948   : > { %7753 = vmatpush3.bf16.msra.mxu1 %v8482_v57  ;;  %7466 = vmatprep.mubr.msk.f32.mxu1 %vm8130_vm1, %v8131_v10 }
0x4949   : > { %7754 = vmatprep.subr.bf16.mxu1 %v8129_v7 }
0x494a   : > { %7750 = vmatpush3.bf16.msra.mxu0 %v8512_v0 }
0x494c   : > { %7756 = vmatpush3.bf16.msra.mxu1 %v8498_v61 }
0x494f   : > { %7467 = vmatmul.mubr.msk.f32.vlgmr.msra.gmra.mrb[62].mxu1 %vm502_vm2, %v5912_v29 }
0x4a18   : > { %v6087_v45 = vpop.f32.mrb[60].mxu0 }
0x4a19   : > { %v7441_v54 = vpop.f32.mrb[61].mxu0 }
0x4a1a   : > { %v6159_v53 = vpop.f32.mrb[60].mxu1 }
0x4a1b   : > { %v6165_v55 = vrot.slane %v6159_v53, 7  ;;  %v7446_v47 = vpop.f32.mrb[61].mxu1 }
0x4a1d   : > { %v6166_v56 = vsel %vm1085_vm6, %v6165_v55, %v6087_v45 }
0x4a1e   : > { %7456 = vmatmul.mubr.msk.f32.vlgmr.msra.gmra.mrb[62].mxu0 %vm502_vm2, %v6166_v56 }
0x4a22   : > { %v6305_v57 = vpop.f32.mrb[62].mxu1 }
0x4a23   : > { %v7468_v10 = vpop.f32.mrb[63].mxu1 }
0x4af1   : > { %v6235_v58 = vpop.f32.mrb[62].mxu0 }
0x4af2   : > { %v6306_v7 = vadd.f32 %v6305_v57, %v6235_v58  ;;  %v7457_v59 = vpop.f32.mrb[63].mxu0 }
0x4af4   : > { %v6309_v0 = vadd.f32 %v8520_v16, %v6306_v7 }
0x4af6   : > { %7998 = vtanh.f32 %v6309_v0 }
0x4afb   : > { %6316 = sbr.rel (%p6580_p8) target bundleno = 19202 (0x4b02), region = 108 }
0x4b00   : > { %v7999_v61 = vpop.eup %7998 }
0x4b01   : > { %6579 = vst.msk [vmem:[%s8308_s24 + $0xe] sm:$0x3] %vm611_vm4, %v7999_v61 }
0x4b02 PF: > { %s6588_s0 = sshll.u32 %s8230_s29, 8  ;;  %s6335_s14 = sshll.u32 %s8308_s24, 4  ;;  %s9172_s14 = int_to_ptr.vmem [resolvable:$true] %s6335_s14 }
0x4b03   : > { %s9169_s30 = scalar_lea.hbm %s9255_s12, %s6588_s0  ;;  %s9295_s16 = sand.u32 1, %s8116_s26  }
0x4b04   : > { %s9176_s27 = scalar_lea.sflag [#allocation6], %s9295_s16  ;;  %s8028_s6 = scalar_lea.vmem %s9172_s14, 256 }
0x4b05   : > { %p8029_p12 = scmp.ne.s32.totalorder %s9172_s14, %s8028_s6  ;;  %p9296_p0 = scmp.ne.s32.totalorder %s9278_s18, 0 }
0x4b06   : > { %s8136_s22 = smov [#allocation7]  }
0x4b07   : > { %p8030_p3 = pnand %p8029_p12, %p9296_p0  ;;  %s8032_s15 = sshll.u32 %s8136_s22, 4  ;;  %s8033_s15 = int_to_ptr.vmem [resolvable:$false] %s8032_s15 }
0x4b08   : > { %s8034_s17 = scalar_lea.vmem %s8033_s15, 512  ;;  %p8035_p5 = scmp.lt.s32.totalorder %s9172_s14, %s8033_s15 }
0x4b09   : > { %p8031_p2 = pneg %p8030_p3  ;;  %p8036_p6 = scmp.lt.s32.totalorder %s8034_s17, %s8028_s6 }
0x4b0b   : > { %p8037_p9 = por %p8036_p6, %p8035_p5 }
0x4b0d   : > { %p8038_p10 = pnand %p8037_p9, %p8031_p2 }
0x4b0f   : > { %8041 = shalt.err (!%p8038_p10)
}
0x4b10   : > { %s8042_s24 = scalar_lea.hbm %s9169_s30, 256  ;;  %s8046_s21 = scalar_lea.hbm %s9255_s12, 512 }
0x4b11   : > { %p8043_p11 = scmp.ne.s32.totalorder %s9169_s30, %s8042_s24  ;;  %p8047_p4 = scmp.lt.u32.totalorder %s9169_s30, %s9255_s12 }
0x4b12   : > { %p8048_p7 = scmp.lt.u32.totalorder %s8046_s21, %s8042_s24  ;;  %p8050_p12 = scmp.lt.u32.totalorder %s8042_s24, %s9169_s30 }
0x4b13   : > { %p8044_p13 = pnand %p8043_p11, %p9296_p0 }
0x4b14   : > { %p8049_p8 = por %p8048_p7, %p8047_p4 }
0x4b15   : > { %p8045_p1 = pneg %p8044_p13 }
0x4b16   : > { %p8051_p3 = por %p8050_p12, %p8049_p8 }
0x4b18   : > { %p8052_p2 = pnand %p8051_p3, %p8045_p1 }
0x4b1a   : > { %8055 = shalt.err (!%p8052_p2)
}
0x4b1b   : > { %s8137_s6 = smov 2   ;;  %s8138_s15 = smov [#allocation8]  }
0x4b1c   : > { %7761 = dma.vmem_to_hbm [thread:$0]  (%p9296_p0), %s9172_s14, 256, %s9169_s30, %s9176_s27, %s8133_s23, %s8133_s23, %s8137_s6  }
0x4b1d   : > { %s6348_s17 = sshll.u32 %s8138_s15, 4  ;;  %p9297_p6 = scmp.eq.s32.totalorder %s8230_s29, 1  ;;  %s6349_s17 = int_to_ptr.vmem [resolvable:$true] %s6348_s17 }
0x4b1e   : > { %s8056_s0 = scalar_lea.vmem %s6349_s17, 64  ;;  %p8063_p11 = scmp.lt.s32.totalorder %s6349_s17, %s6349_s17 }
0x4b1f   : > { %p8057_p5 = scmp.ne.s32.totalorder %s6349_s17, %s8056_s0  ;;  %p8064_p13 = scmp.lt.s32.totalorder %s8056_s0, %s8056_s0 }
0x4b21   : > { %p8058_p9 = pnand %p8057_p5, %p9297_p6  ;;  %p8065_p1 = por %p8064_p13, %p8063_p11 }
0x4b23   : > { %p8059_p10 = pneg %p8058_p9 }
0x4b25   : > { %p8066_p4 = pnand %p8065_p1, %p8059_p10 }
0x4b27   : > { %8069 = shalt.err (!%p8066_p4)
}
0x4b28   : > { %s8070_s20 = scalar_lea.hbm %s9256_s13, 64  ;;  %p9298_p7 = pmov %p9297_p6 }
0x4b29   : > { %p8071_p0 = scmp.ne.s32.totalorder %s9256_s13, %s8070_s20  ;;  %p8076_p3 = scmp.lt.u32.totalorder %s8070_s20, %s9256_s13 }
0x4b2b   : > { %p8072_p8 = pnand %p8071_p0, %p9298_p7 }
0x4b2d   : > { %p8073_p12 = pneg %p8072_p8 }
0x4b2f   : > { %p8078_p2 = pnand %p8076_p3, %p8073_p12 }
0x4b31   : > { %8081 = shalt.err (!%p8078_p2)
}
0x4b32   : > { %p9299_p5 = pmov %p9297_p6 }
0x4b34   : > { %7763 = dma.vmem_to_hbm [thread:$0]  (%p9299_p5), %s6349_s17, 64, %s9256_s13, [#allocation9], %s8133_s23, %s8133_s23, %s8137_s6  }
0x4b35   : > { %p9300_p6 = pmov %p9299_p5 }
0x4b36   : > { %p9301_p9 = pmov %p9299_p5 }
0x4b37   : > { %8103 = dma.done.wait (%p9300_p6), [#allocation9], 64  }
0x4b38   : > { %8105 = vsyncadd (%p9301_p9), [#allocation9], 4294967232 }
0x4b39 PF: > { %p7779_p10 = scmp.ge.s32.totalorder %s8124_s28, 2  ;;  %s6367_s15 = sand.u32 1, %s8112_s25  }
0x4b3a   : > { %p9302_p11 = scmp.ne.s32.totalorder %s9279_s19, 0  ;;  %s6368_s0 = scalar_lea.sflag [#allocation6], %s6367_s15 }
0x4b3c   : > { %p7772_p13 = pnand %p7779_p10, %p9302_p11 }
0x4b3e   : > { %8107 = dma.done.wait (!%p7772_p13), %s6368_s0, 256  }
0x4b3f   : > { %8109 = vsyncadd (!%p7772_p13), %s6368_s0, 4294967040  ;;  %s9303_s28 = sld [smem:[#allocation14_spill]]  ;;  %s9304_s18 = sld [smem:[#allocation13_spill]] }
0x4b40   : > { %s9305_s27 = sld [smem:[#allocation15_spill]]  ;;  %s9306_s25 = smov %s8116_s26 }
0x4b45   : > { %p26_p1 = scmp.ge.s32.totalorder %s9303_s28, 4   ;;  %s9307_s26 = smov %s9304_s18 }
0x4b47   :  { %28 = sbr.rel (!%p26_p1) target bundleno = 8 (0x8), region = 168 }
0x4b4e   :  { %6373 = vsyncpa [#allocation5], 1 }
0x4b4f   :  { %6375 = vsyncpa [#allocation5 + $0x1], 1 }
0x4b50   :  { %6376 = vsyncpa [#allocation6], 1 }
0x4b51   :  { %6378 = vsyncpa [#allocation6 + $0x1], 1 }
0x4b52   :  { %6379 = vsyncpa [#allocation9], 1 }

</bundles_post_ra>
